<compile_context>
chip_gen: v6e
topology: v6e:2x2x1
jax: 0.10.0
libtpu: 0.0.40
codegen_flags: <defaults>
</compile_context>

<pallas_src>
import math
import jax
import jax.numpy as jnp
from jax.experimental import pallas as pl
from jax.experimental.pallas import tpu as pltpu

# -------------------- model hyper-parameters --------------------
D_MODEL = 32
NHEAD = 4
HEAD_DIM = D_MODEL // NHEAD
DIM_FF = 64
NUM_LAYERS = 2
LN_EPS = 1e-5


# -------------------- fused decoder kernel --------------------
def _make_decoder_kernel(B, S_c, S_s):
    D = D_MODEL
    scale = 1.0 / math.sqrt(HEAD_DIM)

    def layer_norm(y, g, b):
        mu = jnp.mean(y, axis=-1, keepdims=True)
        var = jnp.mean(jnp.square(y - mu), axis=-1, keepdims=True)
        return (y - mu) * jax.lax.rsqrt(var + LN_EPS) * g + b

    def attend(q3, kh_list, vh_list):
        """q3: (B, Sq, D); kh/vh: per-head masked (B, Sk, D). Returns (B, Sq, D)."""
        acc = jnp.zeros(q3.shape, jnp.float32)
        for kh, vh in zip(kh_list, vh_list):
            # masked K zeroes the other heads' dims, so a full-D contraction
            # equals the per-head (HEAD_DIM) contraction -- no lane slicing.
            s = jnp.einsum('bqd,bkd->bqk', q3, kh,
                           preferred_element_type=jnp.float32) * scale
            s = s - jnp.max(s, axis=-1, keepdims=True)
            p = jnp.exp(s)
            p = p * pl.reciprocal(jnp.sum(p, axis=-1, keepdims=True), approx=True)
            # masked V deposits the result directly into this head's lanes,
            # so summing over heads replaces the concatenate.
            acc = acc + jnp.einsum('bqk,bkd->bqd', p, vh,
                                   preferred_element_type=jnp.float32)
        return acc

    def kernel(content_ref, style_ref, cpos_ref, spos_ref,
               sa_wqk_ref, sa_bqk_ref, sa_wv_ref, sa_bv_ref, sa_wo_ref, sa_bo_ref,
               ca_wq_ref, ca_bq_ref, ca_wk_ref, ca_bk_ref,
               ca_wv_ref, ca_bv_ref, ca_wo_ref, ca_bo_ref,
               w1_ref, b1_ref, w2_ref, b2_ref,
               ln1_g_ref, ln1_b_ref, ln2_g_ref, ln2_b_ref,
               ln3_g_ref, ln3_b_ref, lnf_g_ref, lnf_b_ref,
               o_ref):
        # ---- load activations / weights once (hoisted out of the layer loop) ----
        x = content_ref[...]                      # (B*S_c, D)
        cpos = cpos_ref[...]                      # (B*S_c, D)
        style = style_ref[...]                    # (B*S_s, D)
        spos = spos_ref[...]                      # (B*S_s, D)

        sa_wqk = sa_wqk_ref[...]; sa_bqk = sa_bqk_ref[...]
        sa_wv = sa_wv_ref[...];   sa_bv = sa_bv_ref[...]
        sa_wo = sa_wo_ref[...];   sa_bo = sa_bo_ref[...]
        ca_wq = ca_wq_ref[...];   ca_bq = ca_bq_ref[...]
        ca_wo = ca_wo_ref[...];   ca_bo = ca_bo_ref[...]
        w1 = w1_ref[...]; b1 = b1_ref[...]
        w2 = w2_ref[...]; b2 = b2_ref[...]
        ln1_g = ln1_g_ref[...]; ln1_b = ln1_b_ref[...]
        ln2_g = ln2_g_ref[...]; ln2_b = ln2_b_ref[...]
        ln3_g = ln3_g_ref[...]; ln3_b = ln3_b_ref[...]
        lnf_g = lnf_g_ref[...]; lnf_b = lnf_b_ref[...]

        # per-head lane masks (compile-time constants)
        d_idx = jax.lax.broadcasted_iota(jnp.int32, (1, 1, D), 2)
        head_masks = [(d_idx >= h * HEAD_DIM) & (d_idx < (h + 1) * HEAD_DIM)
                      for h in range(NHEAD)]

        # ---- cross-attention K/V: style is layer-invariant and every layer has
        #      identical weights (copy.deepcopy at init) -> compute once ----
        kc = jnp.dot(style + spos, ca_wk_ref[...],
                     preferred_element_type=jnp.float32) + ca_bk_ref[...]
        vc = jnp.dot(style, ca_wv_ref[...],
                     preferred_element_type=jnp.float32) + ca_bv_ref[...]
        kc3 = kc.reshape(B, S_s, D)
        vc3 = vc.reshape(B, S_s, D)
        kh_cross = [jnp.where(m, kc3, 0.0) for m in head_masks]
        vh_cross = [jnp.where(m, vc3, 0.0) for m in head_masks]

        # ---- NUM_LAYERS identical layers, fully unrolled at trace time ----
        for _ in range(NUM_LAYERS):
            # -------- self attention: q = k = x + cpos, v = x --------
            qk_in = x + cpos
            qk = jnp.dot(qk_in, sa_wqk, preferred_element_type=jnp.float32) + sa_bqk
            q3 = qk[:, :D].reshape(B, S_c, D)
            k3 = qk[:, D:2 * D].reshape(B, S_c, D)
            v = jnp.dot(x, sa_wv, preferred_element_type=jnp.float32) + sa_bv
            v3 = v.reshape(B, S_c, D)
            kh_self = [jnp.where(m, k3, 0.0) for m in head_masks]
            vh_self = [jnp.where(m, v3, 0.0) for m in head_masks]
            attn = attend(q3, kh_self, vh_self).reshape(B * S_c, D)
            attn = jnp.dot(attn, sa_wo, preferred_element_type=jnp.float32) + sa_bo
            x = layer_norm(x + attn, ln1_g, ln1_b)

            # -------- cross attention: q = x + cpos, k = style + spos, v = style --------
            q2 = jnp.dot(x + cpos, ca_wq, preferred_element_type=jnp.float32) + ca_bq
            q23 = q2.reshape(B, S_c, D)
            attn2 = attend(q23, kh_cross, vh_cross).reshape(B * S_c, D)
            attn2 = jnp.dot(attn2, ca_wo, preferred_element_type=jnp.float32) + ca_bo
            x = layer_norm(x + attn2, ln2_g, ln2_b)

            # -------- feed forward --------
            h = jnp.dot(x, w1, preferred_element_type=jnp.float32) + b1
            h = jnp.maximum(h, 0.0)
            ff = jnp.dot(h, w2, preferred_element_type=jnp.float32) + b2
            x = layer_norm(x + ff, ln3_g, ln3_b)

        # ---- final LayerNorm (self.norm), no zero-residual ----
        o_ref[...] = layer_norm(x, lnf_g, lnf_b).astype(o_ref.dtype)

    return kernel


# -------------------- parameters --------------------
def init_params(key):
    ks = jax.random.split(key, 9)
    scale = 0.02
    D, F = D_MODEL, DIM_FF

    def w(k, shape):
        return (scale * jax.random.normal(k, shape)).astype(jnp.float32)

    zeros = lambda s: jnp.zeros(s, jnp.float32)
    ones = lambda s: jnp.ones(s, jnp.float32)

    # copy.deepcopy(decoder_layer) => identical weights reused for every layer.
    return dict(
        sa_wqk=w(ks[0], (D, 2 * D)), sa_bqk=zeros((1, 2 * D)),   # fused Wq|Wk
        sa_wv=w(ks[1], (D, D)),      sa_bv=zeros((1, D)),
        sa_wo=w(ks[2], (D, D)),      sa_bo=zeros((1, D)),
        ca_wq=w(ks[3], (D, D)),      ca_bq=zeros((1, D)),
        ca_wk=w(ks[4], (D, D)),      ca_bk=zeros((1, D)),
        ca_wv=w(ks[5], (D, D)),      ca_bv=zeros((1, D)),
        ca_wo=w(ks[6], (D, D)),      ca_bo=zeros((1, D)),
        w1=w(ks[7], (D, F)), b1=zeros((1, F)),
        w2=w(ks[8], (F, D)), b2=zeros((1, D)),
        ln1_g=ones((1, D)), ln1_b=zeros((1, D)),
        ln2_g=ones((1, D)), ln2_b=zeros((1, D)),
        ln3_g=ones((1, D)), ln3_b=zeros((1, D)),
        lnf_g=ones((1, D)), lnf_b=zeros((1, D)),
    )


_WEIGHT_ORDER = [
    "sa_wqk", "sa_bqk", "sa_wv", "sa_bv", "sa_wo", "sa_bo",
    "ca_wq", "ca_bq", "ca_wk", "ca_bk", "ca_wv", "ca_bv", "ca_wo", "ca_bo",
    "w1", "b1", "w2", "b2",
    "ln1_g", "ln1_b", "ln2_g", "ln2_b", "ln3_g", "ln3_b", "lnf_g", "lnf_b",
]


# -------------------- decoder forward --------------------
@jax.jit
def decoder_forward(enc_content, enc_style, params,
                    content_pos=None, style_pos=None):
    """enc_content: (S_c, B, D), enc_style: (S_s, B, D) — torch MHA layout.
       Returns (1, S_c, B, D) matching `output.unsqueeze(0)`."""
    S_c, B, D = enc_content.shape
    S_s = enc_style.shape[0]

    def flat(t):                       # (S, B, D) -> (B*S, D)
        return jnp.transpose(t, (1, 0, 2)).reshape(B * t.shape[0], D)

    x = flat(enc_content)
    style = flat(enc_style)
    cpos = flat(content_pos) if content_pos is not None else jnp.zeros_like(x)
    spos = flat(style_pos) if style_pos is not None else jnp.zeros_like(style)

    kernel = _make_decoder_kernel(B, S_c, S_s)
    inputs = [x, style, cpos, spos] + [params[k] for k in _WEIGHT_ORDER]

    vmem_spec = pl.BlockSpec(memory_space=pltpu.MemorySpace.VMEM)
    out_flat = pl.pallas_call(
        kernel,
        out_shape=jax.ShapeDtypeStruct((B * S_c, D), enc_content.dtype),
        in_specs=[vmem_spec] * len(inputs),
        out_specs=vmem_spec,
    )(*inputs)

    out = out_flat.reshape(B, S_c, D).transpose(1, 0, 2)   # (S_c, B, D)
    return out[None]                                       # unsqueeze(0)


# -------------------- main --------------------
if __name__ == "__main__":
    key = jax.random.PRNGKey(0)
    k_params, k_c, k_s, k_cp, k_sp = jax.random.split(key, 5)

    S_C, S_S, B = 8, 8, 2
    params = init_params(k_params)

    enc_content = jax.random.normal(k_c, (S_C, B, D_MODEL), jnp.float32)
    enc_style = jax.random.normal(k_s, (S_S, B, D_MODEL), jnp.float32)
    content_pos = jax.random.normal(k_cp, (S_C, B, D_MODEL), jnp.float32)
    style_pos = jax.random.normal(k_sp, (S_S, B, D_MODEL), jnp.float32)

    out = decoder_forward(enc_content, enc_style, params,
                          content_pos=content_pos, style_pos=style_pos)
    out = jax.block_until_ready(out)

    assert out.shape == (1, S_C, B, D_MODEL), out.shape
    assert bool(jnp.all(jnp.isfinite(out)))
    print("KERNEL_OK")
</pallas_src>

<mosaic_0001>
module attributes {stable_mosaic.version = 11 : i64} {
  func.func @kernel(%arg0: memref<16x32xf32, #tpu.memory_space<vmem>>, %arg1: memref<16x32xf32, #tpu.memory_space<vmem>>, %arg2: memref<16x32xf32, #tpu.memory_space<vmem>>, %arg3: memref<16x32xf32, #tpu.memory_space<vmem>>, %arg4: memref<32x64xf32, #tpu.memory_space<vmem>>, %arg5: memref<1x64xf32, #tpu.memory_space<vmem>>, %arg6: memref<32x32xf32, #tpu.memory_space<vmem>>, %arg7: memref<1x32xf32, #tpu.memory_space<vmem>>, %arg8: memref<32x32xf32, #tpu.memory_space<vmem>>, %arg9: memref<1x32xf32, #tpu.memory_space<vmem>>, %arg10: memref<32x32xf32, #tpu.memory_space<vmem>>, %arg11: memref<1x32xf32, #tpu.memory_space<vmem>>, %arg12: memref<32x32xf32, #tpu.memory_space<vmem>>, %arg13: memref<1x32xf32, #tpu.memory_space<vmem>>, %arg14: memref<32x32xf32, #tpu.memory_space<vmem>>, %arg15: memref<1x32xf32, #tpu.memory_space<vmem>>, %arg16: memref<32x32xf32, #tpu.memory_space<vmem>>, %arg17: memref<1x32xf32, #tpu.memory_space<vmem>>, %arg18: memref<32x64xf32, #tpu.memory_space<vmem>>, %arg19: memref<1x64xf32, #tpu.memory_space<vmem>>, %arg20: memref<64x32xf32, #tpu.memory_space<vmem>>, %arg21: memref<1x32xf32, #tpu.memory_space<vmem>>, %arg22: memref<1x32xf32, #tpu.memory_space<vmem>>, %arg23: memref<1x32xf32, #tpu.memory_space<vmem>>, %arg24: memref<1x32xf32, #tpu.memory_space<vmem>>, %arg25: memref<1x32xf32, #tpu.memory_space<vmem>>, %arg26: memref<1x32xf32, #tpu.memory_space<vmem>>, %arg27: memref<1x32xf32, #tpu.memory_space<vmem>>, %arg28: memref<1x32xf32, #tpu.memory_space<vmem>>, %arg29: memref<1x32xf32, #tpu.memory_space<vmem>>, %arg30: memref<16x32xf32, #tpu.memory_space<vmem>>) attributes {dimension_semantics = [], scalar_prefetch = 0 : i64, scratch_operands = 0 : i64, tpu.core_type = #tpu.core_type<tc>} {
    %c0 = arith.constant 0 : index
    %c0_0 = arith.constant 0 : index
    %0 = vector.load %arg0[%c0, %c0_0] : memref<16x32xf32, #tpu.memory_space<vmem>>, vector<16x32xf32>
    %c0_1 = arith.constant 0 : index
    %c0_2 = arith.constant 0 : index
    %1 = vector.load %arg2[%c0_1, %c0_2] : memref<16x32xf32, #tpu.memory_space<vmem>>, vector<16x32xf32>
    %c0_3 = arith.constant 0 : index
    %c0_4 = arith.constant 0 : index
    %2 = vector.load %arg1[%c0_3, %c0_4] : memref<16x32xf32, #tpu.memory_space<vmem>>, vector<16x32xf32>
    %c0_5 = arith.constant 0 : index
    %c0_6 = arith.constant 0 : index
    %3 = vector.load %arg3[%c0_5, %c0_6] : memref<16x32xf32, #tpu.memory_space<vmem>>, vector<16x32xf32>
    %c0_7 = arith.constant 0 : index
    %c0_8 = arith.constant 0 : index
    %4 = vector.load %arg4[%c0_7, %c0_8] : memref<32x64xf32, #tpu.memory_space<vmem>>, vector<32x64xf32>
    %c0_9 = arith.constant 0 : index
    %c0_10 = arith.constant 0 : index
    %5 = vector.load %arg5[%c0_9, %c0_10] : memref<1x64xf32, #tpu.memory_space<vmem>>, vector<1x64xf32>
    %c0_11 = arith.constant 0 : index
    %c0_12 = arith.constant 0 : index
    %6 = vector.load %arg6[%c0_11, %c0_12] : memref<32x32xf32, #tpu.memory_space<vmem>>, vector<32x32xf32>
    %c0_13 = arith.constant 0 : index
    %c0_14 = arith.constant 0 : index
    %7 = vector.load %arg7[%c0_13, %c0_14] : memref<1x32xf32, #tpu.memory_space<vmem>>, vector<1x32xf32>
    %c0_15 = arith.constant 0 : index
    %c0_16 = arith.constant 0 : index
    %8 = vector.load %arg8[%c0_15, %c0_16] : memref<32x32xf32, #tpu.memory_space<vmem>>, vector<32x32xf32>
    %c0_17 = arith.constant 0 : index
    %c0_18 = arith.constant 0 : index
    %9 = vector.load %arg9[%c0_17, %c0_18] : memref<1x32xf32, #tpu.memory_space<vmem>>, vector<1x32xf32>
    %c0_19 = arith.constant 0 : index
    %c0_20 = arith.constant 0 : index
    %10 = vector.load %arg10[%c0_19, %c0_20] : memref<32x32xf32, #tpu.memory_space<vmem>>, vector<32x32xf32>
    %c0_21 = arith.constant 0 : index
    %c0_22 = arith.constant 0 : index
    %11 = vector.load %arg11[%c0_21, %c0_22] : memref<1x32xf32, #tpu.memory_space<vmem>>, vector<1x32xf32>
    %c0_23 = arith.constant 0 : index
    %c0_24 = arith.constant 0 : index
    %12 = vector.load %arg16[%c0_23, %c0_24] : memref<32x32xf32, #tpu.memory_space<vmem>>, vector<32x32xf32>
    %c0_25 = arith.constant 0 : index
    %c0_26 = arith.constant 0 : index
    %13 = vector.load %arg17[%c0_25, %c0_26] : memref<1x32xf32, #tpu.memory_space<vmem>>, vector<1x32xf32>
    %c0_27 = arith.constant 0 : index
    %c0_28 = arith.constant 0 : index
    %14 = vector.load %arg18[%c0_27, %c0_28] : memref<32x64xf32, #tpu.memory_space<vmem>>, vector<32x64xf32>
    %c0_29 = arith.constant 0 : index
    %c0_30 = arith.constant 0 : index
    %15 = vector.load %arg19[%c0_29, %c0_30] : memref<1x64xf32, #tpu.memory_space<vmem>>, vector<1x64xf32>
    %c0_31 = arith.constant 0 : index
    %c0_32 = arith.constant 0 : index
    %16 = vector.load %arg20[%c0_31, %c0_32] : memref<64x32xf32, #tpu.memory_space<vmem>>, vector<64x32xf32>
    %c0_33 = arith.constant 0 : index
    %c0_34 = arith.constant 0 : index
    %17 = vector.load %arg21[%c0_33, %c0_34] : memref<1x32xf32, #tpu.memory_space<vmem>>, vector<1x32xf32>
    %c0_35 = arith.constant 0 : index
    %c0_36 = arith.constant 0 : index
    %18 = vector.load %arg22[%c0_35, %c0_36] : memref<1x32xf32, #tpu.memory_space<vmem>>, vector<1x32xf32>
    %c0_37 = arith.constant 0 : index
    %c0_38 = arith.constant 0 : index
    %19 = vector.load %arg23[%c0_37, %c0_38] : memref<1x32xf32, #tpu.memory_space<vmem>>, vector<1x32xf32>
    %c0_39 = arith.constant 0 : index
    %c0_40 = arith.constant 0 : index
    %20 = vector.load %arg24[%c0_39, %c0_40] : memref<1x32xf32, #tpu.memory_space<vmem>>, vector<1x32xf32>
    %c0_41 = arith.constant 0 : index
    %c0_42 = arith.constant 0 : index
    %21 = vector.load %arg25[%c0_41, %c0_42] : memref<1x32xf32, #tpu.memory_space<vmem>>, vector<1x32xf32>
    %c0_43 = arith.constant 0 : index
    %c0_44 = arith.constant 0 : index
    %22 = vector.load %arg26[%c0_43, %c0_44] : memref<1x32xf32, #tpu.memory_space<vmem>>, vector<1x32xf32>
    %c0_45 = arith.constant 0 : index
    %c0_46 = arith.constant 0 : index
    %23 = vector.load %arg27[%c0_45, %c0_46] : memref<1x32xf32, #tpu.memory_space<vmem>>, vector<1x32xf32>
    %c0_47 = arith.constant 0 : index
    %c0_48 = arith.constant 0 : index
    %24 = vector.load %arg28[%c0_47, %c0_48] : memref<1x32xf32, #tpu.memory_space<vmem>>, vector<1x32xf32>
    %c0_49 = arith.constant 0 : index
    %c0_50 = arith.constant 0 : index
    %25 = vector.load %arg29[%c0_49, %c0_50] : memref<1x32xf32, #tpu.memory_space<vmem>>, vector<1x32xf32>
    %26 = tpu.iota {dimensions = array<i32: 2>} : vector<1x1x32xi32>
    %c0_i32 = arith.constant 0 : i32
    %27 = vector.broadcast %c0_i32 : i32 to vector<1x1x32xi32>
    %28 = arith.cmpi sge, %26, %27 : vector<1x1x32xi32>
    %c8_i32 = arith.constant 8 : i32
    %29 = vector.broadcast %c8_i32 : i32 to vector<1x1x32xi32>
    %30 = arith.cmpi slt, %26, %29 : vector<1x1x32xi32>
    %31 = arith.andi %28, %30 : vector<1x1x32xi1>
    %c8_i32_51 = arith.constant 8 : i32
    %32 = vector.broadcast %c8_i32_51 : i32 to vector<1x1x32xi32>
    %33 = arith.cmpi sge, %26, %32 : vector<1x1x32xi32>
    %c16_i32 = arith.constant 16 : i32
    %34 = vector.broadcast %c16_i32 : i32 to vector<1x1x32xi32>
    %35 = arith.cmpi slt, %26, %34 : vector<1x1x32xi32>
    %36 = arith.andi %33, %35 : vector<1x1x32xi1>
    %c16_i32_52 = arith.constant 16 : i32
    %37 = vector.broadcast %c16_i32_52 : i32 to vector<1x1x32xi32>
    %38 = arith.cmpi sge, %26, %37 : vector<1x1x32xi32>
    %c24_i32 = arith.constant 24 : i32
    %39 = vector.broadcast %c24_i32 : i32 to vector<1x1x32xi32>
    %40 = arith.cmpi slt, %26, %39 : vector<1x1x32xi32>
    %41 = arith.andi %38, %40 : vector<1x1x32xi1>
    %c24_i32_53 = arith.constant 24 : i32
    %42 = vector.broadcast %c24_i32_53 : i32 to vector<1x1x32xi32>
    %43 = arith.cmpi sge, %26, %42 : vector<1x1x32xi32>
    %c32_i32 = arith.constant 32 : i32
    %44 = vector.broadcast %c32_i32 : i32 to vector<1x1x32xi32>
    %45 = arith.cmpi slt, %26, %44 : vector<1x1x32xi32>
    %46 = arith.andi %43, %45 : vector<1x1x32xi1>
    %47 = arith.addf %2, %3 : vector<16x32xf32>
    %c0_54 = arith.constant 0 : index
    %c0_55 = arith.constant 0 : index
    %48 = vector.load %arg12[%c0_54, %c0_55] : memref<32x32xf32, #tpu.memory_space<vmem>>, vector<32x32xf32>
    %cst = arith.constant dense<0.000000e+00> : vector<16x32xf32>
    %49 = tpu.matmul %47, %48, %cst {dimension_numbers = #tpu.dot_dimension_numbers<[1], [0], [0], [1], [0, 0, 1, 1], [], []>} : vector<16x32xf32>, vector<32x32xf32>, vector<16x32xf32> -> vector<16x32xf32>
    %c0_56 = arith.constant 0 : index
    %c0_57 = arith.constant 0 : index
    %50 = vector.load %arg13[%c0_56, %c0_57] : memref<1x32xf32, #tpu.memory_space<vmem>>, vector<1x32xf32>
    %51 = vector.broadcast %50 : vector<1x32xf32> to vector<16x32xf32>
    %52 = arith.addf %49, %51 : vector<16x32xf32>
    %c0_58 = arith.constant 0 : index
    %c0_59 = arith.constant 0 : index
    %53 = vector.load %arg14[%c0_58, %c0_59] : memref<32x32xf32, #tpu.memory_space<vmem>>, vector<32x32xf32>
    %cst_60 = arith.constant dense<0.000000e+00> : vector<16x32xf32>
    %54 = tpu.matmul %2, %53, %cst_60 {dimension_numbers = #tpu.dot_dimension_numbers<[1], [0], [0], [1], [0, 0, 1, 1], [], []>} : vector<16x32xf32>, vector<32x32xf32>, vector<16x32xf32> -> vector<16x32xf32>
    %c0_61 = arith.constant 0 : index
    %c0_62 = arith.constant 0 : index
    %55 = vector.load %arg15[%c0_61, %c0_62] : memref<1x32xf32, #tpu.memory_space<vmem>>, vector<1x32xf32>
    %56 = vector.broadcast %55 : vector<1x32xf32> to vector<16x32xf32>
    %57 = arith.addf %54, %56 : vector<16x32xf32>
    %58 = vector.shape_cast %52 : vector<16x32xf32> to vector<2x8x32xf32>
    %59 = vector.shape_cast %57 : vector<16x32xf32> to vector<2x8x32xf32>
    %cst_63 = arith.constant 0.000000e+00 : f32
    %60 = vector.shape_cast %31 : vector<1x1x32xi1> to vector<1x1x32xi1>
    %61 = vector.broadcast %60 : vector<1x1x32xi1> to vector<2x8x32xi1>
    %62 = vector.broadcast %cst_63 : f32 to vector<2x8x32xf32>
    %63 = arith.select %61, %58, %62 : vector<2x8x32xi1>, vector<2x8x32xf32>
    %cst_64 = arith.constant 0.000000e+00 : f32
    %64 = vector.shape_cast %36 : vector<1x1x32xi1> to vector<1x1x32xi1>
    %65 = vector.broadcast %64 : vector<1x1x32xi1> to vector<2x8x32xi1>
    %66 = vector.broadcast %cst_64 : f32 to vector<2x8x32xf32>
    %67 = arith.select %65, %58, %66 : vector<2x8x32xi1>, vector<2x8x32xf32>
    %cst_65 = arith.constant 0.000000e+00 : f32
    %68 = vector.shape_cast %41 : vector<1x1x32xi1> to vector<1x1x32xi1>
    %69 = vector.broadcast %68 : vector<1x1x32xi1> to vector<2x8x32xi1>
    %70 = vector.broadcast %cst_65 : f32 to vector<2x8x32xf32>
    %71 = arith.select %69, %58, %70 : vector<2x8x32xi1>, vector<2x8x32xf32>
    %cst_66 = arith.constant 0.000000e+00 : f32
    %72 = vector.shape_cast %46 : vector<1x1x32xi1> to vector<1x1x32xi1>
    %73 = vector.broadcast %72 : vector<1x1x32xi1> to vector<2x8x32xi1>
    %74 = vector.broadcast %cst_66 : f32 to vector<2x8x32xf32>
    %75 = arith.select %73, %58, %74 : vector<2x8x32xi1>, vector<2x8x32xf32>
    %cst_67 = arith.constant 0.000000e+00 : f32
    %76 = vector.shape_cast %31 : vector<1x1x32xi1> to vector<1x1x32xi1>
    %77 = vector.broadcast %76 : vector<1x1x32xi1> to vector<2x8x32xi1>
    %78 = vector.broadcast %cst_67 : f32 to vector<2x8x32xf32>
    %79 = arith.select %77, %59, %78 : vector<2x8x32xi1>, vector<2x8x32xf32>
    %cst_68 = arith.constant 0.000000e+00 : f32
    %80 = vector.shape_cast %36 : vector<1x1x32xi1> to vector<1x1x32xi1>
    %81 = vector.broadcast %80 : vector<1x1x32xi1> to vector<2x8x32xi1>
    %82 = vector.broadcast %cst_68 : f32 to vector<2x8x32xf32>
    %83 = arith.select %81, %59, %82 : vector<2x8x32xi1>, vector<2x8x32xf32>
    %cst_69 = arith.constant 0.000000e+00 : f32
    %84 = vector.shape_cast %41 : vector<1x1x32xi1> to vector<1x1x32xi1>
    %85 = vector.broadcast %84 : vector<1x1x32xi1> to vector<2x8x32xi1>
    %86 = vector.broadcast %cst_69 : f32 to vector<2x8x32xf32>
    %87 = arith.select %85, %59, %86 : vector<2x8x32xi1>, vector<2x8x32xf32>
    %cst_70 = arith.constant 0.000000e+00 : f32
    %88 = vector.shape_cast %46 : vector<1x1x32xi1> to vector<1x1x32xi1>
    %89 = vector.broadcast %88 : vector<1x1x32xi1> to vector<2x8x32xi1>
    %90 = vector.broadcast %cst_70 : f32 to vector<2x8x32xf32>
    %91 = arith.select %89, %59, %90 : vector<2x8x32xi1>, vector<2x8x32xf32>
    %92 = arith.addf %0, %1 : vector<16x32xf32>
    %cst_71 = arith.constant dense<0.000000e+00> : vector<16x64xf32>
    %93 = tpu.matmul %92, %4, %cst_71 {dimension_numbers = #tpu.dot_dimension_numbers<[1], [0], [0], [1], [0, 0, 1, 1], [], []>} : vector<16x32xf32>, vector<32x64xf32>, vector<16x64xf32> -> vector<16x64xf32>
    %94 = vector.broadcast %5 : vector<1x64xf32> to vector<16x64xf32>
    %95 = arith.addf %93, %94 : vector<16x64xf32>
    %96 = vector.extract_strided_slice %95 {offsets = [0, 0], sizes = [16, 32], strides = [1, 1]} : vector<16x64xf32> to vector<16x32xf32>
    %97 = vector.shape_cast %96 : vector<16x32xf32> to vector<2x8x32xf32>
    %98 = vector.extract_strided_slice %95 {offsets = [0, 32], sizes = [16, 32], strides = [1, 1]} : vector<16x64xf32> to vector<16x32xf32>
    %99 = vector.shape_cast %98 : vector<16x32xf32> to vector<2x8x32xf32>
    %cst_72 = arith.constant dense<0.000000e+00> : vector<16x32xf32>
    %100 = tpu.matmul %0, %6, %cst_72 {dimension_numbers = #tpu.dot_dimension_numbers<[1], [0], [0], [1], [0, 0, 1, 1], [], []>} : vector<16x32xf32>, vector<32x32xf32>, vector<16x32xf32> -> vector<16x32xf32>
    %101 = vector.broadcast %7 : vector<1x32xf32> to vector<16x32xf32>
    %102 = arith.addf %100, %101 : vector<16x32xf32>
    %103 = vector.shape_cast %102 : vector<16x32xf32> to vector<2x8x32xf32>
    %cst_73 = arith.constant 0.000000e+00 : f32
    %104 = vector.shape_cast %31 : vector<1x1x32xi1> to vector<1x1x32xi1>
    %105 = vector.broadcast %104 : vector<1x1x32xi1> to vector<2x8x32xi1>
    %106 = vector.broadcast %cst_73 : f32 to vector<2x8x32xf32>
    %107 = arith.select %105, %99, %106 : vector<2x8x32xi1>, vector<2x8x32xf32>
    %cst_74 = arith.constant 0.000000e+00 : f32
    %108 = vector.shape_cast %36 : vector<1x1x32xi1> to vector<1x1x32xi1>
    %109 = vector.broadcast %108 : vector<1x1x32xi1> to vector<2x8x32xi1>
    %110 = vector.broadcast %cst_74 : f32 to vector<2x8x32xf32>
    %111 = arith.select %109, %99, %110 : vector<2x8x32xi1>, vector<2x8x32xf32>
    %cst_75 = arith.constant 0.000000e+00 : f32
    %112 = vector.shape_cast %41 : vector<1x1x32xi1> to vector<1x1x32xi1>
    %113 = vector.broadcast %112 : vector<1x1x32xi1> to vector<2x8x32xi1>
    %114 = vector.broadcast %cst_75 : f32 to vector<2x8x32xf32>
    %115 = arith.select %113, %99, %114 : vector<2x8x32xi1>, vector<2x8x32xf32>
    %cst_76 = arith.constant 0.000000e+00 : f32
    %116 = vector.shape_cast %46 : vector<1x1x32xi1> to vector<1x1x32xi1>
    %117 = vector.broadcast %116 : vector<1x1x32xi1> to vector<2x8x32xi1>
    %118 = vector.broadcast %cst_76 : f32 to vector<2x8x32xf32>
    %119 = arith.select %117, %99, %118 : vector<2x8x32xi1>, vector<2x8x32xf32>
    %cst_77 = arith.constant 0.000000e+00 : f32
    %120 = vector.shape_cast %31 : vector<1x1x32xi1> to vector<1x1x32xi1>
    %121 = vector.broadcast %120 : vector<1x1x32xi1> to vector<2x8x32xi1>
    %122 = vector.broadcast %cst_77 : f32 to vector<2x8x32xf32>
    %123 = arith.select %121, %103, %122 : vector<2x8x32xi1>, vector<2x8x32xf32>
    %cst_78 = arith.constant 0.000000e+00 : f32
    %124 = vector.shape_cast %36 : vector<1x1x32xi1> to vector<1x1x32xi1>
    %125 = vector.broadcast %124 : vector<1x1x32xi1> to vector<2x8x32xi1>
    %126 = vector.broadcast %cst_78 : f32 to vector<2x8x32xf32>
    %127 = arith.select %125, %103, %126 : vector<2x8x32xi1>, vector<2x8x32xf32>
    %cst_79 = arith.constant 0.000000e+00 : f32
    %128 = vector.shape_cast %41 : vector<1x1x32xi1> to vector<1x1x32xi1>
    %129 = vector.broadcast %128 : vector<1x1x32xi1> to vector<2x8x32xi1>
    %130 = vector.broadcast %cst_79 : f32 to vector<2x8x32xf32>
    %131 = arith.select %129, %103, %130 : vector<2x8x32xi1>, vector<2x8x32xf32>
    %cst_80 = arith.constant 0.000000e+00 : f32
    %132 = vector.shape_cast %46 : vector<1x1x32xi1> to vector<1x1x32xi1>
    %133 = vector.broadcast %132 : vector<1x1x32xi1> to vector<2x8x32xi1>
    %134 = vector.broadcast %cst_80 : f32 to vector<2x8x32xf32>
    %135 = arith.select %133, %103, %134 : vector<2x8x32xi1>, vector<2x8x32xf32>
    %cst_81 = arith.constant 0.000000e+00 : f32
    %136 = vector.broadcast %cst_81 : f32 to vector<2x8x32xf32>
    "tpu.trace_start"() <{level = 10 : i32, message = "bqd,bkd->bqk"}> : () -> ()
    %cst_82 = arith.constant dense<0.000000e+00> : vector<2x8x8xf32>
    %137 = tpu.matmul %97, %107, %cst_82 {dimension_numbers = #tpu.dot_dimension_numbers<[2], [2], [1], [1], [0, 0, 0, 1, 1, 1], [0], [0]>} : vector<2x8x32xf32>, vector<2x8x32xf32>, vector<2x8x8xf32> -> vector<2x8x8xf32>
    "tpu.trace_stop"() : () -> ()
    %cst_83 = arith.constant 0.353553385 : f32
    %138 = vector.broadcast %cst_83 : f32 to vector<2x8x8xf32>
    %139 = arith.mulf %137, %138 : vector<2x8x8xf32>
    %cst_84 = arith.constant dense<0xFF800000> : vector<2x8xf32>
    %140 = vector.multi_reduction <maximumf>, %139, %cst_84 [2] : vector<2x8x8xf32> to vector<2x8xf32>
    %141 = vector.shape_cast %140 : vector<2x8xf32> to vector<2x8x1xf32>
    %142 = vector.broadcast %141 : vector<2x8x1xf32> to vector<2x8x8xf32>
    %143 = arith.subf %139, %142 : vector<2x8x8xf32>
    %144 = math.exp %143 : vector<2x8x8xf32>
    %cst_85 = arith.constant dense<0.000000e+00> : vector<2x8xf32>
    %145 = vector.multi_reduction <add>, %144, %cst_85 [2] : vector<2x8x8xf32> to vector<2x8xf32>
    %146 = vector.shape_cast %145 : vector<2x8xf32> to vector<2x8x1xf32>
    %147 = tpu.reciprocal %146 {approx = true} : vector<2x8x1xf32> -> vector<2x8x1xf32>
    %148 = vector.broadcast %147 : vector<2x8x1xf32> to vector<2x8x8xf32>
    %149 = arith.mulf %144, %148 : vector<2x8x8xf32>
    "tpu.trace_start"() <{level = 10 : i32, message = "bqk,bkd->bqd"}> : () -> ()
    %cst_86 = arith.constant dense<0.000000e+00> : vector<2x8x32xf32>
    %150 = tpu.matmul %149, %123, %cst_86 {dimension_numbers = #tpu.dot_dimension_numbers<[2], [1], [1], [2], [0, 0, 0, 1, 1, 2], [0], [0]>} : vector<2x8x8xf32>, vector<2x8x32xf32>, vector<2x8x32xf32> -> vector<2x8x32xf32>
    "tpu.trace_stop"() : () -> ()
    %151 = arith.addf %136, %150 : vector<2x8x32xf32>
    "tpu.trace_start"() <{level = 10 : i32, message = "bqd,bkd->bqk"}> : () -> ()
    %cst_87 = arith.constant dense<0.000000e+00> : vector<2x8x8xf32>
    %152 = tpu.matmul %97, %111, %cst_87 {dimension_numbers = #tpu.dot_dimension_numbers<[2], [2], [1], [1], [0, 0, 0, 1, 1, 1], [0], [0]>} : vector<2x8x32xf32>, vector<2x8x32xf32>, vector<2x8x8xf32> -> vector<2x8x8xf32>
    "tpu.trace_stop"() : () -> ()
    %cst_88 = arith.constant 0.353553385 : f32
    %153 = vector.broadcast %cst_88 : f32 to vector<2x8x8xf32>
    %154 = arith.mulf %152, %153 : vector<2x8x8xf32>
    %cst_89 = arith.constant dense<0xFF800000> : vector<2x8xf32>
    %155 = vector.multi_reduction <maximumf>, %154, %cst_89 [2] : vector<2x8x8xf32> to vector<2x8xf32>
    %156 = vector.shape_cast %155 : vector<2x8xf32> to vector<2x8x1xf32>
    %157 = vector.broadcast %156 : vector<2x8x1xf32> to vector<2x8x8xf32>
    %158 = arith.subf %154, %157 : vector<2x8x8xf32>
    %159 = math.exp %158 : vector<2x8x8xf32>
    %cst_90 = arith.constant dense<0.000000e+00> : vector<2x8xf32>
    %160 = vector.multi_reduction <add>, %159, %cst_90 [2] : vector<2x8x8xf32> to vector<2x8xf32>
    %161 = vector.shape_cast %160 : vector<2x8xf32> to vector<2x8x1xf32>
    %162 = tpu.reciprocal %161 {approx = true} : vector<2x8x1xf32> -> vector<2x8x1xf32>
    %163 = vector.broadcast %162 : vector<2x8x1xf32> to vector<2x8x8xf32>
    %164 = arith.mulf %159, %163 : vector<2x8x8xf32>
    "tpu.trace_start"() <{level = 10 : i32, message = "bqk,bkd->bqd"}> : () -> ()
    %cst_91 = arith.constant dense<0.000000e+00> : vector<2x8x32xf32>
    %165 = tpu.matmul %164, %127, %cst_91 {dimension_numbers = #tpu.dot_dimension_numbers<[2], [1], [1], [2], [0, 0, 0, 1, 1, 2], [0], [0]>} : vector<2x8x8xf32>, vector<2x8x32xf32>, vector<2x8x32xf32> -> vector<2x8x32xf32>
    "tpu.trace_stop"() : () -> ()
    %166 = arith.addf %151, %165 : vector<2x8x32xf32>
    "tpu.trace_start"() <{level = 10 : i32, message = "bqd,bkd->bqk"}> : () -> ()
    %cst_92 = arith.constant dense<0.000000e+00> : vector<2x8x8xf32>
    %167 = tpu.matmul %97, %115, %cst_92 {dimension_numbers = #tpu.dot_dimension_numbers<[2], [2], [1], [1], [0, 0, 0, 1, 1, 1], [0], [0]>} : vector<2x8x32xf32>, vector<2x8x32xf32>, vector<2x8x8xf32> -> vector<2x8x8xf32>
    "tpu.trace_stop"() : () -> ()
    %cst_93 = arith.constant 0.353553385 : f32
    %168 = vector.broadcast %cst_93 : f32 to vector<2x8x8xf32>
    %169 = arith.mulf %167, %168 : vector<2x8x8xf32>
    %cst_94 = arith.constant dense<0xFF800000> : vector<2x8xf32>
    %170 = vector.multi_reduction <maximumf>, %169, %cst_94 [2] : vector<2x8x8xf32> to vector<2x8xf32>
    %171 = vector.shape_cast %170 : vector<2x8xf32> to vector<2x8x1xf32>
    %172 = vector.broadcast %171 : vector<2x8x1xf32> to vector<2x8x8xf32>
    %173 = arith.subf %169, %172 : vector<2x8x8xf32>
    %174 = math.exp %173 : vector<2x8x8xf32>
    %cst_95 = arith.constant dense<0.000000e+00> : vector<2x8xf32>
    %175 = vector.multi_reduction <add>, %174, %cst_95 [2] : vector<2x8x8xf32> to vector<2x8xf32>
    %176 = vector.shape_cast %175 : vector<2x8xf32> to vector<2x8x1xf32>
    %177 = tpu.reciprocal %176 {approx = true} : vector<2x8x1xf32> -> vector<2x8x1xf32>
    %178 = vector.broadcast %177 : vector<2x8x1xf32> to vector<2x8x8xf32>
    %179 = arith.mulf %174, %178 : vector<2x8x8xf32>
    "tpu.trace_start"() <{level = 10 : i32, message = "bqk,bkd->bqd"}> : () -> ()
    %cst_96 = arith.constant dense<0.000000e+00> : vector<2x8x32xf32>
    %180 = tpu.matmul %179, %131, %cst_96 {dimension_numbers = #tpu.dot_dimension_numbers<[2], [1], [1], [2], [0, 0, 0, 1, 1, 2], [0], [0]>} : vector<2x8x8xf32>, vector<2x8x32xf32>, vector<2x8x32xf32> -> vector<2x8x32xf32>
    "tpu.trace_stop"() : () -> ()
    %181 = arith.addf %166, %180 : vector<2x8x32xf32>
    "tpu.trace_start"() <{level = 10 : i32, message = "bqd,bkd->bqk"}> : () -> ()
    %cst_97 = arith.constant dense<0.000000e+00> : vector<2x8x8xf32>
    %182 = tpu.matmul %97, %119, %cst_97 {dimension_numbers = #tpu.dot_dimension_numbers<[2], [2], [1], [1], [0, 0, 0, 1, 1, 1], [0], [0]>} : vector<2x8x32xf32>, vector<2x8x32xf32>, vector<2x8x8xf32> -> vector<2x8x8xf32>
    "tpu.trace_stop"() : () -> ()
    %cst_98 = arith.constant 0.353553385 : f32
    %183 = vector.broadcast %cst_98 : f32 to vector<2x8x8xf32>
    %184 = arith.mulf %182, %183 : vector<2x8x8xf32>
    %cst_99 = arith.constant dense<0xFF800000> : vector<2x8xf32>
    %185 = vector.multi_reduction <maximumf>, %184, %cst_99 [2] : vector<2x8x8xf32> to vector<2x8xf32>
    %186 = vector.shape_cast %185 : vector<2x8xf32> to vector<2x8x1xf32>
    %187 = vector.broadcast %186 : vector<2x8x1xf32> to vector<2x8x8xf32>
    %188 = arith.subf %184, %187 : vector<2x8x8xf32>
    %189 = math.exp %188 : vector<2x8x8xf32>
    %cst_100 = arith.constant dense<0.000000e+00> : vector<2x8xf32>
    %190 = vector.multi_reduction <add>, %189, %cst_100 [2] : vector<2x8x8xf32> to vector<2x8xf32>
    %191 = vector.shape_cast %190 : vector<2x8xf32> to vector<2x8x1xf32>
    %192 = tpu.reciprocal %191 {approx = true} : vector<2x8x1xf32> -> vector<2x8x1xf32>
    %193 = vector.broadcast %192 : vector<2x8x1xf32> to vector<2x8x8xf32>
    %194 = arith.mulf %189, %193 : vector<2x8x8xf32>
    "tpu.trace_start"() <{level = 10 : i32, message = "bqk,bkd->bqd"}> : () -> ()
    %cst_101 = arith.constant dense<0.000000e+00> : vector<2x8x32xf32>
    %195 = tpu.matmul %194, %135, %cst_101 {dimension_numbers = #tpu.dot_dimension_numbers<[2], [1], [1], [2], [0, 0, 0, 1, 1, 2], [0], [0]>} : vector<2x8x8xf32>, vector<2x8x32xf32>, vector<2x8x32xf32> -> vector<2x8x32xf32>
    "tpu.trace_stop"() : () -> ()
    %196 = arith.addf %181, %195 : vector<2x8x32xf32>
    %197 = vector.shape_cast %196 : vector<2x8x32xf32> to vector<16x32xf32>
    %cst_102 = arith.constant dense<0.000000e+00> : vector<16x32xf32>
    %198 = tpu.matmul %197, %8, %cst_102 {dimension_numbers = #tpu.dot_dimension_numbers<[1], [0], [0], [1], [0, 0, 1, 1], [], []>} : vector<16x32xf32>, vector<32x32xf32>, vector<16x32xf32> -> vector<16x32xf32>
    %199 = vector.broadcast %9 : vector<1x32xf32> to vector<16x32xf32>
    %200 = arith.addf %198, %199 : vector<16x32xf32>
    %201 = arith.addf %0, %200 : vector<16x32xf32>
    %cst_103 = arith.constant dense<0.000000e+00> : vector<16xf32>
    %202 = vector.multi_reduction <add>, %201, %cst_103 [1] : vector<16x32xf32> to vector<16xf32>
    %203 = vector.shape_cast %202 : vector<16xf32> to vector<16x1xf32>
    %cst_104 = arith.constant 3.200000e+01 : f32
    %204 = vector.broadcast %cst_104 : f32 to vector<16x1xf32>
    %205 = arith.divf %203, %204 : vector<16x1xf32>
    %206 = vector.broadcast %205 : vector<16x1xf32> to vector<16x32xf32>
    %207 = arith.subf %201, %206 : vector<16x32xf32>
    %208 = arith.mulf %207, %207 : vector<16x32xf32>
    %cst_105 = arith.constant dense<0.000000e+00> : vector<16xf32>
    %209 = vector.multi_reduction <add>, %208, %cst_105 [1] : vector<16x32xf32> to vector<16xf32>
    %210 = vector.shape_cast %209 : vector<16xf32> to vector<16x1xf32>
    %cst_106 = arith.constant 3.200000e+01 : f32
    %211 = vector.broadcast %cst_106 : f32 to vector<16x1xf32>
    %212 = arith.divf %210, %211 : vector<16x1xf32>
    %213 = vector.broadcast %205 : vector<16x1xf32> to vector<16x32xf32>
    %214 = arith.subf %201, %213 : vector<16x32xf32>
    %cst_107 = arith.constant 9.99999974E-6 : f32
    %215 = vector.broadcast %cst_107 : f32 to vector<16x1xf32>
    %216 = arith.addf %212, %215 : vector<16x1xf32>
    %217 = math.rsqrt %216 : vector<16x1xf32>
    %218 = vector.broadcast %217 : vector<16x1xf32> to vector<16x32xf32>
    %219 = arith.mulf %214, %218 : vector<16x32xf32>
    %220 = vector.broadcast %18 : vector<1x32xf32> to vector<16x32xf32>
    %221 = arith.mulf %219, %220 : vector<16x32xf32>
    %222 = vector.broadcast %19 : vector<1x32xf32> to vector<16x32xf32>
    %223 = arith.addf %221, %222 : vector<16x32xf32>
    %224 = arith.addf %223, %1 : vector<16x32xf32>
    %cst_108 = arith.constant dense<0.000000e+00> : vector<16x32xf32>
    %225 = tpu.matmul %224, %10, %cst_108 {dimension_numbers = #tpu.dot_dimension_numbers<[1], [0], [0], [1], [0, 0, 1, 1], [], []>} : vector<16x32xf32>, vector<32x32xf32>, vector<16x32xf32> -> vector<16x32xf32>
    %226 = vector.broadcast %11 : vector<1x32xf32> to vector<16x32xf32>
    %227 = arith.addf %225, %226 : vector<16x32xf32>
    %228 = vector.shape_cast %227 : vector<16x32xf32> to vector<2x8x32xf32>
    %cst_109 = arith.constant 0.000000e+00 : f32
    %229 = vector.broadcast %cst_109 : f32 to vector<2x8x32xf32>
    "tpu.trace_start"() <{level = 10 : i32, message = "bqd,bkd->bqk"}> : () -> ()
    %cst_110 = arith.constant dense<0.000000e+00> : vector<2x8x8xf32>
    %230 = tpu.matmul %228, %63, %cst_110 {dimension_numbers = #tpu.dot_dimension_numbers<[2], [2], [1], [1], [0, 0, 0, 1, 1, 1], [0], [0]>} : vector<2x8x32xf32>, vector<2x8x32xf32>, vector<2x8x8xf32> -> vector<2x8x8xf32>
    "tpu.trace_stop"() : () -> ()
    %cst_111 = arith.constant 0.353553385 : f32
    %231 = vector.broadcast %cst_111 : f32 to vector<2x8x8xf32>
    %232 = arith.mulf %230, %231 : vector<2x8x8xf32>
    %cst_112 = arith.constant dense<0xFF800000> : vector<2x8xf32>
    %233 = vector.multi_reduction <maximumf>, %232, %cst_112 [2] : vector<2x8x8xf32> to vector<2x8xf32>
    %234 = vector.shape_cast %233 : vector<2x8xf32> to vector<2x8x1xf32>
    %235 = vector.broadcast %234 : vector<2x8x1xf32> to vector<2x8x8xf32>
    %236 = arith.subf %232, %235 : vector<2x8x8xf32>
    %237 = math.exp %236 : vector<2x8x8xf32>
    %cst_113 = arith.constant dense<0.000000e+00> : vector<2x8xf32>
    %238 = vector.multi_reduction <add>, %237, %cst_113 [2] : vector<2x8x8xf32> to vector<2x8xf32>
    %239 = vector.shape_cast %238 : vector<2x8xf32> to vector<2x8x1xf32>
    %240 = tpu.reciprocal %239 {approx = true} : vector<2x8x1xf32> -> vector<2x8x1xf32>
    %241 = vector.broadcast %240 : vector<2x8x1xf32> to vector<2x8x8xf32>
    %242 = arith.mulf %237, %241 : vector<2x8x8xf32>
    "tpu.trace_start"() <{level = 10 : i32, message = "bqk,bkd->bqd"}> : () -> ()
    %cst_114 = arith.constant dense<0.000000e+00> : vector<2x8x32xf32>
    %243 = tpu.matmul %242, %79, %cst_114 {dimension_numbers = #tpu.dot_dimension_numbers<[2], [1], [1], [2], [0, 0, 0, 1, 1, 2], [0], [0]>} : vector<2x8x8xf32>, vector<2x8x32xf32>, vector<2x8x32xf32> -> vector<2x8x32xf32>
    "tpu.trace_stop"() : () -> ()
    %244 = arith.addf %229, %243 : vector<2x8x32xf32>
    "tpu.trace_start"() <{level = 10 : i32, message = "bqd,bkd->bqk"}> : () -> ()
    %cst_115 = arith.constant dense<0.000000e+00> : vector<2x8x8xf32>
    %245 = tpu.matmul %228, %67, %cst_115 {dimension_numbers = #tpu.dot_dimension_numbers<[2], [2], [1], [1], [0, 0, 0, 1, 1, 1], [0], [0]>} : vector<2x8x32xf32>, vector<2x8x32xf32>, vector<2x8x8xf32> -> vector<2x8x8xf32>
    "tpu.trace_stop"() : () -> ()
    %cst_116 = arith.constant 0.353553385 : f32
    %246 = vector.broadcast %cst_116 : f32 to vector<2x8x8xf32>
    %247 = arith.mulf %245, %246 : vector<2x8x8xf32>
    %cst_117 = arith.constant dense<0xFF800000> : vector<2x8xf32>
    %248 = vector.multi_reduction <maximumf>, %247, %cst_117 [2] : vector<2x8x8xf32> to vector<2x8xf32>
    %249 = vector.shape_cast %248 : vector<2x8xf32> to vector<2x8x1xf32>
    %250 = vector.broadcast %249 : vector<2x8x1xf32> to vector<2x8x8xf32>
    %251 = arith.subf %247, %250 : vector<2x8x8xf32>
    %252 = math.exp %251 : vector<2x8x8xf32>
    %cst_118 = arith.constant dense<0.000000e+00> : vector<2x8xf32>
    %253 = vector.multi_reduction <add>, %252, %cst_118 [2] : vector<2x8x8xf32> to vector<2x8xf32>
    %254 = vector.shape_cast %253 : vector<2x8xf32> to vector<2x8x1xf32>
    %255 = tpu.reciprocal %254 {approx = true} : vector<2x8x1xf32> -> vector<2x8x1xf32>
    %256 = vector.broadcast %255 : vector<2x8x1xf32> to vector<2x8x8xf32>
    %257 = arith.mulf %252, %256 : vector<2x8x8xf32>
    "tpu.trace_start"() <{level = 10 : i32, message = "bqk,bkd->bqd"}> : () -> ()
    %cst_119 = arith.constant dense<0.000000e+00> : vector<2x8x32xf32>
    %258 = tpu.matmul %257, %83, %cst_119 {dimension_numbers = #tpu.dot_dimension_numbers<[2], [1], [1], [2], [0, 0, 0, 1, 1, 2], [0], [0]>} : vector<2x8x8xf32>, vector<2x8x32xf32>, vector<2x8x32xf32> -> vector<2x8x32xf32>
    "tpu.trace_stop"() : () -> ()
    %259 = arith.addf %244, %258 : vector<2x8x32xf32>
    "tpu.trace_start"() <{level = 10 : i32, message = "bqd,bkd->bqk"}> : () -> ()
    %cst_120 = arith.constant dense<0.000000e+00> : vector<2x8x8xf32>
    %260 = tpu.matmul %228, %71, %cst_120 {dimension_numbers = #tpu.dot_dimension_numbers<[2], [2], [1], [1], [0, 0, 0, 1, 1, 1], [0], [0]>} : vector<2x8x32xf32>, vector<2x8x32xf32>, vector<2x8x8xf32> -> vector<2x8x8xf32>
    "tpu.trace_stop"() : () -> ()
    %cst_121 = arith.constant 0.353553385 : f32
    %261 = vector.broadcast %cst_121 : f32 to vector<2x8x8xf32>
    %262 = arith.mulf %260, %261 : vector<2x8x8xf32>
    %cst_122 = arith.constant dense<0xFF800000> : vector<2x8xf32>
    %263 = vector.multi_reduction <maximumf>, %262, %cst_122 [2] : vector<2x8x8xf32> to vector<2x8xf32>
    %264 = vector.shape_cast %263 : vector<2x8xf32> to vector<2x8x1xf32>
    %265 = vector.broadcast %264 : vector<2x8x1xf32> to vector<2x8x8xf32>
    %266 = arith.subf %262, %265 : vector<2x8x8xf32>
    %267 = math.exp %266 : vector<2x8x8xf32>
    %cst_123 = arith.constant dense<0.000000e+00> : vector<2x8xf32>
    %268 = vector.multi_reduction <add>, %267, %cst_123 [2] : vector<2x8x8xf32> to vector<2x8xf32>
    %269 = vector.shape_cast %268 : vector<2x8xf32> to vector<2x8x1xf32>
    %270 = tpu.reciprocal %269 {approx = true} : vector<2x8x1xf32> -> vector<2x8x1xf32>
    %271 = vector.broadcast %270 : vector<2x8x1xf32> to vector<2x8x8xf32>
    %272 = arith.mulf %267, %271 : vector<2x8x8xf32>
    "tpu.trace_start"() <{level = 10 : i32, message = "bqk,bkd->bqd"}> : () -> ()
    %cst_124 = arith.constant dense<0.000000e+00> : vector<2x8x32xf32>
    %273 = tpu.matmul %272, %87, %cst_124 {dimension_numbers = #tpu.dot_dimension_numbers<[2], [1], [1], [2], [0, 0, 0, 1, 1, 2], [0], [0]>} : vector<2x8x8xf32>, vector<2x8x32xf32>, vector<2x8x32xf32> -> vector<2x8x32xf32>
    "tpu.trace_stop"() : () -> ()
    %274 = arith.addf %259, %273 : vector<2x8x32xf32>
    "tpu.trace_start"() <{level = 10 : i32, message = "bqd,bkd->bqk"}> : () -> ()
    %cst_125 = arith.constant dense<0.000000e+00> : vector<2x8x8xf32>
    %275 = tpu.matmul %228, %75, %cst_125 {dimension_numbers = #tpu.dot_dimension_numbers<[2], [2], [1], [1], [0, 0, 0, 1, 1, 1], [0], [0]>} : vector<2x8x32xf32>, vector<2x8x32xf32>, vector<2x8x8xf32> -> vector<2x8x8xf32>
    "tpu.trace_stop"() : () -> ()
    %cst_126 = arith.constant 0.353553385 : f32
    %276 = vector.broadcast %cst_126 : f32 to vector<2x8x8xf32>
    %277 = arith.mulf %275, %276 : vector<2x8x8xf32>
    %cst_127 = arith.constant dense<0xFF800000> : vector<2x8xf32>
    %278 = vector.multi_reduction <maximumf>, %277, %cst_127 [2] : vector<2x8x8xf32> to vector<2x8xf32>
    %279 = vector.shape_cast %278 : vector<2x8xf32> to vector<2x8x1xf32>
    %280 = vector.broadcast %279 : vector<2x8x1xf32> to vector<2x8x8xf32>
    %281 = arith.subf %277, %280 : vector<2x8x8xf32>
    %282 = math.exp %281 : vector<2x8x8xf32>
    %cst_128 = arith.constant dense<0.000000e+00> : vector<2x8xf32>
    %283 = vector.multi_reduction <add>, %282, %cst_128 [2] : vector<2x8x8xf32> to vector<2x8xf32>
    %284 = vector.shape_cast %283 : vector<2x8xf32> to vector<2x8x1xf32>
    %285 = tpu.reciprocal %284 {approx = true} : vector<2x8x1xf32> -> vector<2x8x1xf32>
    %286 = vector.broadcast %285 : vector<2x8x1xf32> to vector<2x8x8xf32>
    %287 = arith.mulf %282, %286 : vector<2x8x8xf32>
    "tpu.trace_start"() <{level = 10 : i32, message = "bqk,bkd->bqd"}> : () -> ()
    %cst_129 = arith.constant dense<0.000000e+00> : vector<2x8x32xf32>
    %288 = tpu.matmul %287, %91, %cst_129 {dimension_numbers = #tpu.dot_dimension_numbers<[2], [1], [1], [2], [0, 0, 0, 1, 1, 2], [0], [0]>} : vector<2x8x8xf32>, vector<2x8x32xf32>, vector<2x8x32xf32> -> vector<2x8x32xf32>
    "tpu.trace_stop"() : () -> ()
    %289 = arith.addf %274, %288 : vector<2x8x32xf32>
    %290 = vector.shape_cast %289 : vector<2x8x32xf32> to vector<16x32xf32>
    %cst_130 = arith.constant dense<0.000000e+00> : vector<16x32xf32>
    %291 = tpu.matmul %290, %12, %cst_130 {dimension_numbers = #tpu.dot_dimension_numbers<[1], [0], [0], [1], [0, 0, 1, 1], [], []>} : vector<16x32xf32>, vector<32x32xf32>, vector<16x32xf32> -> vector<16x32xf32>
    %292 = vector.broadcast %13 : vector<1x32xf32> to vector<16x32xf32>
    %293 = arith.addf %291, %292 : vector<16x32xf32>
    %294 = arith.addf %223, %293 : vector<16x32xf32>
    %cst_131 = arith.constant dense<0.000000e+00> : vector<16xf32>
    %295 = vector.multi_reduction <add>, %294, %cst_131 [1] : vector<16x32xf32> to vector<16xf32>
    %296 = vector.shape_cast %295 : vector<16xf32> to vector<16x1xf32>
    %cst_132 = arith.constant 3.200000e+01 : f32
    %297 = vector.broadcast %cst_132 : f32 to vector<16x1xf32>
    %298 = arith.divf %296, %297 : vector<16x1xf32>
    %299 = vector.broadcast %298 : vector<16x1xf32> to vector<16x32xf32>
    %300 = arith.subf %294, %299 : vector<16x32xf32>
    %301 = arith.mulf %300, %300 : vector<16x32xf32>
    %cst_133 = arith.constant dense<0.000000e+00> : vector<16xf32>
    %302 = vector.multi_reduction <add>, %301, %cst_133 [1] : vector<16x32xf32> to vector<16xf32>
    %303 = vector.shape_cast %302 : vector<16xf32> to vector<16x1xf32>
    %cst_134 = arith.constant 3.200000e+01 : f32
    %304 = vector.broadcast %cst_134 : f32 to vector<16x1xf32>
    %305 = arith.divf %303, %304 : vector<16x1xf32>
    %306 = vector.broadcast %298 : vector<16x1xf32> to vector<16x32xf32>
    %307 = arith.subf %294, %306 : vector<16x32xf32>
    %cst_135 = arith.constant 9.99999974E-6 : f32
    %308 = vector.broadcast %cst_135 : f32 to vector<16x1xf32>
    %309 = arith.addf %305, %308 : vector<16x1xf32>
    %310 = math.rsqrt %309 : vector<16x1xf32>
    %311 = vector.broadcast %310 : vector<16x1xf32> to vector<16x32xf32>
    %312 = arith.mulf %307, %311 : vector<16x32xf32>
    %313 = vector.broadcast %20 : vector<1x32xf32> to vector<16x32xf32>
    %314 = arith.mulf %312, %313 : vector<16x32xf32>
    %315 = vector.broadcast %21 : vector<1x32xf32> to vector<16x32xf32>
    %316 = arith.addf %314, %315 : vector<16x32xf32>
    %cst_136 = arith.constant dense<0.000000e+00> : vector<16x64xf32>
    %317 = tpu.matmul %316, %14, %cst_136 {dimension_numbers = #tpu.dot_dimension_numbers<[1], [0], [0], [1], [0, 0, 1, 1], [], []>} : vector<16x32xf32>, vector<32x64xf32>, vector<16x64xf32> -> vector<16x64xf32>
    %318 = vector.broadcast %15 : vector<1x64xf32> to vector<16x64xf32>
    %319 = arith.addf %317, %318 : vector<16x64xf32>
    %cst_137 = arith.constant 0.000000e+00 : f32
    %320 = vector.broadcast %cst_137 : f32 to vector<16x64xf32>
    %321 = arith.maximumf %319, %320 : vector<16x64xf32>
    %cst_138 = arith.constant dense<0.000000e+00> : vector<16x32xf32>
    %322 = tpu.matmul %321, %16, %cst_138 {dimension_numbers = #tpu.dot_dimension_numbers<[1], [0], [0], [1], [0, 0, 1, 1], [], []>} : vector<16x64xf32>, vector<64x32xf32>, vector<16x32xf32> -> vector<16x32xf32>
    %323 = vector.broadcast %17 : vector<1x32xf32> to vector<16x32xf32>
    %324 = arith.addf %322, %323 : vector<16x32xf32>
    %325 = arith.addf %316, %324 : vector<16x32xf32>
    %cst_139 = arith.constant dense<0.000000e+00> : vector<16xf32>
    %326 = vector.multi_reduction <add>, %325, %cst_139 [1] : vector<16x32xf32> to vector<16xf32>
    %327 = vector.shape_cast %326 : vector<16xf32> to vector<16x1xf32>
    %cst_140 = arith.constant 3.200000e+01 : f32
    %328 = vector.broadcast %cst_140 : f32 to vector<16x1xf32>
    %329 = arith.divf %327, %328 : vector<16x1xf32>
    %330 = vector.broadcast %329 : vector<16x1xf32> to vector<16x32xf32>
    %331 = arith.subf %325, %330 : vector<16x32xf32>
    %332 = arith.mulf %331, %331 : vector<16x32xf32>
    %cst_141 = arith.constant dense<0.000000e+00> : vector<16xf32>
    %333 = vector.multi_reduction <add>, %332, %cst_141 [1] : vector<16x32xf32> to vector<16xf32>
    %334 = vector.shape_cast %333 : vector<16xf32> to vector<16x1xf32>
    %cst_142 = arith.constant 3.200000e+01 : f32
    %335 = vector.broadcast %cst_142 : f32 to vector<16x1xf32>
    %336 = arith.divf %334, %335 : vector<16x1xf32>
    %337 = vector.broadcast %329 : vector<16x1xf32> to vector<16x32xf32>
    %338 = arith.subf %325, %337 : vector<16x32xf32>
    %cst_143 = arith.constant 9.99999974E-6 : f32
    %339 = vector.broadcast %cst_143 : f32 to vector<16x1xf32>
    %340 = arith.addf %336, %339 : vector<16x1xf32>
    %341 = math.rsqrt %340 : vector<16x1xf32>
    %342 = vector.broadcast %341 : vector<16x1xf32> to vector<16x32xf32>
    %343 = arith.mulf %338, %342 : vector<16x32xf32>
    %344 = vector.broadcast %22 : vector<1x32xf32> to vector<16x32xf32>
    %345 = arith.mulf %343, %344 : vector<16x32xf32>
    %346 = vector.broadcast %23 : vector<1x32xf32> to vector<16x32xf32>
    %347 = arith.addf %345, %346 : vector<16x32xf32>
    %348 = arith.addf %347, %1 : vector<16x32xf32>
    %cst_144 = arith.constant dense<0.000000e+00> : vector<16x64xf32>
    %349 = tpu.matmul %348, %4, %cst_144 {dimension_numbers = #tpu.dot_dimension_numbers<[1], [0], [0], [1], [0, 0, 1, 1], [], []>} : vector<16x32xf32>, vector<32x64xf32>, vector<16x64xf32> -> vector<16x64xf32>
    %350 = vector.broadcast %5 : vector<1x64xf32> to vector<16x64xf32>
    %351 = arith.addf %349, %350 : vector<16x64xf32>
    %352 = vector.extract_strided_slice %351 {offsets = [0, 0], sizes = [16, 32], strides = [1, 1]} : vector<16x64xf32> to vector<16x32xf32>
    %353 = vector.shape_cast %352 : vector<16x32xf32> to vector<2x8x32xf32>
    %354 = vector.extract_strided_slice %351 {offsets = [0, 32], sizes = [16, 32], strides = [1, 1]} : vector<16x64xf32> to vector<16x32xf32>
    %355 = vector.shape_cast %354 : vector<16x32xf32> to vector<2x8x32xf32>
    %cst_145 = arith.constant dense<0.000000e+00> : vector<16x32xf32>
    %356 = tpu.matmul %347, %6, %cst_145 {dimension_numbers = #tpu.dot_dimension_numbers<[1], [0], [0], [1], [0, 0, 1, 1], [], []>} : vector<16x32xf32>, vector<32x32xf32>, vector<16x32xf32> -> vector<16x32xf32>
    %357 = vector.broadcast %7 : vector<1x32xf32> to vector<16x32xf32>
    %358 = arith.addf %356, %357 : vector<16x32xf32>
    %359 = vector.shape_cast %358 : vector<16x32xf32> to vector<2x8x32xf32>
    %cst_146 = arith.constant 0.000000e+00 : f32
    %360 = vector.shape_cast %31 : vector<1x1x32xi1> to vector<1x1x32xi1>
    %361 = vector.broadcast %360 : vector<1x1x32xi1> to vector<2x8x32xi1>
    %362 = vector.broadcast %cst_146 : f32 to vector<2x8x32xf32>
    %363 = arith.select %361, %355, %362 : vector<2x8x32xi1>, vector<2x8x32xf32>
    %cst_147 = arith.constant 0.000000e+00 : f32
    %364 = vector.shape_cast %36 : vector<1x1x32xi1> to vector<1x1x32xi1>
    %365 = vector.broadcast %364 : vector<1x1x32xi1> to vector<2x8x32xi1>
    %366 = vector.broadcast %cst_147 : f32 to vector<2x8x32xf32>
    %367 = arith.select %365, %355, %366 : vector<2x8x32xi1>, vector<2x8x32xf32>
    %cst_148 = arith.constant 0.000000e+00 : f32
    %368 = vector.shape_cast %41 : vector<1x1x32xi1> to vector<1x1x32xi1>
    %369 = vector.broadcast %368 : vector<1x1x32xi1> to vector<2x8x32xi1>
    %370 = vector.broadcast %cst_148 : f32 to vector<2x8x32xf32>
    %371 = arith.select %369, %355, %370 : vector<2x8x32xi1>, vector<2x8x32xf32>
    %cst_149 = arith.constant 0.000000e+00 : f32
    %372 = vector.shape_cast %46 : vector<1x1x32xi1> to vector<1x1x32xi1>
    %373 = vector.broadcast %372 : vector<1x1x32xi1> to vector<2x8x32xi1>
    %374 = vector.broadcast %cst_149 : f32 to vector<2x8x32xf32>
    %375 = arith.select %373, %355, %374 : vector<2x8x32xi1>, vector<2x8x32xf32>
    %cst_150 = arith.constant 0.000000e+00 : f32
    %376 = vector.shape_cast %31 : vector<1x1x32xi1> to vector<1x1x32xi1>
    %377 = vector.broadcast %376 : vector<1x1x32xi1> to vector<2x8x32xi1>
    %378 = vector.broadcast %cst_150 : f32 to vector<2x8x32xf32>
    %379 = arith.select %377, %359, %378 : vector<2x8x32xi1>, vector<2x8x32xf32>
    %cst_151 = arith.constant 0.000000e+00 : f32
    %380 = vector.shape_cast %36 : vector<1x1x32xi1> to vector<1x1x32xi1>
    %381 = vector.broadcast %380 : vector<1x1x32xi1> to vector<2x8x32xi1>
    %382 = vector.broadcast %cst_151 : f32 to vector<2x8x32xf32>
    %383 = arith.select %381, %359, %382 : vector<2x8x32xi1>, vector<2x8x32xf32>
    %cst_152 = arith.constant 0.000000e+00 : f32
    %384 = vector.shape_cast %41 : vector<1x1x32xi1> to vector<1x1x32xi1>
    %385 = vector.broadcast %384 : vector<1x1x32xi1> to vector<2x8x32xi1>
    %386 = vector.broadcast %cst_152 : f32 to vector<2x8x32xf32>
    %387 = arith.select %385, %359, %386 : vector<2x8x32xi1>, vector<2x8x32xf32>
    %cst_153 = arith.constant 0.000000e+00 : f32
    %388 = vector.shape_cast %46 : vector<1x1x32xi1> to vector<1x1x32xi1>
    %389 = vector.broadcast %388 : vector<1x1x32xi1> to vector<2x8x32xi1>
    %390 = vector.broadcast %cst_153 : f32 to vector<2x8x32xf32>
    %391 = arith.select %389, %359, %390 : vector<2x8x32xi1>, vector<2x8x32xf32>
    %cst_154 = arith.constant 0.000000e+00 : f32
    %392 = vector.broadcast %cst_154 : f32 to vector<2x8x32xf32>
    "tpu.trace_start"() <{level = 10 : i32, message = "bqd,bkd->bqk"}> : () -> ()
    %cst_155 = arith.constant dense<0.000000e+00> : vector<2x8x8xf32>
    %393 = tpu.matmul %353, %363, %cst_155 {dimension_numbers = #tpu.dot_dimension_numbers<[2], [2], [1], [1], [0, 0, 0, 1, 1, 1], [0], [0]>} : vector<2x8x32xf32>, vector<2x8x32xf32>, vector<2x8x8xf32> -> vector<2x8x8xf32>
    "tpu.trace_stop"() : () -> ()
    %cst_156 = arith.constant 0.353553385 : f32
    %394 = vector.broadcast %cst_156 : f32 to vector<2x8x8xf32>
    %395 = arith.mulf %393, %394 : vector<2x8x8xf32>
    %cst_157 = arith.constant dense<0xFF800000> : vector<2x8xf32>
    %396 = vector.multi_reduction <maximumf>, %395, %cst_157 [2] : vector<2x8x8xf32> to vector<2x8xf32>
    %397 = vector.shape_cast %396 : vector<2x8xf32> to vector<2x8x1xf32>
    %398 = vector.broadcast %397 : vector<2x8x1xf32> to vector<2x8x8xf32>
    %399 = arith.subf %395, %398 : vector<2x8x8xf32>
    %400 = math.exp %399 : vector<2x8x8xf32>
    %cst_158 = arith.constant dense<0.000000e+00> : vector<2x8xf32>
    %401 = vector.multi_reduction <add>, %400, %cst_158 [2] : vector<2x8x8xf32> to vector<2x8xf32>
    %402 = vector.shape_cast %401 : vector<2x8xf32> to vector<2x8x1xf32>
    %403 = tpu.reciprocal %402 {approx = true} : vector<2x8x1xf32> -> vector<2x8x1xf32>
    %404 = vector.broadcast %403 : vector<2x8x1xf32> to vector<2x8x8xf32>
    %405 = arith.mulf %400, %404 : vector<2x8x8xf32>
    "tpu.trace_start"() <{level = 10 : i32, message = "bqk,bkd->bqd"}> : () -> ()
    %cst_159 = arith.constant dense<0.000000e+00> : vector<2x8x32xf32>
    %406 = tpu.matmul %405, %379, %cst_159 {dimension_numbers = #tpu.dot_dimension_numbers<[2], [1], [1], [2], [0, 0, 0, 1, 1, 2], [0], [0]>} : vector<2x8x8xf32>, vector<2x8x32xf32>, vector<2x8x32xf32> -> vector<2x8x32xf32>
    "tpu.trace_stop"() : () -> ()
    %407 = arith.addf %392, %406 : vector<2x8x32xf32>
    "tpu.trace_start"() <{level = 10 : i32, message = "bqd,bkd->bqk"}> : () -> ()
    %cst_160 = arith.constant dense<0.000000e+00> : vector<2x8x8xf32>
    %408 = tpu.matmul %353, %367, %cst_160 {dimension_numbers = #tpu.dot_dimension_numbers<[2], [2], [1], [1], [0, 0, 0, 1, 1, 1], [0], [0]>} : vector<2x8x32xf32>, vector<2x8x32xf32>, vector<2x8x8xf32> -> vector<2x8x8xf32>
    "tpu.trace_stop"() : () -> ()
    %cst_161 = arith.constant 0.353553385 : f32
    %409 = vector.broadcast %cst_161 : f32 to vector<2x8x8xf32>
    %410 = arith.mulf %408, %409 : vector<2x8x8xf32>
    %cst_162 = arith.constant dense<0xFF800000> : vector<2x8xf32>
    %411 = vector.multi_reduction <maximumf>, %410, %cst_162 [2] : vector<2x8x8xf32> to vector<2x8xf32>
    %412 = vector.shape_cast %411 : vector<2x8xf32> to vector<2x8x1xf32>
    %413 = vector.broadcast %412 : vector<2x8x1xf32> to vector<2x8x8xf32>
    %414 = arith.subf %410, %413 : vector<2x8x8xf32>
    %415 = math.exp %414 : vector<2x8x8xf32>
    %cst_163 = arith.constant dense<0.000000e+00> : vector<2x8xf32>
    %416 = vector.multi_reduction <add>, %415, %cst_163 [2] : vector<2x8x8xf32> to vector<2x8xf32>
    %417 = vector.shape_cast %416 : vector<2x8xf32> to vector<2x8x1xf32>
    %418 = tpu.reciprocal %417 {approx = true} : vector<2x8x1xf32> -> vector<2x8x1xf32>
    %419 = vector.broadcast %418 : vector<2x8x1xf32> to vector<2x8x8xf32>
    %420 = arith.mulf %415, %419 : vector<2x8x8xf32>
    "tpu.trace_start"() <{level = 10 : i32, message = "bqk,bkd->bqd"}> : () -> ()
    %cst_164 = arith.constant dense<0.000000e+00> : vector<2x8x32xf32>
    %421 = tpu.matmul %420, %383, %cst_164 {dimension_numbers = #tpu.dot_dimension_numbers<[2], [1], [1], [2], [0, 0, 0, 1, 1, 2], [0], [0]>} : vector<2x8x8xf32>, vector<2x8x32xf32>, vector<2x8x32xf32> -> vector<2x8x32xf32>
    "tpu.trace_stop"() : () -> ()
    %422 = arith.addf %407, %421 : vector<2x8x32xf32>
    "tpu.trace_start"() <{level = 10 : i32, message = "bqd,bkd->bqk"}> : () -> ()
    %cst_165 = arith.constant dense<0.000000e+00> : vector<2x8x8xf32>
    %423 = tpu.matmul %353, %371, %cst_165 {dimension_numbers = #tpu.dot_dimension_numbers<[2], [2], [1], [1], [0, 0, 0, 1, 1, 1], [0], [0]>} : vector<2x8x32xf32>, vector<2x8x32xf32>, vector<2x8x8xf32> -> vector<2x8x8xf32>
    "tpu.trace_stop"() : () -> ()
    %cst_166 = arith.constant 0.353553385 : f32
    %424 = vector.broadcast %cst_166 : f32 to vector<2x8x8xf32>
    %425 = arith.mulf %423, %424 : vector<2x8x8xf32>
    %cst_167 = arith.constant dense<0xFF800000> : vector<2x8xf32>
    %426 = vector.multi_reduction <maximumf>, %425, %cst_167 [2] : vector<2x8x8xf32> to vector<2x8xf32>
    %427 = vector.shape_cast %426 : vector<2x8xf32> to vector<2x8x1xf32>
    %428 = vector.broadcast %427 : vector<2x8x1xf32> to vector<2x8x8xf32>
    %429 = arith.subf %425, %428 : vector<2x8x8xf32>
    %430 = math.exp %429 : vector<2x8x8xf32>
    %cst_168 = arith.constant dense<0.000000e+00> : vector<2x8xf32>
    %431 = vector.multi_reduction <add>, %430, %cst_168 [2] : vector<2x8x8xf32> to vector<2x8xf32>
    %432 = vector.shape_cast %431 : vector<2x8xf32> to vector<2x8x1xf32>
    %433 = tpu.reciprocal %432 {approx = true} : vector<2x8x1xf32> -> vector<2x8x1xf32>
    %434 = vector.broadcast %433 : vector<2x8x1xf32> to vector<2x8x8xf32>
    %435 = arith.mulf %430, %434 : vector<2x8x8xf32>
    "tpu.trace_start"() <{level = 10 : i32, message = "bqk,bkd->bqd"}> : () -> ()
    %cst_169 = arith.constant dense<0.000000e+00> : vector<2x8x32xf32>
    %436 = tpu.matmul %435, %387, %cst_169 {dimension_numbers = #tpu.dot_dimension_numbers<[2], [1], [1], [2], [0, 0, 0, 1, 1, 2], [0], [0]>} : vector<2x8x8xf32>, vector<2x8x32xf32>, vector<2x8x32xf32> -> vector<2x8x32xf32>
    "tpu.trace_stop"() : () -> ()
    %437 = arith.addf %422, %436 : vector<2x8x32xf32>
    "tpu.trace_start"() <{level = 10 : i32, message = "bqd,bkd->bqk"}> : () -> ()
    %cst_170 = arith.constant dense<0.000000e+00> : vector<2x8x8xf32>
    %438 = tpu.matmul %353, %375, %cst_170 {dimension_numbers = #tpu.dot_dimension_numbers<[2], [2], [1], [1], [0, 0, 0, 1, 1, 1], [0], [0]>} : vector<2x8x32xf32>, vector<2x8x32xf32>, vector<2x8x8xf32> -> vector<2x8x8xf32>
    "tpu.trace_stop"() : () -> ()
    %cst_171 = arith.constant 0.353553385 : f32
    %439 = vector.broadcast %cst_171 : f32 to vector<2x8x8xf32>
    %440 = arith.mulf %438, %439 : vector<2x8x8xf32>
    %cst_172 = arith.constant dense<0xFF800000> : vector<2x8xf32>
    %441 = vector.multi_reduction <maximumf>, %440, %cst_172 [2] : vector<2x8x8xf32> to vector<2x8xf32>
    %442 = vector.shape_cast %441 : vector<2x8xf32> to vector<2x8x1xf32>
    %443 = vector.broadcast %442 : vector<2x8x1xf32> to vector<2x8x8xf32>
    %444 = arith.subf %440, %443 : vector<2x8x8xf32>
    %445 = math.exp %444 : vector<2x8x8xf32>
    %cst_173 = arith.constant dense<0.000000e+00> : vector<2x8xf32>
    %446 = vector.multi_reduction <add>, %445, %cst_173 [2] : vector<2x8x8xf32> to vector<2x8xf32>
    %447 = vector.shape_cast %446 : vector<2x8xf32> to vector<2x8x1xf32>
    %448 = tpu.reciprocal %447 {approx = true} : vector<2x8x1xf32> -> vector<2x8x1xf32>
    %449 = vector.broadcast %448 : vector<2x8x1xf32> to vector<2x8x8xf32>
    %450 = arith.mulf %445, %449 : vector<2x8x8xf32>
    "tpu.trace_start"() <{level = 10 : i32, message = "bqk,bkd->bqd"}> : () -> ()
    %cst_174 = arith.constant dense<0.000000e+00> : vector<2x8x32xf32>
    %451 = tpu.matmul %450, %391, %cst_174 {dimension_numbers = #tpu.dot_dimension_numbers<[2], [1], [1], [2], [0, 0, 0, 1, 1, 2], [0], [0]>} : vector<2x8x8xf32>, vector<2x8x32xf32>, vector<2x8x32xf32> -> vector<2x8x32xf32>
    "tpu.trace_stop"() : () -> ()
    %452 = arith.addf %437, %451 : vector<2x8x32xf32>
    %453 = vector.shape_cast %452 : vector<2x8x32xf32> to vector<16x32xf32>
    %cst_175 = arith.constant dense<0.000000e+00> : vector<16x32xf32>
    %454 = tpu.matmul %453, %8, %cst_175 {dimension_numbers = #tpu.dot_dimension_numbers<[1], [0], [0], [1], [0, 0, 1, 1], [], []>} : vector<16x32xf32>, vector<32x32xf32>, vector<16x32xf32> -> vector<16x32xf32>
    %455 = vector.broadcast %9 : vector<1x32xf32> to vector<16x32xf32>
    %456 = arith.addf %454, %455 : vector<16x32xf32>
    %457 = arith.addf %347, %456 : vector<16x32xf32>
    %cst_176 = arith.constant dense<0.000000e+00> : vector<16xf32>
    %458 = vector.multi_reduction <add>, %457, %cst_176 [1] : vector<16x32xf32> to vector<16xf32>
    %459 = vector.shape_cast %458 : vector<16xf32> to vector<16x1xf32>
    %cst_177 = arith.constant 3.200000e+01 : f32
    %460 = vector.broadcast %cst_177 : f32 to vector<16x1xf32>
    %461 = arith.divf %459, %460 : vector<16x1xf32>
    %462 = vector.broadcast %461 : vector<16x1xf32> to vector<16x32xf32>
    %463 = arith.subf %457, %462 : vector<16x32xf32>
    %464 = arith.mulf %463, %463 : vector<16x32xf32>
    %cst_178 = arith.constant dense<0.000000e+00> : vector<16xf32>
    %465 = vector.multi_reduction <add>, %464, %cst_178 [1] : vector<16x32xf32> to vector<16xf32>
    %466 = vector.shape_cast %465 : vector<16xf32> to vector<16x1xf32>
    %cst_179 = arith.constant 3.200000e+01 : f32
    %467 = vector.broadcast %cst_179 : f32 to vector<16x1xf32>
    %468 = arith.divf %466, %467 : vector<16x1xf32>
    %469 = vector.broadcast %461 : vector<16x1xf32> to vector<16x32xf32>
    %470 = arith.subf %457, %469 : vector<16x32xf32>
    %cst_180 = arith.constant 9.99999974E-6 : f32
    %471 = vector.broadcast %cst_180 : f32 to vector<16x1xf32>
    %472 = arith.addf %468, %471 : vector<16x1xf32>
    %473 = math.rsqrt %472 : vector<16x1xf32>
    %474 = vector.broadcast %473 : vector<16x1xf32> to vector<16x32xf32>
    %475 = arith.mulf %470, %474 : vector<16x32xf32>
    %476 = vector.broadcast %18 : vector<1x32xf32> to vector<16x32xf32>
    %477 = arith.mulf %475, %476 : vector<16x32xf32>
    %478 = vector.broadcast %19 : vector<1x32xf32> to vector<16x32xf32>
    %479 = arith.addf %477, %478 : vector<16x32xf32>
    %480 = arith.addf %479, %1 : vector<16x32xf32>
    %cst_181 = arith.constant dense<0.000000e+00> : vector<16x32xf32>
    %481 = tpu.matmul %480, %10, %cst_181 {dimension_numbers = #tpu.dot_dimension_numbers<[1], [0], [0], [1], [0, 0, 1, 1], [], []>} : vector<16x32xf32>, vector<32x32xf32>, vector<16x32xf32> -> vector<16x32xf32>
    %482 = vector.broadcast %11 : vector<1x32xf32> to vector<16x32xf32>
    %483 = arith.addf %481, %482 : vector<16x32xf32>
    %484 = vector.shape_cast %483 : vector<16x32xf32> to vector<2x8x32xf32>
    %cst_182 = arith.constant 0.000000e+00 : f32
    %485 = vector.broadcast %cst_182 : f32 to vector<2x8x32xf32>
    "tpu.trace_start"() <{level = 10 : i32, message = "bqd,bkd->bqk"}> : () -> ()
    %cst_183 = arith.constant dense<0.000000e+00> : vector<2x8x8xf32>
    %486 = tpu.matmul %484, %63, %cst_183 {dimension_numbers = #tpu.dot_dimension_numbers<[2], [2], [1], [1], [0, 0, 0, 1, 1, 1], [0], [0]>} : vector<2x8x32xf32>, vector<2x8x32xf32>, vector<2x8x8xf32> -> vector<2x8x8xf32>
    "tpu.trace_stop"() : () -> ()
    %cst_184 = arith.constant 0.353553385 : f32
    %487 = vector.broadcast %cst_184 : f32 to vector<2x8x8xf32>
    %488 = arith.mulf %486, %487 : vector<2x8x8xf32>
    %cst_185 = arith.constant dense<0xFF800000> : vector<2x8xf32>
    %489 = vector.multi_reduction <maximumf>, %488, %cst_185 [2] : vector<2x8x8xf32> to vector<2x8xf32>
    %490 = vector.shape_cast %489 : vector<2x8xf32> to vector<2x8x1xf32>
    %491 = vector.broadcast %490 : vector<2x8x1xf32> to vector<2x8x8xf32>
    %492 = arith.subf %488, %491 : vector<2x8x8xf32>
    %493 = math.exp %492 : vector<2x8x8xf32>
    %cst_186 = arith.constant dense<0.000000e+00> : vector<2x8xf32>
    %494 = vector.multi_reduction <add>, %493, %cst_186 [2] : vector<2x8x8xf32> to vector<2x8xf32>
    %495 = vector.shape_cast %494 : vector<2x8xf32> to vector<2x8x1xf32>
    %496 = tpu.reciprocal %495 {approx = true} : vector<2x8x1xf32> -> vector<2x8x1xf32>
    %497 = vector.broadcast %496 : vector<2x8x1xf32> to vector<2x8x8xf32>
    %498 = arith.mulf %493, %497 : vector<2x8x8xf32>
    "tpu.trace_start"() <{level = 10 : i32, message = "bqk,bkd->bqd"}> : () -> ()
    %cst_187 = arith.constant dense<0.000000e+00> : vector<2x8x32xf32>
    %499 = tpu.matmul %498, %79, %cst_187 {dimension_numbers = #tpu.dot_dimension_numbers<[2], [1], [1], [2], [0, 0, 0, 1, 1, 2], [0], [0]>} : vector<2x8x8xf32>, vector<2x8x32xf32>, vector<2x8x32xf32> -> vector<2x8x32xf32>
    "tpu.trace_stop"() : () -> ()
    %500 = arith.addf %485, %499 : vector<2x8x32xf32>
    "tpu.trace_start"() <{level = 10 : i32, message = "bqd,bkd->bqk"}> : () -> ()
    %cst_188 = arith.constant dense<0.000000e+00> : vector<2x8x8xf32>
    %501 = tpu.matmul %484, %67, %cst_188 {dimension_numbers = #tpu.dot_dimension_numbers<[2], [2], [1], [1], [0, 0, 0, 1, 1, 1], [0], [0]>} : vector<2x8x32xf32>, vector<2x8x32xf32>, vector<2x8x8xf32> -> vector<2x8x8xf32>
    "tpu.trace_stop"() : () -> ()
    %cst_189 = arith.constant 0.353553385 : f32
    %502 = vector.broadcast %cst_189 : f32 to vector<2x8x8xf32>
    %503 = arith.mulf %501, %502 : vector<2x8x8xf32>
    %cst_190 = arith.constant dense<0xFF800000> : vector<2x8xf32>
    %504 = vector.multi_reduction <maximumf>, %503, %cst_190 [2] : vector<2x8x8xf32> to vector<2x8xf32>
    %505 = vector.shape_cast %504 : vector<2x8xf32> to vector<2x8x1xf32>
    %506 = vector.broadcast %505 : vector<2x8x1xf32> to vector<2x8x8xf32>
    %507 = arith.subf %503, %506 : vector<2x8x8xf32>
    %508 = math.exp %507 : vector<2x8x8xf32>
    %cst_191 = arith.constant dense<0.000000e+00> : vector<2x8xf32>
    %509 = vector.multi_reduction <add>, %508, %cst_191 [2] : vector<2x8x8xf32> to vector<2x8xf32>
    %510 = vector.shape_cast %509 : vector<2x8xf32> to vector<2x8x1xf32>
    %511 = tpu.reciprocal %510 {approx = true} : vector<2x8x1xf32> -> vector<2x8x1xf32>
    %512 = vector.broadcast %511 : vector<2x8x1xf32> to vector<2x8x8xf32>
    %513 = arith.mulf %508, %512 : vector<2x8x8xf32>
    "tpu.trace_start"() <{level = 10 : i32, message = "bqk,bkd->bqd"}> : () -> ()
    %cst_192 = arith.constant dense<0.000000e+00> : vector<2x8x32xf32>
    %514 = tpu.matmul %513, %83, %cst_192 {dimension_numbers = #tpu.dot_dimension_numbers<[2], [1], [1], [2], [0, 0, 0, 1, 1, 2], [0], [0]>} : vector<2x8x8xf32>, vector<2x8x32xf32>, vector<2x8x32xf32> -> vector<2x8x32xf32>
    "tpu.trace_stop"() : () -> ()
    %515 = arith.addf %500, %514 : vector<2x8x32xf32>
    "tpu.trace_start"() <{level = 10 : i32, message = "bqd,bkd->bqk"}> : () -> ()
    %cst_193 = arith.constant dense<0.000000e+00> : vector<2x8x8xf32>
    %516 = tpu.matmul %484, %71, %cst_193 {dimension_numbers = #tpu.dot_dimension_numbers<[2], [2], [1], [1], [0, 0, 0, 1, 1, 1], [0], [0]>} : vector<2x8x32xf32>, vector<2x8x32xf32>, vector<2x8x8xf32> -> vector<2x8x8xf32>
    "tpu.trace_stop"() : () -> ()
    %cst_194 = arith.constant 0.353553385 : f32
    %517 = vector.broadcast %cst_194 : f32 to vector<2x8x8xf32>
    %518 = arith.mulf %516, %517 : vector<2x8x8xf32>
    %cst_195 = arith.constant dense<0xFF800000> : vector<2x8xf32>
    %519 = vector.multi_reduction <maximumf>, %518, %cst_195 [2] : vector<2x8x8xf32> to vector<2x8xf32>
    %520 = vector.shape_cast %519 : vector<2x8xf32> to vector<2x8x1xf32>
    %521 = vector.broadcast %520 : vector<2x8x1xf32> to vector<2x8x8xf32>
    %522 = arith.subf %518, %521 : vector<2x8x8xf32>
    %523 = math.exp %522 : vector<2x8x8xf32>
    %cst_196 = arith.constant dense<0.000000e+00> : vector<2x8xf32>
    %524 = vector.multi_reduction <add>, %523, %cst_196 [2] : vector<2x8x8xf32> to vector<2x8xf32>
    %525 = vector.shape_cast %524 : vector<2x8xf32> to vector<2x8x1xf32>
    %526 = tpu.reciprocal %525 {approx = true} : vector<2x8x1xf32> -> vector<2x8x1xf32>
    %527 = vector.broadcast %526 : vector<2x8x1xf32> to vector<2x8x8xf32>
    %528 = arith.mulf %523, %527 : vector<2x8x8xf32>
    "tpu.trace_start"() <{level = 10 : i32, message = "bqk,bkd->bqd"}> : () -> ()
    %cst_197 = arith.constant dense<0.000000e+00> : vector<2x8x32xf32>
    %529 = tpu.matmul %528, %87, %cst_197 {dimension_numbers = #tpu.dot_dimension_numbers<[2], [1], [1], [2], [0, 0, 0, 1, 1, 2], [0], [0]>} : vector<2x8x8xf32>, vector<2x8x32xf32>, vector<2x8x32xf32> -> vector<2x8x32xf32>
    "tpu.trace_stop"() : () -> ()
    %530 = arith.addf %515, %529 : vector<2x8x32xf32>
    "tpu.trace_start"() <{level = 10 : i32, message = "bqd,bkd->bqk"}> : () -> ()
    %cst_198 = arith.constant dense<0.000000e+00> : vector<2x8x8xf32>
    %531 = tpu.matmul %484, %75, %cst_198 {dimension_numbers = #tpu.dot_dimension_numbers<[2], [2], [1], [1], [0, 0, 0, 1, 1, 1], [0], [0]>} : vector<2x8x32xf32>, vector<2x8x32xf32>, vector<2x8x8xf32> -> vector<2x8x8xf32>
    "tpu.trace_stop"() : () -> ()
    %cst_199 = arith.constant 0.353553385 : f32
    %532 = vector.broadcast %cst_199 : f32 to vector<2x8x8xf32>
    %533 = arith.mulf %531, %532 : vector<2x8x8xf32>
    %cst_200 = arith.constant dense<0xFF800000> : vector<2x8xf32>
    %534 = vector.multi_reduction <maximumf>, %533, %cst_200 [2] : vector<2x8x8xf32> to vector<2x8xf32>
    %535 = vector.shape_cast %534 : vector<2x8xf32> to vector<2x8x1xf32>
    %536 = vector.broadcast %535 : vector<2x8x1xf32> to vector<2x8x8xf32>
    %537 = arith.subf %533, %536 : vector<2x8x8xf32>
    %538 = math.exp %537 : vector<2x8x8xf32>
    %cst_201 = arith.constant dense<0.000000e+00> : vector<2x8xf32>
    %539 = vector.multi_reduction <add>, %538, %cst_201 [2] : vector<2x8x8xf32> to vector<2x8xf32>
    %540 = vector.shape_cast %539 : vector<2x8xf32> to vector<2x8x1xf32>
    %541 = tpu.reciprocal %540 {approx = true} : vector<2x8x1xf32> -> vector<2x8x1xf32>
    %542 = vector.broadcast %541 : vector<2x8x1xf32> to vector<2x8x8xf32>
    %543 = arith.mulf %538, %542 : vector<2x8x8xf32>
    "tpu.trace_start"() <{level = 10 : i32, message = "bqk,bkd->bqd"}> : () -> ()
    %cst_202 = arith.constant dense<0.000000e+00> : vector<2x8x32xf32>
    %544 = tpu.matmul %543, %91, %cst_202 {dimension_numbers = #tpu.dot_dimension_numbers<[2], [1], [1], [2], [0, 0, 0, 1, 1, 2], [0], [0]>} : vector<2x8x8xf32>, vector<2x8x32xf32>, vector<2x8x32xf32> -> vector<2x8x32xf32>
    "tpu.trace_stop"() : () -> ()
    %545 = arith.addf %530, %544 : vector<2x8x32xf32>
    %546 = vector.shape_cast %545 : vector<2x8x32xf32> to vector<16x32xf32>
    %cst_203 = arith.constant dense<0.000000e+00> : vector<16x32xf32>
    %547 = tpu.matmul %546, %12, %cst_203 {dimension_numbers = #tpu.dot_dimension_numbers<[1], [0], [0], [1], [0, 0, 1, 1], [], []>} : vector<16x32xf32>, vector<32x32xf32>, vector<16x32xf32> -> vector<16x32xf32>
    %548 = vector.broadcast %13 : vector<1x32xf32> to vector<16x32xf32>
    %549 = arith.addf %547, %548 : vector<16x32xf32>
    %550 = arith.addf %479, %549 : vector<16x32xf32>
    %cst_204 = arith.constant dense<0.000000e+00> : vector<16xf32>
    %551 = vector.multi_reduction <add>, %550, %cst_204 [1] : vector<16x32xf32> to vector<16xf32>
    %552 = vector.shape_cast %551 : vector<16xf32> to vector<16x1xf32>
    %cst_205 = arith.constant 3.200000e+01 : f32
    %553 = vector.broadcast %cst_205 : f32 to vector<16x1xf32>
    %554 = arith.divf %552, %553 : vector<16x1xf32>
    %555 = vector.broadcast %554 : vector<16x1xf32> to vector<16x32xf32>
    %556 = arith.subf %550, %555 : vector<16x32xf32>
    %557 = arith.mulf %556, %556 : vector<16x32xf32>
    %cst_206 = arith.constant dense<0.000000e+00> : vector<16xf32>
    %558 = vector.multi_reduction <add>, %557, %cst_206 [1] : vector<16x32xf32> to vector<16xf32>
    %559 = vector.shape_cast %558 : vector<16xf32> to vector<16x1xf32>
    %cst_207 = arith.constant 3.200000e+01 : f32
    %560 = vector.broadcast %cst_207 : f32 to vector<16x1xf32>
    %561 = arith.divf %559, %560 : vector<16x1xf32>
    %562 = vector.broadcast %554 : vector<16x1xf32> to vector<16x32xf32>
    %563 = arith.subf %550, %562 : vector<16x32xf32>
    %cst_208 = arith.constant 9.99999974E-6 : f32
    %564 = vector.broadcast %cst_208 : f32 to vector<16x1xf32>
    %565 = arith.addf %561, %564 : vector<16x1xf32>
    %566 = math.rsqrt %565 : vector<16x1xf32>
    %567 = vector.broadcast %566 : vector<16x1xf32> to vector<16x32xf32>
    %568 = arith.mulf %563, %567 : vector<16x32xf32>
    %569 = vector.broadcast %20 : vector<1x32xf32> to vector<16x32xf32>
    %570 = arith.mulf %568, %569 : vector<16x32xf32>
    %571 = vector.broadcast %21 : vector<1x32xf32> to vector<16x32xf32>
    %572 = arith.addf %570, %571 : vector<16x32xf32>
    %cst_209 = arith.constant dense<0.000000e+00> : vector<16x64xf32>
    %573 = tpu.matmul %572, %14, %cst_209 {dimension_numbers = #tpu.dot_dimension_numbers<[1], [0], [0], [1], [0, 0, 1, 1], [], []>} : vector<16x32xf32>, vector<32x64xf32>, vector<16x64xf32> -> vector<16x64xf32>
    %574 = vector.broadcast %15 : vector<1x64xf32> to vector<16x64xf32>
    %575 = arith.addf %573, %574 : vector<16x64xf32>
    %cst_210 = arith.constant 0.000000e+00 : f32
    %576 = vector.broadcast %cst_210 : f32 to vector<16x64xf32>
    %577 = arith.maximumf %575, %576 : vector<16x64xf32>
    %cst_211 = arith.constant dense<0.000000e+00> : vector<16x32xf32>
    %578 = tpu.matmul %577, %16, %cst_211 {dimension_numbers = #tpu.dot_dimension_numbers<[1], [0], [0], [1], [0, 0, 1, 1], [], []>} : vector<16x64xf32>, vector<64x32xf32>, vector<16x32xf32> -> vector<16x32xf32>
    %579 = vector.broadcast %17 : vector<1x32xf32> to vector<16x32xf32>
    %580 = arith.addf %578, %579 : vector<16x32xf32>
    %581 = arith.addf %572, %580 : vector<16x32xf32>
    %cst_212 = arith.constant dense<0.000000e+00> : vector<16xf32>
    %582 = vector.multi_reduction <add>, %581, %cst_212 [1] : vector<16x32xf32> to vector<16xf32>
    %583 = vector.shape_cast %582 : vector<16xf32> to vector<16x1xf32>
    %cst_213 = arith.constant 3.200000e+01 : f32
    %584 = vector.broadcast %cst_213 : f32 to vector<16x1xf32>
    %585 = arith.divf %583, %584 : vector<16x1xf32>
    %586 = vector.broadcast %585 : vector<16x1xf32> to vector<16x32xf32>
    %587 = arith.subf %581, %586 : vector<16x32xf32>
    %588 = arith.mulf %587, %587 : vector<16x32xf32>
    %cst_214 = arith.constant dense<0.000000e+00> : vector<16xf32>
    %589 = vector.multi_reduction <add>, %588, %cst_214 [1] : vector<16x32xf32> to vector<16xf32>
    %590 = vector.shape_cast %589 : vector<16xf32> to vector<16x1xf32>
    %cst_215 = arith.constant 3.200000e+01 : f32
    %591 = vector.broadcast %cst_215 : f32 to vector<16x1xf32>
    %592 = arith.divf %590, %591 : vector<16x1xf32>
    %593 = vector.broadcast %585 : vector<16x1xf32> to vector<16x32xf32>
    %594 = arith.subf %581, %593 : vector<16x32xf32>
    %cst_216 = arith.constant 9.99999974E-6 : f32
    %595 = vector.broadcast %cst_216 : f32 to vector<16x1xf32>
    %596 = arith.addf %592, %595 : vector<16x1xf32>
    %597 = math.rsqrt %596 : vector<16x1xf32>
    %598 = vector.broadcast %597 : vector<16x1xf32> to vector<16x32xf32>
    %599 = arith.mulf %594, %598 : vector<16x32xf32>
    %600 = vector.broadcast %22 : vector<1x32xf32> to vector<16x32xf32>
    %601 = arith.mulf %599, %600 : vector<16x32xf32>
    %602 = vector.broadcast %23 : vector<1x32xf32> to vector<16x32xf32>
    %603 = arith.addf %601, %602 : vector<16x32xf32>
    %cst_217 = arith.constant dense<0.000000e+00> : vector<16xf32>
    %604 = vector.multi_reduction <add>, %603, %cst_217 [1] : vector<16x32xf32> to vector<16xf32>
    %605 = vector.shape_cast %604 : vector<16xf32> to vector<16x1xf32>
    %cst_218 = arith.constant 3.200000e+01 : f32
    %606 = vector.broadcast %cst_218 : f32 to vector<16x1xf32>
    %607 = arith.divf %605, %606 : vector<16x1xf32>
    %608 = vector.broadcast %607 : vector<16x1xf32> to vector<16x32xf32>
    %609 = arith.subf %603, %608 : vector<16x32xf32>
    %610 = arith.mulf %609, %609 : vector<16x32xf32>
    %cst_219 = arith.constant dense<0.000000e+00> : vector<16xf32>
    %611 = vector.multi_reduction <add>, %610, %cst_219 [1] : vector<16x32xf32> to vector<16xf32>
    %612 = vector.shape_cast %611 : vector<16xf32> to vector<16x1xf32>
    %cst_220 = arith.constant 3.200000e+01 : f32
    %613 = vector.broadcast %cst_220 : f32 to vector<16x1xf32>
    %614 = arith.divf %612, %613 : vector<16x1xf32>
    %615 = vector.broadcast %607 : vector<16x1xf32> to vector<16x32xf32>
    %616 = arith.subf %603, %615 : vector<16x32xf32>
    %cst_221 = arith.constant 9.99999974E-6 : f32
    %617 = vector.broadcast %cst_221 : f32 to vector<16x1xf32>
    %618 = arith.addf %614, %617 : vector<16x1xf32>
    %619 = math.rsqrt %618 : vector<16x1xf32>
    %620 = vector.broadcast %619 : vector<16x1xf32> to vector<16x32xf32>
    %621 = arith.mulf %616, %620 : vector<16x32xf32>
    %622 = vector.broadcast %24 : vector<1x32xf32> to vector<16x32xf32>
    %623 = arith.mulf %621, %622 : vector<16x32xf32>
    %624 = vector.broadcast %25 : vector<1x32xf32> to vector<16x32xf32>
    %625 = arith.addf %623, %624 : vector<16x32xf32>
    %c0_222 = arith.constant 0 : index
    %c0_223 = arith.constant 0 : index
    %626 = vector.load %arg30[%c0_222, %c0_223] : memref<16x32xf32, #tpu.memory_space<vmem>>, vector<16x32xf32>
    tpu.vector_store %arg30[%c0_222, %c0_223], %625 {strides = array<i32>} : memref<16x32xf32, #tpu.memory_space<vmem>>, vector<16x32xf32>,
    return
  }
}

</mosaic_0001>

<bundles_post_ra>
// kernel: decoder_forward.1
= control target key start
LH: loop header
LB: loop body
LE: loop exit
PB: predicated region body
PF: predicated region fallthrough
CT: control target
= control target key end

     0   :  { %s8760_s6 = smov 1   ;;  %s8761_s10 = smov 2   ;;  %s9857_s0 = inlined_call_operand.smem [shape: u32[31], index: -1, kind: input, shape index: {}] }
   0x1   :  { %s8820_s5 = sld [smem:[%s9857_s0]]   ;;  %s8762_s14 = smov 3  }
   0x2   :  { %s8825_s9 = sld [smem:[%s9857_s0 + %s8760_s6]]   ;;  %s8763_s18 = smov 4  }
   0x3   :  { %s8830_s13 = sld [smem:[%s9857_s0 + %s8761_s10]]   ;;  %s8764_s22 = smov 5  }
   0x4   :  { %s8835_s17 = sld [smem:[%s9857_s0 + %s8762_s14]]   ;;  %s8765_s26 = smov 6  }
   0x5   :  { %s8840_s21 = sld [smem:[%s9857_s0 + %s8763_s18]]   ;;  %s8766_s30 = smov 7  }
   0x6   :  { %s8845_s25 = sld [smem:[%s9857_s0 + %s8764_s22]]   ;;  %s8767_s4 = smov 8  }
   0x7   :  { %9871 = sst [smem:[#allocation37_spill]] %s8820_s5  ;;  %s8768_s10 = smov 9  }
   0x8   :  { %9872 = sst [smem:[#allocation38_spill]] %s8825_s9  ;;  %s8769_s15 = smov 10  }
   0x9   :  { %9873 = sst [smem:[#allocation39_spill]] %s8830_s13  ;;  %s8770_s20 = smov 11  }
   0xa   :  { %9874 = sst [smem:[#allocation40_spill]] %s8835_s17  ;;  %s8772_s1 = smov 13  }
   0xb   :  { %9875 = sst [smem:[#allocation41_spill]] %s8840_s21  ;;  %s8773_s7 = smov 14  }
   0xc   :  { %9876 = sst [smem:[#allocation42_spill]] %s8845_s25  ;;  %s8775_s22 = smov 16  }
   0xd   :  { %s8850_s29 = sld [smem:[%s9857_s0 + %s8765_s26]]   ;;  %s8771_s26 = smov 12  }
   0xe   :  { %s8855_s3 = sld [smem:[%s9857_s0 + %s8766_s30]]   ;;  %s8776_s28 = smov 17  }
   0xf   :  { %s8860_s8 = sld [smem:[%s9857_s0 + %s8767_s4]]  }
  0x10   :  { %s8865_s14 = sld [smem:[%s9857_s0 + %s8768_s10]]  }
  0x11   :  { %s8870_s19 = sld [smem:[%s9857_s0 + %s8769_s15]]   ;;  %s8774_s15 = smov 15  }
  0x12   :  { %s8875_s24 = sld [smem:[%s9857_s0 + %s8770_s20]]  }
  0x13   :  { %9877 = sst [smem:[#allocation43_spill]] %s8850_s29 }
  0x14   :  { %s8880_s30 = sld [smem:[%s9857_s0 + %s8771_s26]]  }
  0x15   :  { %9878 = sst [smem:[#allocation44_spill]] %s8860_s8 }
  0x16   :  { %s8885_s6 = sld [smem:[%s9857_s0 + %s8772_s1]]  }
  0x17   :  { %9879 = sst [smem:[#allocation45_spill]] %s8870_s19 }
  0x18   :  { %s8890_s12 = sld [smem:[%s9857_s0 + %s8773_s7]]   ;;  %s8777_s7 = smov 18  }
  0x19   :  { %s8895_s20 = sld [smem:[%s9857_s0 + %s8774_s15]]   ;;  %s8778_s15 = smov 19  }
  0x1a   :  { %9880 = sst [smem:[#allocation46_spill]] %s8880_s30 }
  0x1b   :  { %s8900_s27 = sld [smem:[%s9857_s0 + %s8775_s22]]   ;;  %s8779_s22 = smov 20  }
  0x1c   :  { %s8905_s4 = sld [smem:[%s9857_s0 + %s8776_s28]]   ;;  %s8780_s28 = smov 21  }
  0x1d   :  { %s8910_s19 = sld [smem:[%s9857_s0 + %s8777_s7]]   ;;  %s8781_s7 = smov 22  }
  0x1e   :  { %9881 = sst [smem:[#allocation47_spill]] %s8890_s12 }
  0x1f   :  { %s8915_s8 = sld [smem:[%s9857_s0 + %s8778_s15]]   ;;  %s8782_s15 = smov 23  }
  0x20   :  { %s8920_s25 = sld [smem:[%s9857_s0 + %s8779_s22]]   ;;  %s8783_s22 = smov 24  }
  0x21   :  { %s8925_s29 = sld [smem:[%s9857_s0 + %s8780_s28]]   ;;  %s8784_s28 = smov 25  }
  0x22   :  { %s8935_s12 = sld [smem:[%s9857_s0 + %s8782_s15]]   ;;  %s8786_s15 = smov 27  }
  0x23   :  { %9882 = sst [smem:[#allocation48_spill]] %s8910_s19 }
  0x24   :  { %s8930_s19 = sld [smem:[%s9857_s0 + %s8781_s7]]   ;;  %s8785_s7 = smov 26  }
  0x25   :  { %s8945_s17 = sld [smem:[%s9857_s0 + %s8784_s28]]   ;;  %s8788_s28 = smov 29  }
  0x26   :  { %9883 = sst [smem:[#allocation49_spill]] %s8920_s25 }
  0x27   :  { %s8940_s25 = sld [smem:[%s9857_s0 + %s8783_s22]]   ;;  %s8787_s22 = smov 28  }
  0x28   :  { %s8950_s9 = sld [smem:[%s9857_s0 + %s8785_s7]]   ;;  %s8789_s7 = smov 30  }
  0x29   :  { %s8955_s30 = sld [smem:[%s9857_s0 + %s8786_s15]]  }
  0x2a   :  { %s8960_s13 = sld [smem:[%s9857_s0 + %s8787_s22]]  }
  0x2b   :  { %s8965_s5 = sld [smem:[%s9857_s0 + %s8788_s28]]  }
  0x2c   :  { %s8970_s21 = sld [smem:[%s9857_s0 + %s8789_s7]]  }
  0x2d   :  { %66 = vsyncpa [#allocation3], 0 }
  0x2e   :  { %67 = vsyncpa [#allocation5], 0 }
  0x2f   :  { %68 = vsyncpa [#allocation8], 0 }
  0x30   :  { %69 = vsyncpa [#allocation11], 0 }
  0x31   :  { %70 = vsyncpa [#allocation14], 0 }
  0x32   :  { %71 = vsyncpa [#allocation17], 0 }
  0x33   :  { %72 = vsyncpa [#allocation20], 0 }
  0x34   :  { %73 = vsyncpa [#allocation23], 0 }
  0x35   :  { %74 = vsyncpa [#allocation26], 0  ;;  %s8790_s15 = smov [#allocation4]   ;;  %s8791_s18 = smov [#allocation7]  }
  0x36   :  { %s107_s16 = sshll.u32 %s8790_s15, 4  ;;  %s131_s22 = sshll.u32 %s8791_s18, 4  ;;  %s108_s16 = int_to_ptr.vmem [resolvable:$true] %s107_s16  ;;  %s132_s22 = int_to_ptr.vmem [resolvable:$true] %s131_s22 }
  0x37   :  { %s8410_s23 = scalar_lea.vmem %s108_s16, 16  ;;  %s8414_s26 = scalar_lea.vmem %s108_s16, 32 }
  0x38   :  { %p8411_p0 = scmp.ne.s32.totalorder %s108_s16, %s8410_s23  ;;  %p8415_p1 = scmp.lt.s32.totalorder %s108_s16, %s108_s16 }
  0x39   :  { %p8416_p2 = scmp.lt.s32.totalorder %s8414_s26, %s8410_s23 }
  0x3b   :  { %p8417_p3 = por %p8416_p2, %p8415_p1 }
  0x3d   :  { %p8418_p4 = pnand %p8417_p3, %p8411_p0 }
  0x3f   :  { %8421 = shalt.err (!%p8418_p4)
}
  0x40   :  { %110 = dma.hbm_to_vmem [thread:$0]  %s8865_s14, 16, %s108_s16, [#allocation5]  }
  0x41   :  { %s8430_s0 = scalar_lea.vmem %s132_s22, 16  ;;  %s8434_s28 = scalar_lea.vmem %s132_s22, 32 }
  0x42   :  { %p8431_p5 = scmp.ne.s32.totalorder %s132_s22, %s8430_s0  ;;  %p8435_p6 = scmp.lt.s32.totalorder %s132_s22, %s132_s22 }
  0x43   :  { %p8436_p7 = scmp.lt.s32.totalorder %s8434_s28, %s8430_s0 }
  0x45   :  { %p8437_p8 = por %p8436_p7, %p8435_p6 }
  0x47   :  { %p8438_p9 = pnand %p8437_p8, %p8431_p5 }
  0x49   :  { %8441 = shalt.err (!%p8438_p9)
}
  0x4a   :  { %134 = dma.hbm_to_vmem [thread:$0]  %s8885_s6, 16, %s132_s22, [#allocation8]  }
  0x4b   :  { %s8792_s1 = smov [#allocation10]  }
  0x4c   :  { %s152_s2 = sshll.u32 %s8792_s1, 4  ;;  %s153_s2 = int_to_ptr.vmem [resolvable:$true] %s152_s2 }
  0x4d   :  { %s8450_s7 = scalar_lea.vmem %s153_s2, 512  ;;  %p8455_p11 = scmp.lt.s32.totalorder %s153_s2, %s153_s2 }
  0x4e   :  { %p8451_p10 = scmp.ne.s32.totalorder %s153_s2, %s8450_s7  ;;  %p8456_p12 = scmp.lt.s32.totalorder %s8450_s7, %s8450_s7 }
  0x50   :  { %p8457_p13 = por %p8456_p12, %p8455_p11 }
  0x52   :  { %p8458_p0 = pnand %p8457_p13, %p8451_p10 }
  0x54   :  { %8461 = shalt.err (!%p8458_p0)
}
  0x55   :  { %s8793_s14 = smov 128   ;;  %s8794_s10 = smov 8  }
  0x56   :  { %158 = dma.hbm_to_vmem [thread:$0]  %s8900_s27, 512, %s153_s2, [#allocation11], %s8793_s14, %s8793_s14, %s8794_s10  }
  0x57   :  { %s8795_s11 = smov [#allocation13]   ;;  %s8796_s16 = smov [#allocation16]  }
  0x58   :  { %s177_s15 = sshll.u32 %s8795_s11, 4  ;;  %s199_s18 = sshll.u32 %s8796_s16, 4  ;;  %s178_s15 = int_to_ptr.vmem [resolvable:$true] %s177_s15  ;;  %s200_s18 = int_to_ptr.vmem [resolvable:$true] %s199_s18 }
  0x59   :  { %s8470_s6 = scalar_lea.vmem %s178_s15, 16  ;;  %s8474_s22 = scalar_lea.vmem %s178_s15, 32 }
  0x5a   :  { %p8471_p1 = scmp.ne.s32.totalorder %s178_s15, %s8470_s6  ;;  %p8475_p2 = scmp.lt.s32.totalorder %s178_s15, %s178_s15 }
  0x5b   :  { %p8476_p3 = scmp.lt.s32.totalorder %s8474_s22, %s8470_s6 }
  0x5d   :  { %p8477_p4 = por %p8476_p3, %p8475_p2 }
  0x5f   :  { %p8478_p5 = pnand %p8477_p4, %p8471_p1 }
  0x61   :  { %8481 = shalt.err (!%p8478_p5)
}
  0x62   :  { %180 = dma.hbm_to_vmem [thread:$0]  %s8915_s8, 16, %s178_s15, [#allocation14]  }
  0x63   :  { %s8490_s23 = scalar_lea.vmem %s200_s18, 16  ;;  %s8494_s26 = scalar_lea.vmem %s200_s18, 32 }
  0x64   :  { %p8491_p6 = scmp.ne.s32.totalorder %s200_s18, %s8490_s23  ;;  %p8495_p7 = scmp.lt.s32.totalorder %s200_s18, %s200_s18 }
  0x65   :  { %p8496_p8 = scmp.lt.s32.totalorder %s8494_s26, %s8490_s23 }
  0x67   :  { %p8497_p9 = por %p8496_p8, %p8495_p7 }
  0x69   :  { %p8498_p10 = pnand %p8497_p9, %p8491_p6 }
  0x6b   :  { %8501 = shalt.err (!%p8498_p10)
}
  0x6c   :  { %202 = dma.hbm_to_vmem [thread:$0]  %s8930_s19, 16, %s200_s18, [#allocation17]  }
  0x6d   :  { %s8797_s27 = smov [#allocation19]   ;;  %s8798_s28 = smov [#allocation22]  }
  0x6e   :  { %s219_s0 = sshll.u32 %s8797_s27, 4  ;;  %s239_s1 = sshll.u32 %s8798_s28, 4  ;;  %s220_s0 = int_to_ptr.vmem [resolvable:$true] %s219_s0  ;;  %s240_s1 = int_to_ptr.vmem [resolvable:$true] %s239_s1 }
  0x6f   :  { %s8510_s2 = scalar_lea.vmem %s220_s0, 16  ;;  %s8514_s7 = scalar_lea.vmem %s220_s0, 32 }
  0x70   :  { %p8511_p11 = scmp.ne.s32.totalorder %s220_s0, %s8510_s2  ;;  %p8515_p12 = scmp.lt.s32.totalorder %s220_s0, %s220_s0 }
  0x71   :  { %p8516_p13 = scmp.lt.s32.totalorder %s8514_s7, %s8510_s2 }
  0x73   :  { %p8517_p0 = por %p8516_p13, %p8515_p12 }
  0x75   :  { %p8518_p1 = pnand %p8517_p0, %p8511_p11 }
  0x77   :  { %8521 = shalt.err (!%p8518_p1)
}
  0x78   :  { %222 = dma.hbm_to_vmem [thread:$0]  %s8940_s25, 16, %s220_s0, [#allocation20]  }
  0x79   :  { %s8530_s8 = scalar_lea.vmem %s240_s1, 16  ;;  %s8534_s14 = scalar_lea.vmem %s240_s1, 32 }
  0x7a   :  { %p8531_p2 = scmp.ne.s32.totalorder %s240_s1, %s8530_s8  ;;  %p8535_p3 = scmp.lt.s32.totalorder %s240_s1, %s240_s1 }
  0x7b   :  { %p8536_p4 = scmp.lt.s32.totalorder %s8534_s14, %s8530_s8 }
  0x7d   :  { %p8537_p5 = por %p8536_p4, %p8535_p3 }
  0x7f   :  { %p8538_p6 = pnand %p8537_p5, %p8531_p2 }
  0x81   :  { %8541 = shalt.err (!%p8538_p6)
}
  0x82   :  { %242 = dma.hbm_to_vmem [thread:$0]  %s8950_s9, 16, %s240_s1, [#allocation23]  }
  0x83   :  { %s8799_s19 = smov [#allocation25]   ;;  %s8800_s11 = smov [#allocation2]  }
  0x84   :  { %s259_s10 = sshll.u32 %s8799_s19, 4  ;;  %s95_s15 = sshll.u32 %s8800_s11, 4  ;;  %s260_s10 = int_to_ptr.vmem [resolvable:$true] %s259_s10  ;;  %s96_s15 = int_to_ptr.vmem [resolvable:$true] %s95_s15 }
  0x85   :  { %s8550_s16 = scalar_lea.vmem %s260_s10, 16  ;;  %s8554_s18 = scalar_lea.vmem %s260_s10, 32 }
  0x86   :  { %p8551_p7 = scmp.ne.s32.totalorder %s260_s10, %s8550_s16  ;;  %p8555_p8 = scmp.lt.s32.totalorder %s260_s10, %s260_s10 }
  0x87   :  { %p8556_p9 = scmp.lt.s32.totalorder %s8554_s18, %s8550_s16 }
  0x89   :  { %p8557_p10 = por %p8556_p9, %p8555_p8 }
  0x8b   :  { %p8558_p11 = pnand %p8557_p10, %p8551_p7 }
  0x8d   :  { %8561 = shalt.err (!%p8558_p11)
}
  0x8e   :  { %262 = dma.hbm_to_vmem [thread:$0]  %s8960_s13, 16, %s260_s10, [#allocation26]  }
  0x8f   :  { %s8570_s25 = scalar_lea.vmem %s96_s15, 16  ;;  %s8574_s6 = scalar_lea.vmem %s96_s15, 32 }
  0x90   :  { %p8571_p12 = scmp.ne.s32.totalorder %s96_s15, %s8570_s25  ;;  %p8575_p13 = scmp.lt.s32.totalorder %s96_s15, %s96_s15 }
  0x91   :  { %p8576_p0 = scmp.lt.s32.totalorder %s8574_s6, %s8570_s25 }
  0x93   :  { %p8577_p1 = por %p8576_p0, %p8575_p13 }
  0x95   :  { %p8578_p2 = pnand %p8577_p1, %p8571_p12 }
  0x97   :  { %8581 = shalt.err (!%p8578_p2)
}
  0x98   :  { %98 = dma.hbm_to_vmem [thread:$0]  %s8855_s3, 16, %s96_s15, [#allocation3]  }
  0x99   :  { %s8801_s9 = smov [#allocation6]   ;;  %s8802_s23 = smov [#allocation9]  }
  0x9a   :  { %s119_s22 = sshll.u32 %s8801_s9, 4  ;;  %s143_s26 = sshll.u32 %s8802_s23, 4  ;;  %s120_s22 = int_to_ptr.vmem [resolvable:$true] %s119_s22  ;;  %s144_s26 = int_to_ptr.vmem [resolvable:$true] %s143_s26 }
  0x9b   :  { %s8590_s27 = scalar_lea.vmem %s120_s22, 16  ;;  %s8594_s0 = scalar_lea.vmem %s120_s22, 32 }
  0x9c   :  { %p8591_p3 = scmp.ne.s32.totalorder %s120_s22, %s8590_s27  ;;  %p8595_p4 = scmp.lt.s32.totalorder %s120_s22, %s120_s22 }
  0x9d   :  { %p8596_p5 = scmp.lt.s32.totalorder %s8594_s0, %s8590_s27 }
  0x9f   :  { %p8597_p6 = por %p8596_p5, %p8595_p4 }
  0xa1   :  { %p8598_p7 = pnand %p8597_p6, %p8591_p3 }
  0xa3   :  { %8601 = shalt.err (!%p8598_p7)
}
  0xa4   :  { %122 = dma.hbm_to_vmem [thread:$0]  %s8875_s24, 16, %s120_s22, [#allocation5]  }
  0xa5   :  { %s8610_s13 = scalar_lea.vmem %s144_s26, 16  ;;  %s8614_s28 = scalar_lea.vmem %s144_s26, 32 }
  0xa6   :  { %p8611_p8 = scmp.ne.s32.totalorder %s144_s26, %s8610_s13  ;;  %p8615_p9 = scmp.lt.s32.totalorder %s144_s26, %s144_s26 }
  0xa7   :  { %p8616_p10 = scmp.lt.s32.totalorder %s8614_s28, %s8610_s13 }
  0xa9   :  { %p8617_p11 = por %p8616_p10, %p8615_p9 }
  0xab   :  { %p8618_p12 = pnand %p8617_p11, %p8611_p8 }
  0xad   :  { %8621 = shalt.err (!%p8618_p12)
}
  0xae   :  { %146 = dma.hbm_to_vmem [thread:$0]  %s8895_s20, 16, %s144_s26, [#allocation8]  }
  0xaf   :  { %s8803_s3 = smov [#allocation12]   ;;  %s8804_s2 = smov [#allocation15]  }
  0xb0   :  { %s165_s1 = sshll.u32 %s8803_s3, 4  ;;  %s189_s7 = sshll.u32 %s8804_s2, 4  ;;  %s166_s1 = int_to_ptr.vmem [resolvable:$true] %s165_s1  ;;  %s190_s7 = int_to_ptr.vmem [resolvable:$true] %s189_s7 }
  0xb1   :  { %s8630_s8 = scalar_lea.vmem %s166_s1, 16  ;;  %s8634_s14 = scalar_lea.vmem %s166_s1, 32 }
  0xb2   :  { %p8631_p13 = scmp.ne.s32.totalorder %s166_s1, %s8630_s8  ;;  %p8635_p0 = scmp.lt.s32.totalorder %s166_s1, %s166_s1 }
  0xb3   :  { %p8636_p1 = scmp.lt.s32.totalorder %s8634_s14, %s8630_s8 }
  0xb5   :  { %p8637_p2 = por %p8636_p1, %p8635_p0 }
  0xb7   :  { %p8638_p3 = pnand %p8637_p2, %p8631_p13 }
  0xb9   :  { %8641 = shalt.err (!%p8638_p3)
}
  0xba   :  { %168 = dma.hbm_to_vmem [thread:$0]  %s8905_s4, 16, %s166_s1, [#allocation11]  }
  0xbb   :  { %s8650_s24 = scalar_lea.vmem %s190_s7, 16  ;;  %s8654_s19 = scalar_lea.vmem %s190_s7, 32 }
  0xbc   :  { %p8651_p4 = scmp.ne.s32.totalorder %s190_s7, %s8650_s24  ;;  %p8655_p5 = scmp.lt.s32.totalorder %s190_s7, %s190_s7 }
  0xbd   :  { %p8656_p6 = scmp.lt.s32.totalorder %s8654_s19, %s8650_s24 }
  0xbf   :  { %p8657_p7 = por %p8656_p6, %p8655_p5 }
  0xc1   :  { %p8658_p8 = pnand %p8657_p7, %p8651_p4 }
  0xc3   :  { %8661 = shalt.err (!%p8658_p8)
}
  0xc4   :  { %192 = dma.hbm_to_vmem [thread:$0]  %s8925_s29, 16, %s190_s7, [#allocation14]  }
  0xc5   :  { %s8805_s20 = smov [#allocation18]   ;;  %s8806_s11 = smov [#allocation21]  }
  0xc6   :  { %s209_s10 = sshll.u32 %s8805_s20, 4  ;;  %s229_s15 = sshll.u32 %s8806_s11, 4  ;;  %s210_s10 = int_to_ptr.vmem [resolvable:$true] %s209_s10  ;;  %s230_s15 = int_to_ptr.vmem [resolvable:$true] %s229_s15 }
  0xc7   :  { %s8670_s16 = scalar_lea.vmem %s210_s10, 16  ;;  %s8674_s18 = scalar_lea.vmem %s210_s10, 32 }
  0xc8   :  { %p8671_p9 = scmp.ne.s32.totalorder %s210_s10, %s8670_s16  ;;  %p8675_p10 = scmp.lt.s32.totalorder %s210_s10, %s210_s10 }
  0xc9   :  { %p8676_p11 = scmp.lt.s32.totalorder %s8674_s18, %s8670_s16 }
  0xcb   :  { %p8677_p12 = por %p8676_p11, %p8675_p10 }
  0xcd   :  { %p8678_p13 = pnand %p8677_p12, %p8671_p9 }
  0xcf   :  { %8681 = shalt.err (!%p8678_p13)
}
  0xd0   :  { %212 = dma.hbm_to_vmem [thread:$0]  %s8935_s12, 16, %s210_s10, [#allocation17]  }
  0xd1   :  { %s8690_s4 = scalar_lea.vmem %s230_s15, 16  ;;  %s8694_s25 = scalar_lea.vmem %s230_s15, 32 }
  0xd2   :  { %p8691_p0 = scmp.ne.s32.totalorder %s230_s15, %s8690_s4  ;;  %p8695_p1 = scmp.lt.s32.totalorder %s230_s15, %s230_s15 }
  0xd3   :  { %p8696_p2 = scmp.lt.s32.totalorder %s8694_s25, %s8690_s4 }
  0xd5   :  { %p8697_p3 = por %p8696_p2, %p8695_p1 }
  0xd7   :  { %p8698_p4 = pnand %p8697_p3, %p8691_p0 }
  0xd9   :  { %8701 = shalt.err (!%p8698_p4)
}
  0xda   :  { %232 = dma.hbm_to_vmem [thread:$0]  %s8945_s17, 16, %s230_s15, [#allocation20]  }
  0xdb   :  { %s8807_s29 = smov [#allocation24]   ;;  %s8808_s9 = smov [#allocation27]  }
  0xdc   :  { %s249_s6 = sshll.u32 %s8807_s29, 4  ;;  %s269_s22 = sshll.u32 %s8808_s9, 4  ;;  %s250_s6 = int_to_ptr.vmem [resolvable:$true] %s249_s6  ;;  %s270_s22 = int_to_ptr.vmem [resolvable:$true] %s269_s22 }
  0xdd   :  { %s8710_s23 = scalar_lea.vmem %s250_s6, 16  ;;  %s8714_s26 = scalar_lea.vmem %s250_s6, 32 }
  0xde   :  { %p8711_p5 = scmp.ne.s32.totalorder %s250_s6, %s8710_s23  ;;  %p8715_p6 = scmp.lt.s32.totalorder %s250_s6, %s250_s6 }
  0xdf   :  { %p8716_p7 = scmp.lt.s32.totalorder %s8714_s26, %s8710_s23 }
  0xe1   :  { %p8717_p8 = por %p8716_p7, %p8715_p6 }
  0xe3   :  { %p8718_p9 = pnand %p8717_p8, %p8711_p5 }
  0xe5   :  { %8721 = shalt.err (!%p8718_p9)
}
  0xe6   :  { %252 = dma.hbm_to_vmem [thread:$0]  %s8955_s30, 16, %s250_s6, [#allocation23]  }
  0xe7   :  { %s8730_s12 = scalar_lea.vmem %s270_s22, 16  ;;  %s8734_s27 = scalar_lea.vmem %s270_s22, 32 }
  0xe8   :  { %p8731_p10 = scmp.ne.s32.totalorder %s270_s22, %s8730_s12  ;;  %p8735_p11 = scmp.lt.s32.totalorder %s270_s22, %s270_s22 }
  0xe9   :  { %p8736_p12 = scmp.lt.s32.totalorder %s8734_s27, %s8730_s12 }
  0xeb   :  { %p8737_p13 = por %p8736_p12, %p8735_p11 }
  0xed   :  { %p8738_p0 = pnand %p8737_p13, %p8731_p10 }
  0xef   :  { %8741 = shalt.err (!%p8738_p0)
}
  0xf0   :  { %272 = dma.hbm_to_vmem [thread:$0]  %s8965_s5, 16, %s270_s22, [#allocation26]  }
  0xf1   :  { %8742 = dma.done.wait [#allocation3], 16  }
  0xf2   :  { %8743 = vsyncadd [#allocation3], 4294967280 }
  0xf3   :  { %8744 = dma.done.wait [#allocation5], 32  }
  0xf4   :  { %8745 = vsyncadd [#allocation5], 4294967264 }
  0xf5   :  { %8746 = dma.done.wait [#allocation8], 32  }
  0xf6   :  { %8747 = vsyncadd [#allocation8], 4294967264 }
  0xf7   :  { %8748 = dma.done.wait [#allocation11], 528  }
  0xf8   :  { %8749 = vsyncadd [#allocation11], 4294966768 }
  0xf9   :  { %8750 = dma.done.wait [#allocation14], 32  }
  0xfa   :  { %8751 = vsyncadd [#allocation14], 4294967264 }
  0xfb   :  { %8752 = dma.done.wait [#allocation17], 32  }
  0xfc   :  { %8753 = vsyncadd [#allocation17], 4294967264 }
  0xfd   :  { %8754 = dma.done.wait [#allocation20], 32  }
  0xfe   :  { %8755 = vsyncadd [#allocation20], 4294967264 }
  0xff   :  { %8756 = dma.done.wait [#allocation23], 32  }
 0x100   :  { %8757 = vsyncadd [#allocation23], 4294967264 }
 0x101   :  { %8758 = dma.done.wait [#allocation26], 32  }
 0x102   :  { %8759 = vsyncadd [#allocation26], 4294967264  ;;  %s9884_s17 = sld [smem:[#allocation41_spill]]  ;;  %vm406_vm0 = vcmask 261120   ;;  %v8809_v28 = vmov 0.0   ;;  %vm8810_vm1 = vmmov 0   ;;  %v379_v37 = vlaneseq }
 0x103   :  { %s9885_s5 = sld [smem:[#allocation37_spill]]  ;;  %s8811_s7 = smov 96   ;;  %v9050_v34 = vld [vmem:[#allocation7] ss:$0 sm:$0xff]  ;;  %v7235_v49 = vld [vmem:[#allocation2] ss:$0 sm:$0xff] }
 0x104   :  { %s9886_s30 = sld [smem:[#allocation39_spill]]  ;;  %v9055_v38 = vand.u32 127, %v379_v37  ;;  %vm956_vm6 = vcmask 64512   ;;  %vm3798_vm13 = vcmask 523264  }
 0x105   :  { %s9887_s0 = sld [smem:[#allocation46_spill]] }
 0x106   :  { %s9888_s13 = sld [smem:[#allocation38_spill]]  ;;  %vm382_vm2 = vcmp.lt.s32.totalorder %v9055_v38, 8  ;;  %vm384_vm3 = vcmp.ge.s32.totalorder %v9055_v38, 8  ;;  %vm385_vm4 = vcmp.lt.s32.totalorder %v9055_v38, 16  ;;  %vm387_vm7 = vcmp.ge.s32.totalorder %v9055_v38, 16 }
 0x107   :  { %s9889_s28 = sld [smem:[#allocation40_spill]]  ;;  %vm9066_vm5 = vmand %vm384_vm3, %vm385_vm4  ;;  %vm388_vm8 = vcmp.lt.s32.totalorder %v9055_v38, 24  ;;  %vm390_vm10 = vcmp.ge.s32.totalorder %v9055_v38, 24  ;;  %vm391_vm11 = vcmp.lt.s32.totalorder %v9055_v38, 32 }
 0x108   :  { %v335_v0 = vld [vmem:[%s9884_s17 + $0x18] sm:$0xff]  ;;  %v334_v1 = vld [vmem:[%s9884_s17 + $0x10] sm:$0xff]  ;;  %v333_v4 = vld [vmem:[%s9884_s17 + $0x8] sm:$0xff]  ;;  %s9890_s3 = sld [smem:[#allocation47_spill]] }
 0x109   :  { %7657 = vmatprep.subr.mxu0 %v335_v0  ;;  %v8992_v2 = vld [vmem:[%s9885_s5] sm:$0xff]  ;;  %v9001_v6 = vld [vmem:[%s9885_s5 + $0x8] sm:$0xff]  ;;  %s9891_s1 = sld [smem:[#allocation43_spill]]  ;;  %vm9145_vm9 = vmand %vm387_vm7, %vm388_vm8 }
 0x10a   :  { %v8995_v3 = vld [vmem:[%s9886_s30] sm:$0xff]  ;;  %7658 = vmatpush3.msra.mxu0 %v335_v0  ;;  %v9004_v7 = vld [vmem:[%s9886_s30 + $0x8] sm:$0xff]  ;;  %s9892_s2 = sld [smem:[#allocation42_spill]]  ;;  %vm9188_vm12 = vmand %vm390_vm10, %vm391_vm11 }
 0x10b   :  { %v604_v5 = vadd.f32 %v8995_v3, %v8992_v2  ;;  %7659 = vmatprep.subr.mxu0 %v334_v1  ;;  %v332_v8 = vld [vmem:[%s9884_s17] sm:$0xff]  ;;  %v605_v9 = vadd.f32 %v9004_v7, %v9001_v6  ;;  %v398_v10 = vld [vmem:[%s9887_s0 + $0x18] sm:$0xff]  ;;  %v397_v11 = vld [vmem:[%s9887_s0 + $0x10] sm:$0xff]  ;;  %s9899_s8 = sld [smem:[#allocation44_spill]] }
 0x10c   :  { %7660 = vmatpush3.msra.mxu0 %v334_v1  ;;  %7635 = vmatprep.subr.mxu1 %v398_v10  ;;  %v328_v12 = vld [vmem:[%s9888_s13] sm:$0xff]  ;;  %v396_v14 = vld [vmem:[%s9887_s0 + $0x8] sm:$0xff]  ;;  %s9900_s14 = sld [smem:[#allocation45_spill]] }
 0x10d   :  { %7665 = vmatprep.mubr.msk.f32.mxu0 %vm406_vm0, %v604_v5  ;;  %7661 = vmatprep.subr.mxu0 %v333_v4  ;;  %v330_v13 = vld [vmem:[%s9889_s28] sm:$0xff]  ;;  %v329_v16 = vld [vmem:[%s9888_s13 + $0x8] sm:$0xff]  ;;  %s9901_s24 = sld [smem:[#allocation48_spill]] }
 0x10e   :  { %7662 = vmatpush3.msra.mxu0 %v333_v4  ;;  %7636 = vmatpush3.msra.mxu1 %v398_v10  ;;  %v393_v15 = vadd.f32 %v330_v13, %v328_v12  ;;  %v331_v17 = vld [vmem:[%s9889_s28 + $0x8] sm:$0xff]  ;;  %v395_v18 = vld [vmem:[%s9887_s0] sm:$0xff]  ;;  %v491_v20 = vld [vmem:[%s9890_s3 + $0x18] sm:$0xff]  ;;  %s9902_s19 = sld [smem:[#allocation49_spill]] }
 0x10f   :  { %7663 = vmatprep.subr.mxu0 %v332_v8  ;;  %7637 = vmatprep.subr.mxu1 %v397_v11  ;;  %v394_v19 = vadd.f32 %v331_v17, %v329_v16  ;;  %v490_v21 = vld [vmem:[%s9890_s3 + $0x10] sm:$0xff]  ;;  %v489_v22 = vld [vmem:[%s9890_s3 + $0x8] sm:$0xff]  ;;  %v488_v23 = vld [vmem:[%s9890_s3] sm:$0xff] }
 0x110   :  { %7664 = vmatpush3.msra.mxu0 %v332_v8  ;;  %7638 = vmatpush3.msra.mxu1 %v397_v11  ;;  %v340_v24 = vld [vmem:[%s9891_s1 + $0x18] sm:$0xff]  ;;  %v339_v25 = vld [vmem:[%s9891_s1 + $0x10] sm:$0xff]  ;;  %v338_v26 = vld [vmem:[%s9891_s1 + $0x8] sm:$0xff] }
 0x111   :  { %7666 = vmatmul.mubr.msk.f32.vlgmr.msra.gmra.mxu0 %vm406_vm0, %v605_v9  ;;  %7643 = vmatprep.mubr.msk.f32.mxu1 %vm406_vm0, %v393_v15  ;;  %v337_v27 = vld [vmem:[%s9891_s1] sm:$0xff] }
 0x112   :  { %7639 = vmatprep.subr.mxu1 %v396_v14  ;;  %7679 = vmatprep.subr.mxu0 %v8809_v28  ;;  %v7232_v30 = vld [vmem:[%s9892_s2] ss:$0 sm:$0xff] }
 0x113   :  { %7640 = vmatpush3.msra.mxu1 %v396_v14  ;;  %7681 = vmatprep.mubr.msk.f32.mxu0 %vm8810_vm1, %v8809_v28 }
 0x114   :  { %7641 = vmatprep.subr.mxu1 %v395_v18 }
 0x115   :  { %7642 = vmatpush3.msra.mxu1 %v395_v18 }
 0x116   :  { %7646 = vmatprep.subr.mxu1 %v491_v20  ;;  %7644 = vmatmul.mubr.msk.f32.vlgmr.msra.gmra.mxu1 %vm406_vm0, %v394_v19 }
 0x117   :  { %7647 = vmatpush3.msra.mxu1 %v491_v20  ;;  %7654 = vmatprep.mubr.msk.f32.mxu1 %vm406_vm0, %v328_v12 }
 0x118   :  { %7648 = vmatprep.subr.mxu1 %v490_v21 }
 0x119   :  { %7649 = vmatpush3.msra.mxu1 %v490_v21 }
 0x11a   :  { %7650 = vmatprep.subr.mxu1 %v489_v22 }
 0x11b   :  { %7651 = vmatpush3.msra.mxu1 %v489_v22 }
 0x11c   :  { %7652 = vmatprep.subr.mxu1 %v488_v23 }
 0x11d   :  { %7653 = vmatpush3.msra.mxu1 %v488_v23 }
 0x11e   :  { %7668 = vmatprep.subr.mxu1 %v340_v24  ;;  %7655 = vmatmul.mubr.msk.f32.vlgmr.msra.gmra.mxu1 %vm406_vm0, %v329_v16 }
 0x11f   :  { %7669 = vmatpush3.msra.mxu1 %v340_v24  ;;  %7676 = vmatprep.mubr.msk.f32.mxu1 %vm406_vm0, %v8992_v2 }
 0x120   :  { %7670 = vmatprep.subr.mxu1 %v339_v25 }
 0x121   :  { %7671 = vmatpush3.msra.mxu1 %v339_v25 }
 0x122   :  { %7672 = vmatprep.subr.mxu1 %v338_v26 }
 0x123   :  { %7673 = vmatpush3.msra.mxu1 %v338_v26 }
 0x124   :  { %7674 = vmatprep.subr.mxu1 %v337_v27 }
 0x125   :  { %7675 = vmatpush3.msra.mxu1 %v337_v27 }
 0x126   :  { %7677 = vmatmul.mubr.msk.f32.vlgmr.msra.gmra.mxu1 %vm406_vm0, %v9001_v6  ;;  %7684 = vmatprep.subr.mxu1 %v8809_v28 }
 0x127   :  { %7686 = vmatprep.mubr.msk.f32.mxu1 %vm8810_vm1, %v8809_v28 }
 0x1d1   :  { %v7667_v29 = vpop.f32.mrf.mxu0 }
 0x1d2   :  { %v9046_v33 = vadd.f32 %v7667_v29, %v7232_v30 }
 0x1d3   :  { %v684_v31 = vpop.f32.mrf.mxu0 }
 0x1d4   :  { %v9042_v32 = vadd.f32 %v7232_v30, %v684_v31 }
 0x1d6   :  { %782 = vrot.lane.b32.xlu0 %v9042_v32, %s8811_s7  ;;  %v7645_v35 = vpop.f32.mrf.mxu1 }
 0x1d7   :  { %v9053_v36 = vadd.f32 %v7645_v35, %v9050_v34 }
 0x1d8   :  { %v9104_v46 = vpop.f32.mrf.mxu1 }
 0x1da   :  { %784 = vrot.lane.b32.xlu0 %v9046_v33, %s8811_s7 }
 0x1de   :  { %v9106_v47 = vpop.f32.mrf.mxu1 }
 0x1e0   :  { %v9108_v48 = vpop.f32.mrf.mxu1 }
 0x1e6   :  { %v7678_v50 = vpop.f32.mrf.mxu1 }
 0x1e7   :  { %v9110_v51 = vadd.f32 %v7678_v50, %v7235_v49 }
 0x1e8   :  { %v771_v52 = vpop.f32.mrf.mxu1 }
 0x1e9   :  { %v9112_v53 = vadd.f32 %v7235_v49, %v771_v52 }
 0x248   :  { %v9060_v39 = vpop.permute.xlu0 %782 }
 0x249   :  { %v788_v40 = vsel %vm382_vm2, %v9060_v39, 0.0  ;;  %v790_v44 = vsel %vm9066_vm5, %v9060_v39, 0.0 }
 0x24a   :  { %7680 = vmatpush3.xpose.msk.msra.mxu0 %vm406_vm0, %v788_v40 }
 0x24b   :  { %7689 = vmatprep.subr.mxu0 %v8809_v28 }
 0x24c   :  { %v9071_v42 = vpop.permute.xlu0 %784 }
 0x24d   :  { %7682 = vmatmul.mubr.msk.f32.vlgmr.msra.gmra.mxu0 %vm406_vm0, %v9042_v32  ;;  %v789_v43 = vsel %vm382_vm2, %v9071_v42, 0.0  ;;  %v791_v45 = vsel %vm9066_vm5, %v9071_v42, 0.0 }
 0x24e   :  { %7685 = vmatpush3.xpose.msk.msra.mxu1 %vm406_vm0, %v789_v43  ;;  %7690 = vmatpush3.xpose.msk.msra.mxu0 %vm406_vm0, %v790_v44 }
 0x24f   :  { %7691 = vmatprep.mubr.msk.f32.mxu0 %vm8810_vm1, %v8809_v28  ;;  %7694 = vmatprep.subr.mxu1 %v8809_v28 }
 0x250   :  { %7699 = vmatprep.subr.mxu0 %v8809_v28 }
 0x251   :  { %7687 = vmatmul.mubr.msk.f32.vlgmr.msra.gmra.mxu1 %vm406_vm0, %v9046_v33  ;;  %7692 = vmatmul.mubr.msk.f32.vlgmr.msra.gmra.mxu0 %vm406_vm0, %v9042_v32 }
 0x252   :  { %7695 = vmatpush3.xpose.msk.msra.mxu1 %vm406_vm0, %v791_v45  ;;  %7696 = vmatprep.mubr.msk.f32.mxu1 %vm8810_vm1, %v8809_v28 }
 0x253   :  { %7704 = vmatprep.subr.mxu1 %v8809_v28  ;;  %7701 = vmatprep.mubr.msk.f32.mxu0 %vm8810_vm1, %v8809_v28 }
 0x254   :  { %7700 = vmatpush3.msk.msra.mxu0 %vm9066_vm5, %v9112_v53 }
 0x255   :  { %7697 = vmatmul.mubr.msk.f32.vlgmr.msra.gmra.mxu1 %vm406_vm0, %v9046_v33  ;;  %7709 = vmatprep.subr.mxu0 %v8809_v28 }
 0x256   :  { %7706 = vmatprep.mubr.msk.f32.mxu1 %vm8810_vm1, %v8809_v28  ;;  %7705 = vmatpush3.msk.msra.mxu1 %vm9066_vm5, %v9110_v51 }
 0x257   :  { %7714 = vmatprep.subr.mxu1 %v8809_v28 }
 0x30d   :  { %v875_v54 = vpop.f32.mrf.mxu0 }
 0x30e   :  { %v954_v55 = vmul.f32 0.35355338, %v875_v54 }
 0x30f   :  { %v7683_v56 = vpop.f32.mrf.mxu0 }
 0x310   :  { %v957_v57 = vsel %vm956_vm6, %v954_v55, -inf }
 0x311   :  { %958 = vmax.xlane.f32.xlu0 %v957_v57  ;;  %v950_v58 = vpop.f32.mrf.mxu1  ;;  %v1048_v59 = vpop.f32.mrf.mxu0 }
 0x312   :  { %v1125_v60 = vmul.f32 0.35355338, %v1048_v59  ;;  %v955_v5 = vmul.f32 0.35355338, %v950_v58  ;;  %v793_v58 = vsel %vm9145_vm9, %v9071_v42, 0.0 }
 0x313   :  { %v7688_v61 = vpop.f32.mrf.mxu1  ;;  %v7693_v62 = vpop.f32.mrf.mxu0 }
 0x314   :  { %v1127_v63 = vsel %vm956_vm6, %v1125_v60, -inf  ;;  %v960_v9 = vsel %vm956_vm6, %v955_v5, -inf }
 0x315   :  { %1128 = vmax.xlane.f32.xlu1 %v1127_v63  ;;  %v1121_v0 = vpop.f32.mrf.mxu1 }
 0x316   :  { %v1126_v1 = vmul.f32 0.35355338, %v1121_v0 }
 0x317   :  { %v7698_v4 = vpop.f32.mrf.mxu1 }
 0x318   :  { %v1130_v8 = vsel %vm956_vm6, %v1126_v1, -inf }
 0x319   :  { %1131 = vmax.xlane.f32.xlu1 %v1130_v8 }
 0x31d   :  { %961 = vmax.xlane.f32.xlu1 %v960_v9 }
 0x39a   :  { %v959_v12 = vpop.xlane.xlu0 %958 }
 0x39b   :  { %v963_v15 = vsub.f32 %v954_v55, %v959_v12  ;;  %v792_v55 = vsel %vm9145_vm9, %v9060_v39, 0.0 }
 0x39d   :  { %v965_v19 = vmul.f32 1.442695, %v963_v15 }
 0x39e   :  { %v1129_v10 = vpop.xlane.xlu1 %1128 }
 0x39f   :  { %v1133_v11 = vsub.f32 %v1125_v60, %v1129_v10 }
 0x3a1   :  { %v1135_v16 = vmul.f32 1.442695, %v1133_v11 }
 0x3a2   :  { %v1132_v13 = vpop.xlane.xlu1 %1131 }
 0x3a3   :  { %v1134_v14 = vsub.f32 %v1126_v1, %v1132_v13 }
 0x3a5   :  { %v1137_v17 = vmul.f32 1.442695, %v1134_v14 }
 0x3a6   :  { %v962_v18 = vpop.xlane.xlu1 %961 }
 0x3a7   :  { %8199 = vpow2.f32 %v1137_v17  ;;  %v964_v20 = vsub.f32 %v955_v5, %v962_v18 }
 0x3a8   :  { %8201 = vpow2.f32 %v1135_v16 }
 0x3a9   :  { %8203 = vpow2.f32 %v965_v19  ;;  %v967_v21 = vmul.f32 1.442695, %v964_v20 }
 0x3ab   :  { %8205 = vpow2.f32 %v967_v21 }
 0x3b4   :  { %v8200_v22 = vpop.eup %8199 }
 0x3b5   :  { %v1142_v23 = vsel %vm956_vm6, %v8200_v22, 0.0  ;;  %v8202_v24 = vpop.eup %8201 }
 0x3b6   :  { %1143 = vadd.xlane.f32.xlu1 %v1142_v23  ;;  %v1139_v25 = vsel %vm956_vm6, %v8202_v24, 0.0  ;;  %v8204_v26 = vpop.eup %8203 }
 0x3b7   :  { %v969_v27 = vsel %vm956_vm6, %v8204_v26, 0.0 }
 0x3b8   :  { %v8206_v29 = vpop.eup %8205 }
 0x3b9   :  { %v972_v30 = vsel %vm956_vm6, %v8206_v29, 0.0 }
 0x3ba   :  { %1140 = vadd.xlane.f32.xlu1 %v1139_v25 }
 0x3be   :  { %970 = vadd.xlane.f32.xlu1 %v969_v27 }
 0x3c2   :  { %973 = vadd.xlane.f32.xlu1 %v972_v30 }
 0x43f   :  { %v1144_v31 = vpop.xlane.xlu1 %1143 }
 0x440   :  { %8207 = vrcp.f32 %v1144_v31 }
 0x443   :  { %v1141_v35 = vpop.xlane.xlu1 %1140 }
 0x444   :  { %8209 = vrcp.f32 %v1141_v35 }
 0x447   :  { %v971_v37 = vpop.xlane.xlu1 %970 }
 0x448   :  { %8211 = vrcp.f32 %v971_v37  ;;  %v794_v37 = vsel %vm9188_vm12, %v9060_v39, 0.0 }
 0x44b   :  { %v974_v40 = vpop.xlane.xlu1 %973 }
 0x44c   :  { %8213 = vrcp.f32 %v974_v40 }
 0x44d   :  { %v8208_v43 = vpop.eup %8207 }
 0x44e   :  { %v1148_v44 = vmul.f32 %v8208_v43, %v8200_v22 }
 0x450   :  { %7707 = vmatmul.mubr.msk.f32.vlgmr.msra.gmra.mxu1 %vm956_vm6, %v1148_v44  ;;  %v795_v44 = vsel %vm9188_vm12, %v9071_v42, 0.0 }
 0x451   :  { %v8210_v45 = vpop.eup %8209  ;;  %7715 = vmatpush3.msk.msra.mxu1 %vm382_vm2, %v9110_v51  ;;  %7716 = vmatprep.mubr.msk.f32.mxu1 %vm8810_vm1, %v8809_v28 }
 0x452   :  { %v1147_v49 = vmul.f32 %v8210_v45, %v8202_v24  ;;  %7724 = vmatprep.subr.mxu1 %v8809_v28 }
 0x454   :  { %7702 = vmatmul.mubr.msk.f32.vlgmr.msra.gmra.mxu0 %vm956_vm6, %v1147_v49 }
 0x455   :  { %v8212_v50 = vpop.eup %8211  ;;  %7710 = vmatpush3.msk.msra.mxu0 %vm382_vm2, %v9112_v53  ;;  %7711 = vmatprep.mubr.msk.f32.mxu0 %vm8810_vm1, %v8809_v28 }
 0x456   :  { %7719 = vmatprep.subr.mxu0 %v8809_v28  ;;  %v977_v54 = vmul.f32 %v8212_v50, %v8204_v26 }
 0x458   :  { %7712 = vmatmul.mubr.msk.f32.vlgmr.msra.gmra.mxu0 %vm956_vm6, %v977_v54 }
 0x459   :  { %v8214_v56 = vpop.eup %8213  ;;  %7720 = vmatpush3.xpose.msk.msra.mxu0 %vm406_vm0, %v792_v55  ;;  %7721 = vmatprep.mubr.msk.f32.mxu0 %vm8810_vm1, %v8809_v28 }
 0x45a   :  { %7729 = vmatprep.subr.mxu0 %v8809_v28  ;;  %v978_v57 = vmul.f32 %v8214_v56, %v8206_v29 }
 0x45c   :  { %7717 = vmatmul.mubr.msk.f32.vlgmr.msra.gmra.mxu1 %vm956_vm6, %v978_v57  ;;  %7722 = vmatmul.mubr.msk.f32.vlgmr.msra.gmra.mxu0 %vm406_vm0, %v9042_v32 }
 0x45d   :  { %7725 = vmatpush3.xpose.msk.msra.mxu1 %vm406_vm0, %v793_v58  ;;  %7730 = vmatpush3.msk.msra.mxu0 %vm9145_vm9, %v9112_v53 }
 0x45e   :  { %7726 = vmatprep.mubr.msk.f32.mxu1 %vm8810_vm1, %v8809_v28  ;;  %7734 = vmatprep.subr.mxu1 %v8809_v28 }
 0x45f   :  { %7731 = vmatprep.mubr.msk.f32.mxu0 %vm8810_vm1, %v8809_v28  ;;  %7739 = vmatprep.subr.mxu0 %v8809_v28 }
 0x460   :  { %7727 = vmatmul.mubr.msk.f32.vlgmr.msra.gmra.mxu1 %vm406_vm0, %v9046_v33 }
 0x461   :  { %7735 = vmatpush3.msk.msra.mxu1 %vm9145_vm9, %v9110_v51  ;;  %7736 = vmatprep.mubr.msk.f32.mxu1 %vm8810_vm1, %v8809_v28 }
 0x462   :  { %7744 = vmatprep.subr.mxu1 %v8809_v28 }
 0x510   :  { %v1291_v59 = vpop.f32.mrf.mxu1 }
 0x512   :  { %v7708_v60 = vpop.f32.mrf.mxu1 }
 0x514   :  { %v1218_v61 = vpop.f32.mrf.mxu0 }
 0x516   :  { %v7703_v62 = vpop.f32.mrf.mxu0 }
 0x518   :  { %v1364_v63 = vpop.f32.mrf.mxu0 }
 0x519   :  { %v1365_v0 = vadd.f32 %v1364_v63, %v1218_v61 }
 0x51a   :  { %v7713_v1 = vpop.f32.mrf.mxu0 }
 0x51c   :  { %v1437_v4 = vpop.f32.mrf.mxu1  ;;  %v1510_v5 = vpop.f32.mrf.mxu0 }
 0x51d   :  { %v1438_v8 = vadd.f32 %v1437_v4, %v1291_v59  ;;  %v1587_v9 = vmul.f32 0.35355338, %v1510_v5 }
 0x51e   :  { %v7718_v10 = vpop.f32.mrf.mxu1  ;;  %v7723_v11 = vpop.f32.mrf.mxu0 }
 0x51f   :  { %v1589_v12 = vsel %vm956_vm6, %v1587_v9, -inf }
 0x520   :  { %1590 = vmax.xlane.f32.xlu1 %v1589_v12  ;;  %v1583_v13 = vpop.f32.mrf.mxu1 }
 0x521   :  { %v1588_v14 = vmul.f32 0.35355338, %v1583_v13 }
 0x522   :  { %v7728_v15 = vpop.f32.mrf.mxu1 }
 0x523   :  { %v1592_v16 = vsel %vm956_vm6, %v1588_v14, -inf }
 0x524   :  { %1593 = vmax.xlane.f32.xlu1 %v1592_v16  ;;  %v344_v16 = vld [vmem:[%s9899_s8 + $0x10] sm:$0xff] }
 0x5a9   :  { %v1591_v17 = vpop.xlane.xlu1 %1590 }
 0x5aa   :  { %v1595_v18 = vsub.f32 %v1587_v9, %v1591_v17  ;;  %v345_v9 = vld [vmem:[%s9899_s8 + $0x18] sm:$0xff]  ;;  %v343_v17 = vld [vmem:[%s9899_s8 + $0x8] sm:$0xff] }
 0x5ac   :  { %v1597_v19 = vmul.f32 1.442695, %v1595_v18  ;;  %v342_v18 = vld [vmem:[%s9899_s8] sm:$0xff] }
 0x5ad   :  { %v1594_v20 = vpop.xlane.xlu1 %1593 }
 0x5ae   :  { %8215 = vpow2.f32 %v1597_v19  ;;  %v1596_v21 = vsub.f32 %v1588_v14, %v1594_v20 }
 0x5b0   :  { %v1599_v22 = vmul.f32 1.442695, %v1596_v21 }
 0x5b2   :  { %8217 = vpow2.f32 %v1599_v22  ;;  %v9235_v22 = vadd.f32 %v9050_v34, %v9104_v46  ;;  %v7270_v34 = vld [vmem:[#allocation4] ss:$0 sm:$0xff] }
 0x5bb   :  { %v8216_v23 = vpop.eup %8215 }
 0x5bc   :  { %v1601_v24 = vsel %vm956_vm6, %v8216_v23, 0.0 }
 0x5bd   :  { %1602 = vadd.xlane.f32.xlu1 %v1601_v24 }
 0x5bf   :  { %v8218_v25 = vpop.eup %8217 }
 0x5c0   :  { %v1604_v26 = vsel %vm956_vm6, %v8218_v25, 0.0 }
 0x5c1   :  { %1605 = vadd.xlane.f32.xlu0 %v1604_v26  ;;  %v9242_v26 = vsel %vm382_vm2, %v9235_v22, 0.0 }
 0x646   :  { %v1603_v27 = vpop.xlane.xlu1 %1602 }
 0x647   :  { %8219 = vrcp.f32 %v1603_v27 }
 0x64a   :  { %v1606_v29 = vpop.xlane.xlu0 %1605 }
 0x64b   :  { %8221 = vrcp.f32 %v1606_v29 }
 0x654   :  { %v8220_v30 = vpop.eup %8219 }
 0x655   :  { %v1609_v35 = vmul.f32 %v8220_v30, %v8216_v23 }
 0x657   :  { %7732 = vmatmul.mubr.msk.f32.vlgmr.msra.gmra.mxu0 %vm956_vm6, %v1609_v35 }
 0x658   :  { %v8222_v40 = vpop.eup %8221  ;;  %7740 = vmatpush3.xpose.msk.msra.mxu0 %vm406_vm0, %v794_v37  ;;  %7741 = vmatprep.mubr.msk.f32.mxu0 %vm8810_vm1, %v8809_v28 }
 0x659   :  { %7749 = vmatprep.subr.mxu0 %v8809_v28  ;;  %v1610_v43 = vmul.f32 %v8222_v40, %v8218_v25 }
 0x65b   :  { %7737 = vmatmul.mubr.msk.f32.vlgmr.msra.gmra.mxu1 %vm956_vm6, %v1610_v43  ;;  %7742 = vmatmul.mubr.msk.f32.vlgmr.msra.gmra.mxu0 %vm406_vm0, %v9042_v32 }
 0x65c   :  { %7745 = vmatpush3.xpose.msk.msra.mxu1 %vm406_vm0, %v795_v44  ;;  %7750 = vmatpush3.msk.msra.mxu0 %vm9188_vm12, %v9112_v53 }
 0x65d   :  { %7746 = vmatprep.mubr.msk.f32.mxu1 %vm8810_vm1, %v8809_v28  ;;  %7754 = vmatprep.subr.mxu1 %v8809_v28 }
 0x65e   :  { %7751 = vmatprep.mubr.msk.f32.mxu0 %vm8810_vm1, %v8809_v28  ;;  %7759 = vmatprep.subr.mxu0 %v345_v9 }
 0x65f   :  { %7747 = vmatmul.mubr.msk.f32.vlgmr.msra.gmra.mxu1 %vm406_vm0, %v9046_v33 }
 0x660   :  { %7755 = vmatpush3.msk.msra.mxu1 %vm9188_vm12, %v9110_v51  ;;  %7756 = vmatprep.mubr.msk.f32.mxu1 %vm8810_vm1, %v8809_v28 }
 0x717   :  { %v1680_v32 = vpop.f32.mrf.mxu0 }
 0x718   :  { %v1757_v39 = vadd.f32 %v1680_v32, %v1365_v0 }
 0x719   :  { %v7733_v42 = vpop.f32.mrf.mxu0 }
 0x71b   :  { %v1753_v53 = vpop.f32.mrf.mxu1  ;;  %v1828_v45 = vpop.f32.mrf.mxu0 }
 0x71c   :  { %v1758_v49 = vadd.f32 %v1753_v53, %v1438_v8  ;;  %v1905_v50 = vmul.f32 0.35355338, %v1828_v45 }
 0x71d   :  { %v7738_v54 = vpop.f32.mrf.mxu1  ;;  %v7743_v55 = vpop.f32.mrf.mxu0 }
 0x71e   :  { %v1907_v56 = vsel %vm956_vm6, %v1905_v50, -inf  ;;  %v350_v54 = vld [vmem:[%s9900_s14 + $0x18] sm:$0xff]  ;;  %v349_v55 = vld [vmem:[%s9900_s14 + $0x10] sm:$0xff] }
 0x71f   :  { %v1901_v57 = vpop.f32.mrf.mxu1  ;;  %1908 = vmax.xlane.f32.xlu1 %v1907_v56  ;;  %7770 = vmatprep.subr.mxu1 %v350_v54  ;;  %v348_v56 = vld [vmem:[%s9900_s14 + $0x8] sm:$0xff] }
 0x720   :  { %v1906_v33 = vmul.f32 0.35355338, %v1901_v57  ;;  %v347_v57 = vld [vmem:[%s9900_s14] sm:$0xff] }
 0x721   :  { %v7748_v58 = vpop.f32.mrf.mxu1 }
 0x722   :  { %v1910_v51 = vsel %vm956_vm6, %v1906_v33, -inf }
 0x723   :  { %1911 = vmax.xlane.f32.xlu0 %v1910_v51 }
 0x7a8   :  { %v1909_v59 = vpop.xlane.xlu1 %1908 }
 0x7a9   :  { %v1913_v60 = vsub.f32 %v1905_v50, %v1909_v59 }
 0x7ab   :  { %v1915_v61 = vmul.f32 1.442695, %v1913_v60 }
 0x7ac   :  { %v1912_v62 = vpop.xlane.xlu0 %1911 }
 0x7ad   :  { %8223 = vpow2.f32 %v1915_v61  ;;  %v1914_v63 = vsub.f32 %v1906_v33, %v1912_v62 }
 0x7af   :  { %v1917_v0 = vmul.f32 1.442695, %v1914_v63  ;;  %v7273_v63 = vld [vmem:[#allocation16] ss:$0 sm:$0xff] }
 0x7b1   :  { %8225 = vpow2.f32 %v1917_v0 }
 0x7ba   :  { %v8224_v1 = vpop.eup %8223 }
 0x7bb   :  { %v1919_v4 = vsel %vm956_vm6, %v8224_v1, 0.0 }
 0x7bc   :  { %1920 = vadd.xlane.f32.xlu1 %v1919_v4  ;;  %v7274_v4 = vld [vmem:[#allocation18] ss:$0 sm:$0xff] }
 0x7be   :  { %v8226_v5 = vpop.eup %8225 }
 0x7bf   :  { %v1922_v8 = vsel %vm956_vm6, %v8226_v5, 0.0 }
 0x7c0   :  { %1923 = vadd.xlane.f32.xlu0 %v1922_v8 }
 0x845   :  { %v1921_v10 = vpop.xlane.xlu1 %1920 }
 0x846   :  { %8227 = vrcp.f32 %v1921_v10 }
 0x849   :  { %v1924_v11 = vpop.xlane.xlu0 %1923 }
 0x84a   :  { %8229 = vrcp.f32 %v1924_v11 }
 0x853   :  { %v8228_v12 = vpop.eup %8227 }
 0x854   :  { %v1927_v13 = vmul.f32 %v8228_v12, %v8224_v1 }
 0x856   :  { %7752 = vmatmul.mubr.msk.f32.vlgmr.msra.gmra.mxu0 %vm956_vm6, %v1927_v13 }
 0x857   :  { %v8230_v14 = vpop.eup %8229  ;;  %7760 = vmatpush3.msra.mxu0 %v345_v9 }
 0x858   :  { %v1928_v15 = vmul.f32 %v8230_v14, %v8226_v5  ;;  %7761 = vmatprep.subr.mxu0 %v344_v16  ;;  %v9273_v14 = vsel %vm382_vm2, %v9053_v36, 0.0 }
 0x859   :  { %7762 = vmatpush3.msra.mxu0 %v344_v16 }
 0x85a   :  { %7757 = vmatmul.mubr.msk.f32.vlgmr.msra.gmra.mxu1 %vm956_vm6, %v1928_v15  ;;  %7763 = vmatprep.subr.mxu0 %v343_v17 }
 0x85b   :  { %7764 = vmatpush3.msra.mxu0 %v343_v17  ;;  %7771 = vmatpush3.msra.mxu1 %v350_v54  ;;  %v7229_v17 = vld [vmem:[#allocation9] ss:$0 sm:$0xff] }
 0x85c   :  { %7765 = vmatprep.subr.mxu0 %v342_v18  ;;  %7772 = vmatprep.subr.mxu1 %v349_v55 }
 0x85d   :  { %7766 = vmatpush3.msra.mxu0 %v342_v18  ;;  %7773 = vmatpush3.msra.mxu1 %v349_v55 }
 0x85e   :  { %7781 = vmatprep.subr.mxu0 %v8809_v28  ;;  %7774 = vmatprep.subr.mxu1 %v348_v56 }
 0x85f   :  { %7775 = vmatpush3.msra.mxu1 %v348_v56 }
 0x860   :  { %7776 = vmatprep.subr.mxu1 %v347_v57 }
 0x861   :  { %7777 = vmatpush3.msra.mxu1 %v347_v57 }
 0x862   :  { %7786 = vmatprep.subr.mxu1 %v8809_v28 }
 0x916   :  { %v1998_v19 = vpop.f32.mrf.mxu0 }
 0x917   :  { %v2075_v20 = vadd.f32 %v1998_v19, %v1757_v39  ;;  %v9289_v19 = vsel %vm9066_vm5, %v9053_v36, 0.0 }
 0x918   :  { %v7753_v21 = vpop.f32.mrf.mxu0 }
 0x919   :  { %7767 = vmatprep.mubr.msk.f32.mxu0 %vm406_vm0, %v2075_v20  ;;  %v9300_v20 = vsel %vm9066_vm5, %v9235_v22, 0.0  ;;  %v9304_v21 = vadd.f32 %v9106_v47, %v7229_v17 }
 0x91a   :  { %v2071_v23 = vpop.f32.mrf.mxu1 }
 0x91b   :  { %v2076_v24 = vadd.f32 %v2071_v23, %v1758_v49  ;;  %v9314_v23 = vadd.f32 %v7229_v17, %v9108_v48 }
 0x91c   :  { %v7758_v25 = vpop.f32.mrf.mxu1 }
 0x91d   :  { %7768 = vmatmul.mubr.msk.f32.vlgmr.msra.gmra.mxu0 %vm406_vm0, %v2076_v24 }
 0x91e   :  { %7782 = vmatpush3.xpose.msk.msra.mxu0 %vm406_vm0, %v9242_v26  ;;  %7783 = vmatprep.mubr.msk.f32.mxu0 %vm8810_vm1, %v8809_v28 }
 0x91f   :  { %7791 = vmatprep.subr.mxu0 %v8809_v28 }
 0x9dd   :  { %v7769_v46 = vpop.f32.mrf.mxu0 }
 0x9de   :  { %v2161_v27 = vadd.f32 %v7769_v46, %v7270_v34 }
 0x9df   :  { %v2155_v29 = vpop.f32.mrf.mxu0 }
 0x9e0   :  { %v2156_v30 = vadd.f32 %v7270_v34, %v2155_v29  ;;  %v2165_v35 = vadd.f32 %v2161_v27, %v9001_v6 }
 0x9e2   :  { %v2169_v37 = vsel %vm406_vm0, %v2165_v35, 0.0  ;;  %v2164_v40 = vadd.f32 %v2156_v30, %v8992_v2 }
 0x9e3   :  { %2170 = vadd.xlane.f32.xlu0 %v2169_v37 }
 0x9e4   :  { %v2166_v43 = vsel %vm406_vm0, %v2164_v40, 0.0 }
 0x9e5   :  { %2167 = vadd.xlane.f32.xlu1 %v2166_v43 }
 0xa6c   :  { %v2171_v44 = vpop.xlane.xlu0 %2170 }
 0xa6d   :  { %v2174_v32 = vmul.f32 0.03125, %v2171_v44 }
 0xa6e   :  { %v2168_v39 = vpop.xlane.xlu1 %2167 }
 0xa6f   :  { %v2176_v42 = vsub.f32 %v2165_v35, %v2174_v32  ;;  %v2173_v53 = vmul.f32 0.03125, %v2168_v39 }
 0xa71   :  { %v2175_v45 = vsub.f32 %v2164_v40, %v2173_v53  ;;  %v2178_v49 = vmul.f32 %v2176_v42, %v2176_v42 }
 0xa73   :  { %v2182_v6 = vsel %vm406_vm0, %v2178_v49, 0.0  ;;  %v2177_v50 = vmul.f32 %v2175_v45, %v2175_v45 }
 0xa74   :  { %2183 = vadd.xlane.f32.xlu0 %v2182_v6 }
 0xa75   :  { %v2179_v2 = vsel %vm406_vm0, %v2177_v50, 0.0 }
 0xa76   :  { %2180 = vadd.xlane.f32.xlu1 %v2179_v2 }
 0xafd   :  { %v2184_v33 = vpop.xlane.xlu0 %2183 }
 0xafe   :  { %v2186_v58 = vmul.f32 0.03125, %v2184_v33 }
 0xaff   :  { %v2181_v51 = vpop.xlane.xlu1 %2180 }
 0xb00   :  { %v2188_v59 = vadd.f32 1e-05, %v2186_v58  ;;  %v2185_v60 = vmul.f32 0.03125, %v2181_v51 }
 0xb02   :  { %8231 = vrsqrt.f32 %v2188_v59  ;;  %v2187_v61 = vadd.f32 1e-05, %v2185_v60 }
 0xb04   :  { %8233 = vrsqrt.f32 %v2187_v61 }
 0xb0f   :  { %v8232_v62 = vpop.eup %8231 }
 0xb10   :  { %v2192_v0 = vmul.f32 %v8232_v62, %v2176_v42 }
 0xb11   :  { %v8234_v1 = vpop.eup %8233 }
 0xb12   :  { %v2191_v5 = vmul.f32 %v8234_v1, %v2175_v45  ;;  %v2200_v8 = vmul.f32 %v7273_v63, %v2192_v0 }
 0xb14   :  { %v2199_v9 = vmul.f32 %v7273_v63, %v2191_v5  ;;  %v9260_v10 = vadd.f32 %v7274_v4, %v2200_v8 }
 0xb16   :  { %v9262_v11 = vadd.f32 %v7274_v4, %v2199_v9  ;;  %v2210_v13 = vadd.f32 %v9260_v10, %v9004_v7 }
 0xb18   :  { %v2209_v12 = vadd.f32 %v9262_v11, %v8995_v3  ;;  %v7275_v3 = vld [vmem:[#allocation6] ss:$0 sm:$0xff] }
 0xb1a   :  { %7778 = vmatprep.mubr.msk.f32.mxu1 %vm406_vm0, %v2209_v12 }
 0xb1b   :  { %7779 = vmatmul.mubr.msk.f32.vlgmr.msra.gmra.mxu1 %vm406_vm0, %v2210_v13 }
 0xb1c   :  { %7787 = vmatpush3.xpose.msk.msra.mxu1 %vm406_vm0, %v9273_v14  ;;  %7788 = vmatprep.mubr.msk.f32.mxu1 %vm8810_vm1, %v8809_v28 }
 0xb1d   :  { %7796 = vmatprep.subr.mxu1 %v8809_v28 }
 0xbdb   :  { %v7780_v15 = vpop.f32.mrf.mxu1 }
 0xbdc   :  { %v9280_v7 = vadd.f32 %v7780_v15, %v7275_v3 }
 0xbdd   :  { %v2289_v16 = vpop.f32.mrf.mxu1 }
 0xbde   :  { %v9282_v18 = vadd.f32 %v7275_v3, %v2289_v16  ;;  %7789 = vmatmul.mubr.msk.f32.vlgmr.msra.gmra.mxu1 %vm406_vm0, %v9280_v7 }
 0xbdf   :  { %7797 = vmatpush3.xpose.msk.msra.mxu1 %vm406_vm0, %v9289_v19  ;;  %7798 = vmatprep.mubr.msk.f32.mxu1 %vm8810_vm1, %v8809_v28 }
 0xbe0   :  { %7784 = vmatmul.mubr.msk.f32.vlgmr.msra.gmra.mxu0 %vm406_vm0, %v9282_v18  ;;  %7806 = vmatprep.subr.mxu1 %v8809_v28 }
 0xbe1   :  { %7792 = vmatpush3.xpose.msk.msra.mxu0 %vm406_vm0, %v9300_v20  ;;  %7793 = vmatprep.mubr.msk.f32.mxu0 %vm8810_vm1, %v8809_v28 }
 0xbe2   :  { %7799 = vmatmul.mubr.msk.f32.vlgmr.msra.gmra.mxu1 %vm406_vm0, %v9280_v7  ;;  %7801 = vmatprep.subr.mxu0 %v8809_v28 }
 0xbe3   :  { %7807 = vmatpush3.msk.msra.mxu1 %vm9066_vm5, %v9304_v21  ;;  %7808 = vmatprep.mubr.msk.f32.mxu1 %vm8810_vm1, %v8809_v28 }
 0xbe4   :  { %7794 = vmatmul.mubr.msk.f32.vlgmr.msra.gmra.mxu0 %vm406_vm0, %v9282_v18  ;;  %7816 = vmatprep.subr.mxu1 %v8809_v28 }
 0xbe5   :  { %7802 = vmatpush3.msk.msra.mxu0 %vm9066_vm5, %v9314_v23  ;;  %7803 = vmatprep.mubr.msk.f32.mxu0 %vm8810_vm1, %v8809_v28 }
 0xbe6   :  { %7811 = vmatprep.subr.mxu0 %v8809_v28 }
 0xc9e   :  { %v2446_v47 = vpop.f32.mrf.mxu1 }
 0xc9f   :  { %v2451_v30 = vmul.f32 0.35355338, %v2446_v47  ;;  %v9355_v47 = vsel %vm9145_vm9, %v9053_v36, 0.0 }
 0xca0   :  { %v2370_v48 = vpop.f32.mrf.mxu0  ;;  %v7790_v24 = vpop.f32.mrf.mxu1 }
 0xca1   :  { %v2450_v43 = vmul.f32 0.35355338, %v2370_v48  ;;  %v2455_v32 = vsel %vm956_vm6, %v2451_v30, -inf  ;;  %v9366_v24 = vsel %vm9145_vm9, %v9235_v22, 0.0 }
 0xca2   :  { %v7785_v25 = vpop.f32.mrf.mxu0  ;;  %v2616_v34 = vpop.f32.mrf.mxu1 }
 0xca3   :  { %v2621_v46 = vmul.f32 0.35355338, %v2616_v34  ;;  %v2452_v39 = vsel %vm956_vm6, %v2450_v43, -inf }
 0xca4   :  { %v2543_v27 = vpop.f32.mrf.mxu0  ;;  %v7800_v29 = vpop.f32.mrf.mxu1 }
 0xca5   :  { %v2620_v35 = vmul.f32 0.35355338, %v2543_v27  ;;  %v2625_v37 = vsel %vm956_vm6, %v2621_v46, -inf }
 0xca6   :  { %2626 = vmax.xlane.f32.xlu0 %v2625_v37  ;;  %v7795_v40 = vpop.f32.mrf.mxu0 }
 0xca7   :  { %v2622_v44 = vsel %vm956_vm6, %v2620_v35, -inf }
 0xca8   :  { %2623 = vmax.xlane.f32.xlu1 %v2622_v44 }
 0xcaa   :  { %2456 = vmax.xlane.f32.xlu0 %v2455_v32 }
 0xcac   :  { %2453 = vmax.xlane.f32.xlu1 %v2452_v39 }
 0xd2f   :  { %v2627_v42 = vpop.xlane.xlu0 %2626 }
 0xd30   :  { %v2629_v53 = vsub.f32 %v2621_v46, %v2627_v42 }
 0xd31   :  { %v2624_v45 = vpop.xlane.xlu1 %2623 }
 0xd32   :  { %v2632_v49 = vmul.f32 1.442695, %v2629_v53  ;;  %v2628_v6 = vsub.f32 %v2620_v35, %v2624_v45 }
 0xd33   :  { %v2457_v50 = vpop.xlane.xlu0 %2456 }
 0xd34   :  { %8235 = vpow2.f32 %v2632_v49  ;;  %v2630_v2 = vmul.f32 1.442695, %v2628_v6  ;;  %v2459_v54 = vsub.f32 %v2451_v30, %v2457_v50 }
 0xd35   :  { %v2454_v55 = vpop.xlane.xlu1 %2453 }
 0xd36   :  { %8237 = vpow2.f32 %v2630_v2  ;;  %v2462_v56 = vmul.f32 1.442695, %v2459_v54  ;;  %v2458_v57 = vsub.f32 %v2450_v43, %v2454_v55 }
 0xd38   :  { %8239 = vpow2.f32 %v2462_v56  ;;  %v2460_v33 = vmul.f32 1.442695, %v2458_v57 }
 0xd3a   :  { %8241 = vpow2.f32 %v2460_v33 }
 0xd41   :  { %v8236_v58 = vpop.eup %8235 }
 0xd42   :  { %v2637_v51 = vsel %vm956_vm6, %v8236_v58, 0.0 }
 0xd43   :  { %v8238_v59 = vpop.eup %8237  ;;  %2638 = vadd.xlane.f32.xlu0 %v2637_v51 }
 0xd44   :  { %v2634_v60 = vsel %vm956_vm6, %v8238_v59, 0.0 }
 0xd45   :  { %v8240_v61 = vpop.eup %8239  ;;  %2635 = vadd.xlane.f32.xlu1 %v2634_v60 }
 0xd46   :  { %v2467_v62 = vsel %vm956_vm6, %v8240_v61, 0.0 }
 0xd47   :  { %v8242_v63 = vpop.eup %8241  ;;  %2468 = vadd.xlane.f32.xlu0 %v2467_v62 }
 0xd48   :  { %v2464_v0 = vsel %vm956_vm6, %v8242_v63, 0.0 }
 0xd49   :  { %2465 = vadd.xlane.f32.xlu1 %v2464_v0 }
 0xdcc   :  { %v2639_v1 = vpop.xlane.xlu0 %2638 }
 0xdcd   :  { %8243 = vrcp.f32 %v2639_v1  ;;  %v9398_v1 = vsel %vm9188_vm12, %v9053_v36, 0.0 }
 0xdce   :  { %v2636_v4 = vpop.xlane.xlu1 %2635 }
 0xdcf   :  { %8245 = vrcp.f32 %v2636_v4 }
 0xdd0   :  { %v2469_v5 = vpop.xlane.xlu0 %2468 }
 0xdd1   :  { %8247 = vrcp.f32 %v2469_v5  ;;  %v9408_v5 = vsel %vm9188_vm12, %v9235_v22, 0.0 }
 0xdd2   :  { %v2466_v8 = vpop.xlane.xlu1 %2465 }
 0xdd3   :  { %8249 = vrcp.f32 %v2466_v8 }
 0xdda   :  { %v8244_v9 = vpop.eup %8243 }
 0xddb   :  { %v2643_v12 = vmul.f32 %v8244_v9, %v8236_v58 }
 0xddc   :  { %v8246_v13 = vpop.eup %8245 }
 0xddd   :  { %7809 = vmatmul.mubr.msk.f32.vlgmr.msra.gmra.mxu1 %vm956_vm6, %v2643_v12  ;;  %v2642_v3 = vmul.f32 %v8246_v13, %v8238_v59 }
 0xdde   :  { %v8248_v15 = vpop.eup %8247  ;;  %7817 = vmatpush3.msk.msra.mxu1 %vm382_vm2, %v9304_v21  ;;  %7818 = vmatprep.mubr.msk.f32.mxu1 %vm8810_vm1, %v8809_v28 }
 0xddf   :  { %7804 = vmatmul.mubr.msk.f32.vlgmr.msra.gmra.mxu0 %vm956_vm6, %v2642_v3  ;;  %7826 = vmatprep.subr.mxu1 %v8809_v28  ;;  %v2473_v16 = vmul.f32 %v8248_v15, %v8240_v61 }
 0xde0   :  { %v8250_v17 = vpop.eup %8249  ;;  %7812 = vmatpush3.msk.msra.mxu0 %vm382_vm2, %v9314_v23  ;;  %7813 = vmatprep.mubr.msk.f32.mxu0 %vm8810_vm1, %v8809_v28 }
 0xde1   :  { %7819 = vmatmul.mubr.msk.f32.vlgmr.msra.gmra.mxu1 %vm956_vm6, %v2473_v16  ;;  %7821 = vmatprep.subr.mxu0 %v8809_v28  ;;  %v2472_v48 = vmul.f32 %v8250_v17, %v8242_v63 }
 0xde2   :  { %7827 = vmatpush3.xpose.msk.msra.mxu1 %vm406_vm0, %v9355_v47  ;;  %7828 = vmatprep.mubr.msk.f32.mxu1 %vm8810_vm1, %v8809_v28 }
 0xde3   :  { %7814 = vmatmul.mubr.msk.f32.vlgmr.msra.gmra.mxu0 %vm956_vm6, %v2472_v48  ;;  %7836 = vmatprep.subr.mxu1 %v8809_v28 }
 0xde4   :  { %7822 = vmatpush3.xpose.msk.msra.mxu0 %vm406_vm0, %v9366_v24  ;;  %7823 = vmatprep.mubr.msk.f32.mxu0 %vm8810_vm1, %v8809_v28 }
 0xde5   :  { %7829 = vmatmul.mubr.msk.f32.vlgmr.msra.gmra.mxu1 %vm406_vm0, %v9280_v7  ;;  %7831 = vmatprep.subr.mxu0 %v8809_v28 }
 0xde6   :  { %7837 = vmatpush3.msk.msra.mxu1 %vm9145_vm9, %v9304_v21  ;;  %7838 = vmatprep.mubr.msk.f32.mxu1 %vm8810_vm1, %v8809_v28 }
 0xde7   :  { %7824 = vmatmul.mubr.msk.f32.vlgmr.msra.gmra.mxu0 %vm406_vm0, %v9282_v18  ;;  %7846 = vmatprep.subr.mxu1 %v8809_v28 }
 0xde8   :  { %7832 = vmatpush3.msk.msra.mxu0 %vm9145_vm9, %v9314_v23  ;;  %7833 = vmatprep.mubr.msk.f32.mxu0 %vm8810_vm1, %v8809_v28 }
 0xde9   :  { %7841 = vmatprep.subr.mxu0 %v8809_v28 }
 0xe9d   :  { %v2786_v25 = vpop.f32.mrf.mxu1 }
 0xe9f   :  { %v2713_v34 = vpop.f32.mrf.mxu0  ;;  %v7810_v46 = vpop.f32.mrf.mxu1 }
 0xea1   :  { %v7805_v27 = vpop.f32.mrf.mxu0  ;;  %v2932_v29 = vpop.f32.mrf.mxu1 }
 0xea2   :  { %v2933_v30 = vadd.f32 %v2932_v29, %v2786_v25 }
 0xea3   :  { %v2859_v35 = vpop.f32.mrf.mxu0  ;;  %v7820_v37 = vpop.f32.mrf.mxu1 }
 0xea4   :  { %v2860_v40 = vadd.f32 %v2859_v35, %v2713_v34 }
 0xea5   :  { %v7815_v43 = vpop.f32.mrf.mxu0  ;;  %v3078_v44 = vpop.f32.mrf.mxu1 }
 0xea6   :  { %v3083_v32 = vmul.f32 0.35355338, %v3078_v44 }
 0xea7   :  { %v3005_v39 = vpop.f32.mrf.mxu0  ;;  %v7830_v42 = vpop.f32.mrf.mxu1 }
 0xea8   :  { %v3082_v53 = vmul.f32 0.35355338, %v3005_v39  ;;  %v3087_v45 = vsel %vm956_vm6, %v3083_v32, -inf }
 0xea9   :  { %3088 = vmax.xlane.f32.xlu0 %v3087_v45  ;;  %v7825_v49 = vpop.f32.mrf.mxu0 }
 0xeaa   :  { %v3084_v6 = vsel %vm956_vm6, %v3082_v53, -inf }
 0xeab   :  { %3085 = vmax.xlane.f32.xlu1 %v3084_v6 }
 0xf32   :  { %v3089_v50 = vpop.xlane.xlu0 %3088 }
 0xf33   :  { %v3091_v2 = vsub.f32 %v3083_v32, %v3089_v50  ;;  %v355_v32 = vld [vmem:[#allocation10 + $0x18] sm:$0xff]  ;;  %v354_v50 = vld [vmem:[#allocation10 + $0x10] sm:$0xff] }
 0xf34   :  { %v3086_v54 = vpop.xlane.xlu1 %3085 }
 0xf35   :  { %v3094_v55 = vmul.f32 1.442695, %v3091_v2  ;;  %v3090_v56 = vsub.f32 %v3082_v53, %v3086_v54  ;;  %v353_v2 = vld [vmem:[#allocation10 + $0x8] sm:$0xff]  ;;  %v352_v54 = vld [vmem:[#allocation10] sm:$0xff] }
 0xf37   :  { %8251 = vpow2.f32 %v3094_v55  ;;  %v3092_v57 = vmul.f32 1.442695, %v3090_v56 }
 0xf39   :  { %8253 = vpow2.f32 %v3092_v57 }
 0xf44   :  { %v8252_v33 = vpop.eup %8251 }
 0xf45   :  { %v3099_v58 = vsel %vm956_vm6, %v8252_v33, 0.0 }
 0xf46   :  { %v8254_v51 = vpop.eup %8253  ;;  %3100 = vadd.xlane.f32.xlu0 %v3099_v58 }
 0xf47   :  { %v3096_v59 = vsel %vm956_vm6, %v8254_v51, 0.0 }
 0xf48   :  { %3097 = vadd.xlane.f32.xlu1 %v3096_v59  ;;  %v7310_v59 = vld [vmem:[#allocation12] ss:$0 sm:$0xff] }
 0xfcf   :  { %v3101_v60 = vpop.xlane.xlu0 %3100 }
 0xfd0   :  { %8255 = vrcp.f32 %v3101_v60 }
 0xfd1   :  { %v3098_v61 = vpop.xlane.xlu1 %3097 }
 0xfd2   :  { %8257 = vrcp.f32 %v3098_v61 }
 0xfdd   :  { %v8256_v62 = vpop.eup %8255 }
 0xfde   :  { %v3105_v63 = vmul.f32 %v8256_v62, %v8252_v33 }
 0xfdf   :  { %v8258_v0 = vpop.eup %8257 }
 0xfe0   :  { %7839 = vmatmul.mubr.msk.f32.vlgmr.msra.gmra.mxu1 %vm956_vm6, %v3105_v63  ;;  %v3104_v4 = vmul.f32 %v8258_v0, %v8254_v51 }
 0xfe1   :  { %7847 = vmatpush3.xpose.msk.msra.mxu1 %vm406_vm0, %v9398_v1  ;;  %7848 = vmatprep.mubr.msk.f32.mxu1 %vm8810_vm1, %v8809_v28 }
 0xfe2   :  { %7834 = vmatmul.mubr.msk.f32.vlgmr.msra.gmra.mxu0 %vm956_vm6, %v3104_v4  ;;  %7856 = vmatprep.subr.mxu1 %v8809_v28 }
 0xfe3   :  { %7842 = vmatpush3.xpose.msk.msra.mxu0 %vm406_vm0, %v9408_v5  ;;  %7843 = vmatprep.mubr.msk.f32.mxu0 %vm8810_vm1, %v8809_v28 }
 0xfe4   :  { %7849 = vmatmul.mubr.msk.f32.vlgmr.msra.gmra.mxu1 %vm406_vm0, %v9280_v7  ;;  %7851 = vmatprep.subr.mxu0 %v8809_v28 }
 0xfe5   :  { %7857 = vmatpush3.msk.msra.mxu1 %vm9188_vm12, %v9304_v21  ;;  %7858 = vmatprep.mubr.msk.f32.mxu1 %vm8810_vm1, %v8809_v28 }
 0xfe6   :  { %7844 = vmatmul.mubr.msk.f32.vlgmr.msra.gmra.mxu0 %vm406_vm0, %v9282_v18 }
 0xfe7   :  { %7852 = vmatpush3.msk.msra.mxu0 %vm9188_vm12, %v9314_v23  ;;  %7853 = vmatprep.mubr.msk.f32.mxu0 %vm8810_vm1, %v8809_v28 }
 0xfe8   :  { %7861 = vmatprep.subr.mxu0 %v355_v32 }
0x10a0   :  { %v3248_v36 = vpop.f32.mrf.mxu1 }
0x10a1   :  { %v3253_v22 = vadd.f32 %v3248_v36, %v2933_v30 }
0x10a2   :  { %v3175_v7 = vpop.f32.mrf.mxu0  ;;  %v7840_v8 = vpop.f32.mrf.mxu1 }
0x10a3   :  { %v3252_v9 = vadd.f32 %v3175_v7, %v2860_v40 }
0x10a4   :  { %v7835_v12 = vpop.f32.mrf.mxu0  ;;  %v3396_v13 = vpop.f32.mrf.mxu1 }
0x10a5   :  { %v3401_v3 = vmul.f32 0.35355338, %v3396_v13 }
0x10a6   :  { %v3323_v15 = vpop.f32.mrf.mxu0  ;;  %v7850_v16 = vpop.f32.mrf.mxu1 }
0x10a7   :  { %v3400_v17 = vmul.f32 0.35355338, %v3323_v15  ;;  %v3405_v18 = vsel %vm956_vm6, %v3401_v3, -inf }
0x10a8   :  { %3406 = vmax.xlane.f32.xlu0 %v3405_v18  ;;  %v7845_v48 = vpop.f32.mrf.mxu0  ;;  %v359_v18 = vld [vmem:[%s9901_s24 + $0x10] sm:$0xff] }
0x10a9   :  { %v3402_v25 = vsel %vm956_vm6, %v3400_v17, -inf  ;;  %v358_v48 = vld [vmem:[%s9901_s24 + $0x8] sm:$0xff] }
0x10aa   :  { %3403 = vmax.xlane.f32.xlu1 %v3402_v25  ;;  %v357_v25 = vld [vmem:[%s9901_s24] sm:$0xff] }
0x1131   :  { %v3407_v34 = vpop.xlane.xlu0 %3406 }
0x1132   :  { %v3409_v46 = vsub.f32 %v3401_v3, %v3407_v34  ;;  %v369_v34 = vld [vmem:[%s9902_s19 + $0x38] sm:$0xff] }
0x1133   :  { %v3404_v27 = vpop.xlane.xlu1 %3403 }
0x1134   :  { %v3412_v29 = vmul.f32 1.442695, %v3409_v46  ;;  %v3408_v30 = vsub.f32 %v3400_v17, %v3404_v27  ;;  %v360_v17 = vld [vmem:[%s9901_s24 + $0x18] sm:$0xff]  ;;  %v368_v46 = vld [vmem:[%s9902_s19 + $0x30] sm:$0xff] }
0x1135   :  { %7872 = vmatprep.subr.mxu1 %v360_v17  ;;  %v8355_v27 = vld [vmem:[%s9884_s17 + $0x18] sm:$0xff] }
0x1136   :  { %8259 = vpow2.f32 %v3412_v29  ;;  %v3410_v35 = vmul.f32 1.442695, %v3408_v30  ;;  %v367_v29 = vld [vmem:[%s9902_s19 + $0x28] sm:$0xff]  ;;  %v366_v30 = vld [vmem:[%s9902_s19 + $0x20] sm:$0xff] }
0x1138   :  { %8261 = vpow2.f32 %v3410_v35 }
0x1143   :  { %v8260_v37 = vpop.eup %8259 }
0x1144   :  { %v3417_v40 = vsel %vm956_vm6, %v8260_v37, 0.0 }
0x1145   :  { %v8262_v43 = vpop.eup %8261  ;;  %3418 = vadd.xlane.f32.xlu0 %v3417_v40 }
0x1146   :  { %v3414_v44 = vsel %vm956_vm6, %v8262_v43, 0.0 }
0x1147   :  { %3415 = vadd.xlane.f32.xlu1 %v3414_v44 }
0x11ce   :  { %v3419_v39 = vpop.xlane.xlu0 %3418 }
0x11cf   :  { %8263 = vrcp.f32 %v3419_v39 }
0x11d0   :  { %v3416_v42 = vpop.xlane.xlu1 %3415 }
0x11d1   :  { %8265 = vrcp.f32 %v3416_v42 }
0x11dc   :  { %v8264_v53 = vpop.eup %8263 }
0x11dd   :  { %v3423_v45 = vmul.f32 %v8264_v53, %v8260_v37  ;;  %v7313_v53 = vld [vmem:[#allocation19] ss:$0 sm:$0xff] }
0x11de   :  { %v8266_v49 = vpop.eup %8265 }
0x11df   :  { %7859 = vmatmul.mubr.msk.f32.vlgmr.msra.gmra.mxu1 %vm956_vm6, %v3423_v45  ;;  %v3422_v6 = vmul.f32 %v8266_v49, %v8262_v43 }
0x11e0   :  { %7873 = vmatpush3.msra.mxu1 %v360_v17 }
0x11e1   :  { %7854 = vmatmul.mubr.msk.f32.vlgmr.msra.gmra.mxu0 %vm956_vm6, %v3422_v6  ;;  %7874 = vmatprep.subr.mxu1 %v359_v18 }
0x11e2   :  { %7862 = vmatpush3.msra.mxu0 %v355_v32  ;;  %7875 = vmatpush3.msra.mxu1 %v359_v18 }
0x11e3   :  { %7863 = vmatprep.subr.mxu0 %v354_v50  ;;  %7876 = vmatprep.subr.mxu1 %v358_v48 }
0x11e4   :  { %7864 = vmatpush3.msra.mxu0 %v354_v50  ;;  %7877 = vmatpush3.msra.mxu1 %v358_v48  ;;  %v7314_v50 = vld [vmem:[#allocation21] ss:$0 sm:$0xff] }
0x11e5   :  { %7865 = vmatprep.subr.mxu0 %v353_v2  ;;  %7878 = vmatprep.subr.mxu1 %v357_v25 }
0x11e6   :  { %7866 = vmatpush3.msra.mxu0 %v353_v2  ;;  %7879 = vmatpush3.msra.mxu1 %v357_v25 }
0x11e7   :  { %7867 = vmatprep.subr.mxu0 %v352_v54  ;;  %7902 = vmatprep.subr.mxu1 %v8355_v27 }
0x11e8   :  { %7868 = vmatpush3.msra.mxu0 %v352_v54 }
0x11e9   :  { %7883 = vmatprep.subr.mxu0 %v369_v34 }
0x129f   :  { %v3566_v55 = vpop.f32.mrf.mxu1 }
0x12a0   :  { %v3571_v58 = vadd.f32 %v3566_v55, %v3253_v22 }
0x12a1   :  { %v3493_v56 = vpop.f32.mrf.mxu0  ;;  %v7860_v57 = vpop.f32.mrf.mxu1 }
0x12a2   :  { %v3570_v33 = vadd.f32 %v3493_v56, %v3252_v9  ;;  %v8356_v56 = vld [vmem:[%s9884_s17 + $0x10] sm:$0xff]  ;;  %v8357_v57 = vld [vmem:[%s9884_s17 + $0x8] sm:$0xff] }
0x12a3   :  { %v7855_v51 = vpop.f32.mrf.mxu0 }
0x12a4   :  { %7869 = vmatprep.mubr.msk.f32.mxu0 %vm406_vm0, %v3570_v33  ;;  %v8358_v33 = vld [vmem:[%s9884_s17] sm:$0xff]  ;;  %v365_v51 = vld [vmem:[%s9902_s19 + $0x18] sm:$0xff] }
0x12a5   :  { %7870 = vmatmul.mubr.msk.f32.vlgmr.msra.gmra.mxu0 %vm406_vm0, %v3571_v58  ;;  %v9459_v58 = vld [vmem:[%s9891_s1 + $0x18] sm:$0xff] }
0x12a6   :  { %7884 = vmatpush3.msra.mxu0 %v369_v34 }
0x12a7   :  { %7885 = vmatprep.subr.mxu0 %v368_v46 }
0x12a8   :  { %7886 = vmatpush3.msra.mxu0 %v368_v46 }
0x12a9   :  { %7887 = vmatprep.subr.mxu0 %v367_v29 }
0x12aa   :  { %7888 = vmatpush3.msra.mxu0 %v367_v29 }
0x12ab   :  { %7889 = vmatprep.subr.mxu0 %v366_v30 }
0x12ac   :  { %7890 = vmatpush3.msra.mxu0 %v366_v30 }
0x12ad   :  { %7891 = vmatprep.subr.mxu0 %v365_v51 }
0x12ae   :  { %7892 = vmatpush3.msra.mxu0 %v365_v51  ;;  %v9485_v51 = vld [vmem:[%s9886_s30 + $0x8] sm:$0xff] }
0x1365   :  { %v7871_v60 = vpop.f32.mrf.mxu0 }
0x1366   :  { %v3656_v61 = vadd.f32 %v7871_v60, %v7310_v59  ;;  %v363_v60 = vld [vmem:[%s9902_s19 + $0x8] sm:$0xff] }
0x1367   :  { %v3650_v62 = vpop.f32.mrf.mxu0 }
0x1368   :  { %v3651_v63 = vadd.f32 %v7310_v59, %v3650_v62  ;;  %v3660_v0 = vadd.f32 %v3656_v61, %v9260_v10  ;;  %v364_v59 = vld [vmem:[%s9902_s19 + $0x10] sm:$0xff]  ;;  %v362_v61 = vld [vmem:[%s9902_s19] sm:$0xff]  ;;  %v7315_v62 = vld [vmem:[#allocation13] ss:$0 sm:$0xff] }
0x1369   :  { %7893 = vmatprep.subr.mxu0 %v364_v59 }
0x136a   :  { %v3664_v4 = vsel %vm406_vm0, %v3660_v0, 0.0  ;;  %v3659_v36 = vadd.f32 %v3651_v63, %v9262_v11  ;;  %7894 = vmatpush3.msra.mxu0 %v364_v59 }
0x136b   :  { %3665 = vadd.xlane.f32.xlu0 %v3664_v4  ;;  %7895 = vmatprep.subr.mxu0 %v363_v60 }
0x136c   :  { %v3661_v22 = vsel %vm406_vm0, %v3659_v36, 0.0  ;;  %7896 = vmatpush3.msra.mxu0 %v363_v60  ;;  %v8362_v60 = vld [vmem:[%s9891_s1 + $0x10] sm:$0xff] }
0x136d   :  { %3662 = vadd.xlane.f32.xlu1 %v3661_v22  ;;  %7897 = vmatprep.subr.mxu0 %v362_v61 }
0x136e   :  { %7898 = vmatpush3.msra.mxu0 %v362_v61  ;;  %v8363_v61 = vld [vmem:[%s9891_s1 + $0x8] sm:$0xff] }
0x136f   :  { %7924 = vmatprep.subr.mxu0 %v8809_v28 }
0x13f4   :  { %v3666_v7 = vpop.xlane.xlu0 %3665 }
0x13f5   :  { %v3668_v8 = vmul.f32 0.03125, %v3666_v7 }
0x13f6   :  { %v3663_v9 = vpop.xlane.xlu1 %3662 }
0x13f7   :  { %v3670_v12 = vsub.f32 %v3660_v0, %v3668_v8  ;;  %v3667_v13 = vmul.f32 0.03125, %v3663_v9  ;;  %v7318_v8 = vld [vmem:[#allocation15] ss:$0 sm:$0xff] }
0x13f9   :  { %v3669_v3 = vsub.f32 %v3659_v36, %v3667_v13  ;;  %v3672_v15 = vmul.f32 %v3670_v12, %v3670_v12 }
0x13fb   :  { %v3676_v10 = vsel %vm406_vm0, %v3672_v15, 0.0  ;;  %v3671_v16 = vmul.f32 %v3669_v3, %v3669_v3 }
0x13fc   :  { %3677 = vadd.xlane.f32.xlu0 %v3676_v10 }
0x13fd   :  { %v3673_v11 = vsel %vm406_vm0, %v3671_v16, 0.0 }
0x13fe   :  { %3674 = vadd.xlane.f32.xlu1 %v3673_v11 }
0x1485   :  { %v3678_v35 = vpop.xlane.xlu0 %3677 }
0x1486   :  { %v3680_v37 = vmul.f32 0.03125, %v3678_v35 }
0x1487   :  { %v3675_v40 = vpop.xlane.xlu1 %3674 }
0x1488   :  { %v3682_v43 = vadd.f32 1e-05, %v3680_v37  ;;  %v3679_v44 = vmul.f32 0.03125, %v3675_v40 }
0x148a   :  { %8267 = vrsqrt.f32 %v3682_v43  ;;  %v3681_v32 = vadd.f32 1e-05, %v3679_v44 }
0x148c   :  { %8269 = vrsqrt.f32 %v3681_v32 }
0x1497   :  { %v8268_v39 = vpop.eup %8267 }
0x1498   :  { %v3686_v42 = vmul.f32 %v8268_v39, %v3670_v12 }
0x1499   :  { %v8270_v45 = vpop.eup %8269 }
0x149a   :  { %v3685_v49 = vmul.f32 %v8270_v45, %v3669_v3  ;;  %v3694_v6 = vmul.f32 %v7313_v53, %v3686_v42 }
0x149c   :  { %v3693_v2 = vmul.f32 %v7313_v53, %v3685_v49  ;;  %v3702_v55 = vadd.f32 %v7314_v50, %v3694_v6  ;;  %v7321_v53 = vld [vmem:[#allocation22] ss:$0 sm:$0xff] }
0x149e   :  { %v3701_v54 = vadd.f32 %v7314_v50, %v3693_v2  ;;  %v7322_v2 = vld [vmem:[#allocation24] ss:$0 sm:$0xff] }
0x14a0   :  { %7880 = vmatprep.mubr.msk.f32.mxu1 %vm406_vm0, %v3701_v54 }
0x14a1   :  { %7881 = vmatmul.mubr.msk.f32.vlgmr.msra.gmra.mxu1 %vm406_vm0, %v3702_v55 }
0x14a2   :  { %7903 = vmatpush3.msra.mxu1 %v8355_v27 }
0x14a3   :  { %7904 = vmatprep.subr.mxu1 %v8356_v56 }
0x14a4   :  { %7905 = vmatpush3.msra.mxu1 %v8356_v56 }
0x14a5   :  { %7906 = vmatprep.subr.mxu1 %v8357_v57 }
0x14a6   :  { %7907 = vmatpush3.msra.mxu1 %v8357_v57  ;;  %v9480_v57 = vld [vmem:[%s9886_s30] sm:$0xff] }
0x14a7   :  { %7908 = vmatprep.subr.mxu1 %v8358_v33 }
0x14a8   :  { %7909 = vmatpush3.msra.mxu1 %v8358_v33 }
0x14a9   :  { %7913 = vmatprep.subr.mxu1 %v9459_v58 }
0x1561   :  { %v7882_v63 = vpop.f32.mrf.mxu1 }
0x1562   :  { %v3787_v0 = vadd.f32 %v7882_v63, %v7315_v62  ;;  %v8365_v63 = vld [vmem:[%s9892_s2] ss:$0 sm:$0xff] }
0x1563   :  { %v3781_v4 = vpop.f32.mrf.mxu1 }
0x1564   :  { %v3782_v36 = vadd.f32 %v7315_v62, %v3781_v4  ;;  %v3791_v7 = vmax.f32 %v3787_v0, 0.0  ;;  %v8364_v62 = vld [vmem:[%s9891_s1] sm:$0xff] }
0x1566   :  { %v3790_v22 = vmax.f32 %v3782_v36, 0.0 }
0x1568   :  { %7899 = vmatprep.mubr.msk.f32.mxu0 %vm3798_vm13, %v3790_v22 }
0x1569   :  { %7900 = vmatmul.mubr.msk.f32.vlgmr.msra.gmra.mxu0 %vm3798_vm13, %v3791_v7 }
0x156a   :  { %7926 = vmatprep.mubr.msk.f32.mxu0 %vm8810_vm1, %v8809_v28 }
0x1629   :  { %v7901_v9 = vpop.f32.mrf.mxu0 }
0x162a   :  { %v3877_v12 = vadd.f32 %v7901_v9, %v7318_v8 }
0x162b   :  { %v3871_v13 = vpop.f32.mrf.mxu0 }
0x162c   :  { %v3872_v3 = vadd.f32 %v7318_v8, %v3871_v13  ;;  %v3881_v15 = vadd.f32 %v3877_v12, %v3702_v55 }
0x162e   :  { %v3885_v10 = vsel %vm406_vm0, %v3881_v15, 0.0  ;;  %v3880_v16 = vadd.f32 %v3872_v3, %v3701_v54 }
0x162f   :  { %3886 = vadd.xlane.f32.xlu0 %v3885_v10  ;;  %v8366_v10 = vld [vmem:[#allocation2] ss:$0 sm:$0xff] }
0x1630   :  { %v3882_v11 = vsel %vm406_vm0, %v3880_v16, 0.0 }
0x1631   :  { %3883 = vadd.xlane.f32.xlu1 %v3882_v11 }
0x16b8   :  { %v3887_v17 = vpop.xlane.xlu0 %3886 }
0x16b9   :  { %v3889_v18 = vmul.f32 0.03125, %v3887_v17 }
0x16ba   :  { %v3884_v48 = vpop.xlane.xlu1 %3883 }
0x16bb   :  { %v3891_v25 = vsub.f32 %v3881_v15, %v3889_v18  ;;  %v3888_v34 = vmul.f32 0.03125, %v3884_v48 }
0x16bd   :  { %v3890_v46 = vsub.f32 %v3880_v16, %v3888_v34  ;;  %v3893_v27 = vmul.f32 %v3891_v25, %v3891_v25 }
0x16bf   :  { %v3897_v29 = vsel %vm406_vm0, %v3893_v27, 0.0  ;;  %v3892_v30 = vmul.f32 %v3890_v46, %v3890_v46 }
0x16c0   :  { %3898 = vadd.xlane.f32.xlu0 %v3897_v29 }
0x16c1   :  { %v3894_v35 = vsel %vm406_vm0, %v3892_v30, 0.0 }
0x16c2   :  { %3895 = vadd.xlane.f32.xlu1 %v3894_v35 }
0x1749   :  { %v3899_v37 = vpop.xlane.xlu0 %3898 }
0x174a   :  { %v3901_v40 = vmul.f32 0.03125, %v3899_v37 }
0x174b   :  { %v3896_v43 = vpop.xlane.xlu1 %3895 }
0x174c   :  { %v3903_v44 = vadd.f32 1e-05, %v3901_v40  ;;  %v3900_v32 = vmul.f32 0.03125, %v3896_v43 }
0x174e   :  { %8271 = vrsqrt.f32 %v3903_v44  ;;  %v3902_v39 = vadd.f32 1e-05, %v3900_v32 }
0x1750   :  { %8273 = vrsqrt.f32 %v3902_v39 }
0x175b   :  { %v8272_v42 = vpop.eup %8271 }
0x175c   :  { %v3907_v45 = vmul.f32 %v8272_v42, %v3891_v25 }
0x175d   :  { %v8274_v49 = vpop.eup %8273 }
0x175e   :  { %v3915_v6 = vmul.f32 %v7321_v53, %v3907_v45  ;;  %v3906_v50 = vmul.f32 %v8274_v49, %v3890_v46 }
0x1760   :  { %v3914_v54 = vmul.f32 %v7321_v53, %v3906_v50  ;;  %v9475_v55 = vadd.f32 %v7322_v2, %v3915_v6 }
0x1762   :  { %v9477_v56 = vadd.f32 %v7322_v2, %v3914_v54  ;;  %v3925_v59 = vadd.f32 %v9485_v51, %v9475_v55 }
0x1764   :  { %v3924_v33 = vadd.f32 %v9480_v57, %v9477_v56 }
0x1766   :  { %7910 = vmatprep.mubr.msk.f32.mxu1 %vm406_vm0, %v3924_v33 }
0x1767   :  { %7911 = vmatmul.mubr.msk.f32.vlgmr.msra.gmra.mxu1 %vm406_vm0, %v3925_v59 }
0x1768   :  { %7914 = vmatpush3.msra.mxu1 %v9459_v58  ;;  %7921 = vmatprep.mubr.msk.f32.mxu1 %vm406_vm0, %v9477_v56 }
0x1769   :  { %7915 = vmatprep.subr.mxu1 %v8362_v60 }
0x176a   :  { %7916 = vmatpush3.msra.mxu1 %v8362_v60 }
0x176b   :  { %7917 = vmatprep.subr.mxu1 %v8363_v61 }
0x176c   :  { %7918 = vmatpush3.msra.mxu1 %v8363_v61 }
0x176d   :  { %7919 = vmatprep.subr.mxu1 %v8364_v62 }
0x176e   :  { %7920 = vmatpush3.msra.mxu1 %v8364_v62 }
0x176f   :  { %7922 = vmatmul.mubr.msk.f32.vlgmr.msra.gmra.mxu1 %vm406_vm0, %v9475_v55  ;;  %7929 = vmatprep.subr.mxu1 %v8809_v28 }
0x1770   :  { %7931 = vmatprep.mubr.msk.f32.mxu1 %vm8810_vm1, %v8809_v28 }
0x1827   :  { %v7912_v58 = vpop.f32.mrf.mxu1 }
0x1828   :  { %v9503_v0 = vadd.f32 %v8365_v63, %v7912_v58 }
0x1829   :  { %v3998_v4 = vpop.f32.mrf.mxu1 }
0x182a   :  { %v9505_v36 = vadd.f32 %v8365_v63, %v3998_v4  ;;  %4092 = vrot.lane.b32.xlu0 %v9503_v0, %s8811_s7 }
0x182c   :  { %4090 = vrot.lane.b32.xlu1 %v9505_v36, %s8811_s7 }
0x182f   :  { %v7923_v9 = vpop.f32.mrf.mxu1 }
0x1830   :  { %v9539_v16 = vadd.f32 %v8366_v10, %v7923_v9 }
0x1831   :  { %v4079_v3 = vpop.f32.mrf.mxu1 }
0x1832   :  { %v9547_v11 = vadd.f32 %v8366_v10, %v4079_v3 }
0x189c   :  { %v9511_v22 = vpop.permute.xlu0 %4092 }
0x189d   :  { %v4097_v7 = vsel %vm382_vm2, %v9511_v22, 0.0  ;;  %v4099_v13 = vsel %vm9066_vm5, %v9511_v22, 0.0 }
0x189e   :  { %7930 = vmatpush3.xpose.msk.msra.mxu1 %vm406_vm0, %v4097_v7  ;;  %v9517_v8 = vpop.permute.xlu1 %4090 }
0x189f   :  { %v4096_v12 = vsel %vm382_vm2, %v9517_v8, 0.0  ;;  %7939 = vmatprep.subr.mxu1 %v8809_v28  ;;  %v4098_v15 = vsel %vm9066_vm5, %v9517_v8, 0.0 }
0x18a0   :  { %7925 = vmatpush3.xpose.msk.msra.mxu0 %vm406_vm0, %v4096_v12 }
0x18a1   :  { %7932 = vmatmul.mubr.msk.f32.vlgmr.msra.gmra.mxu1 %vm406_vm0, %v9503_v0  ;;  %7934 = vmatprep.subr.mxu0 %v8809_v28 }
0x18a2   :  { %7940 = vmatpush3.xpose.msk.msra.mxu1 %vm406_vm0, %v4099_v13  ;;  %7941 = vmatprep.mubr.msk.f32.mxu1 %vm8810_vm1, %v8809_v28 }
0x18a3   :  { %7927 = vmatmul.mubr.msk.f32.vlgmr.msra.gmra.mxu0 %vm406_vm0, %v9505_v36  ;;  %7949 = vmatprep.subr.mxu1 %v8809_v28 }
0x18a4   :  { %7935 = vmatpush3.xpose.msk.msra.mxu0 %vm406_vm0, %v4098_v15  ;;  %7936 = vmatprep.mubr.msk.f32.mxu0 %vm8810_vm1, %v8809_v28 }
0x18a5   :  { %7942 = vmatmul.mubr.msk.f32.vlgmr.msra.gmra.mxu1 %vm406_vm0, %v9503_v0  ;;  %7944 = vmatprep.subr.mxu0 %v8809_v28 }
0x18a6   :  { %7950 = vmatpush3.msk.msra.mxu1 %vm9066_vm5, %v9539_v16  ;;  %7951 = vmatprep.mubr.msk.f32.mxu1 %vm8810_vm1, %v8809_v28 }
0x18a7   :  { %7937 = vmatmul.mubr.msk.f32.vlgmr.msra.gmra.mxu0 %vm406_vm0, %v9505_v36  ;;  %7959 = vmatprep.subr.mxu1 %v8809_v28 }
0x18a8   :  { %7945 = vmatpush3.msk.msra.mxu0 %vm9066_vm5, %v9547_v11  ;;  %7946 = vmatprep.mubr.msk.f32.mxu0 %vm8810_vm1, %v8809_v28 }
0x18a9   :  { %7954 = vmatprep.subr.mxu0 %v8809_v28 }
0x1961   :  { %v4258_v17 = vpop.f32.mrf.mxu1 }
0x1962   :  { %v4263_v30 = vmul.f32 0.35355338, %v4258_v17 }
0x1963   :  { %v4183_v18 = vpop.f32.mrf.mxu0  ;;  %v7933_v48 = vpop.f32.mrf.mxu1 }
0x1964   :  { %v4262_v43 = vmul.f32 0.35355338, %v4183_v18  ;;  %v4267_v32 = vsel %vm956_vm6, %v4263_v30, -inf }
0x1965   :  { %v7928_v25 = vpop.f32.mrf.mxu0  ;;  %v4428_v34 = vpop.f32.mrf.mxu1 }
0x1966   :  { %v4433_v46 = vmul.f32 0.35355338, %v4428_v34  ;;  %v4264_v39 = vsel %vm956_vm6, %v4262_v43, -inf }
0x1967   :  { %v4355_v27 = vpop.f32.mrf.mxu0  ;;  %v7943_v29 = vpop.f32.mrf.mxu1 }
0x1968   :  { %v4432_v35 = vmul.f32 0.35355338, %v4355_v27  ;;  %v4437_v37 = vsel %vm956_vm6, %v4433_v46, -inf }
0x1969   :  { %4438 = vmax.xlane.f32.xlu0 %v4437_v37  ;;  %v7938_v40 = vpop.f32.mrf.mxu0  ;;  %v4100_v37 = vsel %vm9145_vm9, %v9517_v8, 0.0 }
0x196a   :  { %v4434_v44 = vsel %vm956_vm6, %v4432_v35, -inf }
0x196b   :  { %4435 = vmax.xlane.f32.xlu1 %v4434_v44 }
0x196d   :  { %4268 = vmax.xlane.f32.xlu0 %v4267_v32 }
0x196f   :  { %4265 = vmax.xlane.f32.xlu1 %v4264_v39 }
0x19f2   :  { %v4439_v42 = vpop.xlane.xlu0 %4438 }
0x19f3   :  { %v4441_v53 = vsub.f32 %v4433_v46, %v4439_v42 }
0x19f4   :  { %v4436_v45 = vpop.xlane.xlu1 %4435 }
0x19f5   :  { %v4444_v49 = vmul.f32 1.442695, %v4441_v53  ;;  %v4440_v6 = vsub.f32 %v4432_v35, %v4436_v45 }
0x19f6   :  { %v4269_v50 = vpop.xlane.xlu0 %4268 }
0x19f7   :  { %8275 = vpow2.f32 %v4444_v49  ;;  %v4442_v2 = vmul.f32 1.442695, %v4440_v6  ;;  %v4271_v54 = vsub.f32 %v4263_v30, %v4269_v50  ;;  %v4101_v30 = vsel %vm9145_vm9, %v9511_v22, 0.0 }
0x19f8   :  { %v4266_v33 = vpop.xlane.xlu1 %4265 }
0x19f9   :  { %8277 = vpow2.f32 %v4442_v2  ;;  %v4274_v59 = vmul.f32 1.442695, %v4271_v54  ;;  %v4270_v60 = vsub.f32 %v4262_v43, %v4266_v33 }
0x19fb   :  { %8279 = vpow2.f32 %v4274_v59  ;;  %v4272_v61 = vmul.f32 1.442695, %v4270_v60 }
0x19fd   :  { %8281 = vpow2.f32 %v4272_v61 }
0x1a04   :  { %v8276_v62 = vpop.eup %8275 }
0x1a05   :  { %v4449_v58 = vsel %vm956_vm6, %v8276_v62, 0.0 }
0x1a06   :  { %v8278_v63 = vpop.eup %8277  ;;  %4450 = vadd.xlane.f32.xlu0 %v4449_v58 }
0x1a07   :  { %v4446_v4 = vsel %vm956_vm6, %v8278_v63, 0.0 }
0x1a08   :  { %v8280_v7 = vpop.eup %8279  ;;  %4447 = vadd.xlane.f32.xlu1 %v4446_v4 }
0x1a09   :  { %v4279_v9 = vsel %vm956_vm6, %v8280_v7, 0.0 }
0x1a0a   :  { %v8282_v12 = vpop.eup %8281  ;;  %4280 = vadd.xlane.f32.xlu0 %v4279_v9 }
0x1a0b   :  { %v4276_v13 = vsel %vm956_vm6, %v8282_v12, 0.0 }
0x1a0c   :  { %4277 = vadd.xlane.f32.xlu1 %v4276_v13 }
0x1a8f   :  { %v4451_v3 = vpop.xlane.xlu0 %4450 }
0x1a90   :  { %8283 = vrcp.f32 %v4451_v3 }
0x1a91   :  { %v4448_v15 = vpop.xlane.xlu1 %4447 }
0x1a92   :  { %8285 = vrcp.f32 %v4448_v15 }
0x1a93   :  { %v4281_v10 = vpop.xlane.xlu0 %4280 }
0x1a94   :  { %8287 = vrcp.f32 %v4281_v10 }
0x1a95   :  { %v4278_v17 = vpop.xlane.xlu1 %4277 }
0x1a96   :  { %8289 = vrcp.f32 %v4278_v17 }
0x1a9d   :  { %v8284_v18 = vpop.eup %8283 }
0x1a9e   :  { %v4455_v48 = vmul.f32 %v8284_v18, %v8276_v62 }
0x1a9f   :  { %v8286_v25 = vpop.eup %8285 }
0x1aa0   :  { %7952 = vmatmul.mubr.msk.f32.vlgmr.msra.gmra.mxu1 %vm956_vm6, %v4455_v48  ;;  %v4454_v34 = vmul.f32 %v8286_v25, %v8278_v63 }
0x1aa1   :  { %v8288_v46 = vpop.eup %8287  ;;  %7960 = vmatpush3.msk.msra.mxu1 %vm382_vm2, %v9539_v16  ;;  %7961 = vmatprep.mubr.msk.f32.mxu1 %vm8810_vm1, %v8809_v28 }
0x1aa2   :  { %7947 = vmatmul.mubr.msk.f32.vlgmr.msra.gmra.mxu0 %vm956_vm6, %v4454_v34  ;;  %7969 = vmatprep.subr.mxu1 %v8809_v28  ;;  %v4285_v27 = vmul.f32 %v8288_v46, %v8280_v7  ;;  %v4103_v46 = vsel %vm9188_vm12, %v9511_v22, 0.0  ;;  %v8367_v22 = vld [vmem:[%s9900_s14 + $0x18] sm:$0xff] }
0x1aa3   :  { %v8290_v29 = vpop.eup %8289  ;;  %7955 = vmatpush3.msk.msra.mxu0 %vm382_vm2, %v9547_v11  ;;  %7956 = vmatprep.mubr.msk.f32.mxu0 %vm8810_vm1, %v8809_v28 }
0x1aa4   :  { %7962 = vmatmul.mubr.msk.f32.vlgmr.msra.gmra.mxu1 %vm956_vm6, %v4285_v27  ;;  %7964 = vmatprep.subr.mxu0 %v8809_v28  ;;  %v4284_v35 = vmul.f32 %v8290_v29, %v8282_v12  ;;  %v4102_v29 = vsel %vm9188_vm12, %v9517_v8, 0.0 }
0x1aa5   :  { %7970 = vmatpush3.xpose.msk.msra.mxu1 %vm406_vm0, %v4101_v30  ;;  %7971 = vmatprep.mubr.msk.f32.mxu1 %vm8810_vm1, %v8809_v28 }
0x1aa6   :  { %7957 = vmatmul.mubr.msk.f32.vlgmr.msra.gmra.mxu0 %vm956_vm6, %v4284_v35  ;;  %7979 = vmatprep.subr.mxu1 %v8809_v28 }
0x1aa7   :  { %7965 = vmatpush3.xpose.msk.msra.mxu0 %vm406_vm0, %v4100_v37  ;;  %7966 = vmatprep.mubr.msk.f32.mxu0 %vm8810_vm1, %v8809_v28 }
0x1aa8   :  { %7972 = vmatmul.mubr.msk.f32.vlgmr.msra.gmra.mxu1 %vm406_vm0, %v9503_v0  ;;  %7974 = vmatprep.subr.mxu0 %v8809_v28 }
0x1aa9   :  { %7980 = vmatpush3.msk.msra.mxu1 %vm9145_vm9, %v9539_v16  ;;  %7981 = vmatprep.mubr.msk.f32.mxu1 %vm8810_vm1, %v8809_v28 }
0x1aaa   :  { %7967 = vmatmul.mubr.msk.f32.vlgmr.msra.gmra.mxu0 %vm406_vm0, %v9505_v36  ;;  %7989 = vmatprep.subr.mxu1 %v8809_v28 }
0x1aab   :  { %7975 = vmatpush3.msk.msra.mxu0 %vm9145_vm9, %v9547_v11  ;;  %7976 = vmatprep.mubr.msk.f32.mxu0 %vm8810_vm1, %v8809_v28 }
0x1aac   :  { %7984 = vmatprep.subr.mxu0 %v8809_v28 }
0x1b60   :  { %v4598_v40 = vpop.f32.mrf.mxu1 }
0x1b62   :  { %v4525_v43 = vpop.f32.mrf.mxu0  ;;  %v7953_v44 = vpop.f32.mrf.mxu1 }
0x1b64   :  { %v7948_v32 = vpop.f32.mrf.mxu0  ;;  %v4744_v39 = vpop.f32.mrf.mxu1 }
0x1b65   :  { %v4745_v42 = vadd.f32 %v4744_v39, %v4598_v40 }
0x1b66   :  { %v4671_v53 = vpop.f32.mrf.mxu0  ;;  %v7963_v45 = vpop.f32.mrf.mxu1 }
0x1b67   :  { %v4672_v49 = vadd.f32 %v4671_v53, %v4525_v43 }
0x1b68   :  { %v7958_v6 = vpop.f32.mrf.mxu0  ;;  %v4890_v50 = vpop.f32.mrf.mxu1 }
0x1b69   :  { %v4895_v2 = vmul.f32 0.35355338, %v4890_v50 }
0x1b6a   :  { %v4817_v54 = vpop.f32.mrf.mxu0  ;;  %v7973_v33 = vpop.f32.mrf.mxu1 }
0x1b6b   :  { %v4894_v59 = vmul.f32 0.35355338, %v4817_v54  ;;  %v4899_v60 = vsel %vm956_vm6, %v4895_v2, -inf }
0x1b6c   :  { %4900 = vmax.xlane.f32.xlu0 %v4899_v60  ;;  %v7968_v61 = vpop.f32.mrf.mxu0 }
0x1b6d   :  { %v4896_v62 = vsel %vm956_vm6, %v4894_v59, -inf }
0x1b6e   :  { %4897 = vmax.xlane.f32.xlu1 %v4896_v62 }
0x1bf5   :  { %v4901_v58 = vpop.xlane.xlu0 %4900 }
0x1bf6   :  { %v4903_v63 = vsub.f32 %v4895_v2, %v4901_v58 }
0x1bf7   :  { %v4898_v4 = vpop.xlane.xlu1 %4897 }
0x1bf8   :  { %v4906_v7 = vmul.f32 1.442695, %v4903_v63  ;;  %v4902_v9 = vsub.f32 %v4894_v59, %v4898_v4 }
0x1bfa   :  { %8291 = vpow2.f32 %v4906_v7  ;;  %v4904_v12 = vmul.f32 1.442695, %v4902_v9 }
0x1bfc   :  { %8293 = vpow2.f32 %v4904_v12  ;;  %v8369_v12 = vld [vmem:[%s9900_s14 + $0x10] sm:$0xff] }
0x1c07   :  { %v8292_v13 = vpop.eup %8291 }
0x1c08   :  { %v4911_v3 = vsel %vm956_vm6, %v8292_v13, 0.0 }
0x1c09   :  { %v8294_v15 = vpop.eup %8293  ;;  %4912 = vadd.xlane.f32.xlu0 %v4911_v3  ;;  %v8371_v3 = vld [vmem:[%s9900_s14 + $0x8] sm:$0xff] }
0x1c0a   :  { %v4908_v10 = vsel %vm956_vm6, %v8294_v15, 0.0 }
0x1c0b   :  { %4909 = vadd.xlane.f32.xlu1 %v4908_v10  ;;  %v8373_v10 = vld [vmem:[%s9900_s14] sm:$0xff] }
0x1c92   :  { %v4913_v17 = vpop.xlane.xlu0 %4912 }
0x1c93   :  { %8295 = vrcp.f32 %v4913_v17  ;;  %v8374_v17 = vld [vmem:[%s9899_s8] sm:$0xff] }
0x1c94   :  { %v4910_v18 = vpop.xlane.xlu1 %4909 }
0x1c95   :  { %8297 = vrcp.f32 %v4910_v18 }
0x1ca0   :  { %v8296_v48 = vpop.eup %8295 }
0x1ca1   :  { %v4917_v25 = vmul.f32 %v8296_v48, %v8292_v13  ;;  %v8370_v13 = vld [vmem:[%s9899_s8 + $0x10] sm:$0xff] }
0x1ca2   :  { %v8298_v34 = vpop.eup %8297 }
0x1ca3   :  { %7982 = vmatmul.mubr.msk.f32.vlgmr.msra.gmra.mxu1 %vm956_vm6, %v4917_v25  ;;  %v4916_v27 = vmul.f32 %v8298_v34, %v8294_v15  ;;  %v8372_v15 = vld [vmem:[%s9899_s8 + $0x8] sm:$0xff] }
0x1ca4   :  { %7990 = vmatpush3.xpose.msk.msra.mxu1 %vm406_vm0, %v4103_v46  ;;  %7991 = vmatprep.mubr.msk.f32.mxu1 %vm8810_vm1, %v8809_v28 }
0x1ca5   :  { %7977 = vmatmul.mubr.msk.f32.vlgmr.msra.gmra.mxu0 %vm956_vm6, %v4916_v27  ;;  %7999 = vmatprep.subr.mxu1 %v8809_v28 }
0x1ca6   :  { %7985 = vmatpush3.xpose.msk.msra.mxu0 %vm406_vm0, %v4102_v29  ;;  %7986 = vmatprep.mubr.msk.f32.mxu0 %vm8810_vm1, %v8809_v28 }
0x1ca7   :  { %7992 = vmatmul.mubr.msk.f32.vlgmr.msra.gmra.mxu1 %vm406_vm0, %v9503_v0  ;;  %7994 = vmatprep.subr.mxu0 %v8809_v28  ;;  %v8368_v0 = vld [vmem:[%s9899_s8 + $0x18] sm:$0xff] }
0x1ca8   :  { %8000 = vmatpush3.msk.msra.mxu1 %vm9188_vm12, %v9539_v16  ;;  %8001 = vmatprep.mubr.msk.f32.mxu1 %vm8810_vm1, %v8809_v28 }
0x1ca9   :  { %7987 = vmatmul.mubr.msk.f32.vlgmr.msra.gmra.mxu0 %vm406_vm0, %v9505_v36  ;;  %8015 = vmatprep.subr.mxu1 %v8367_v22 }
0x1caa   :  { %7995 = vmatpush3.msk.msra.mxu0 %vm9188_vm12, %v9547_v11  ;;  %7996 = vmatprep.mubr.msk.f32.mxu0 %vm8810_vm1, %v8809_v28 }
0x1cab   :  { %8004 = vmatprep.subr.mxu0 %v8368_v0 }
0x1d63   :  { %v5060_v8 = vpop.f32.mrf.mxu1 }
0x1d64   :  { %v9653_v30 = vadd.f32 %v5060_v8, %v4745_v42 }
0x1d65   :  { %v4987_v16 = vpop.f32.mrf.mxu0  ;;  %v7983_v35 = vpop.f32.mrf.mxu1 }
0x1d66   :  { %v5064_v37 = vadd.f32 %v4987_v16, %v4672_v49 }
0x1d67   :  { %v7978_v40 = vpop.f32.mrf.mxu0  ;;  %v5208_v43 = vpop.f32.mrf.mxu1 }
0x1d68   :  { %v5213_v36 = vmul.f32 0.35355338, %v5208_v43 }
0x1d69   :  { %v5135_v44 = vpop.f32.mrf.mxu0  ;;  %v7993_v32 = vpop.f32.mrf.mxu1 }
0x1d6a   :  { %v5212_v39 = vmul.f32 0.35355338, %v5135_v44  ;;  %v5217_v53 = vsel %vm956_vm6, %v5213_v36, -inf }
0x1d6b   :  { %5218 = vmax.xlane.f32.xlu0 %v5217_v53  ;;  %v7988_v11 = vpop.f32.mrf.mxu0 }
0x1d6c   :  { %v5214_v45 = vsel %vm956_vm6, %v5212_v39, -inf }
0x1d6d   :  { %5215 = vmax.xlane.f32.xlu1 %v5214_v45 }
0x1df4   :  { %v5219_v6 = vpop.xlane.xlu0 %5218 }
0x1df5   :  { %v5221_v50 = vsub.f32 %v5213_v36, %v5219_v6 }
0x1df6   :  { %v5216_v42 = vpop.xlane.xlu1 %5215 }
0x1df7   :  { %v5224_v2 = vmul.f32 1.442695, %v5221_v50  ;;  %v5220_v54 = vsub.f32 %v5212_v39, %v5216_v42 }
0x1df9   :  { %8299 = vpow2.f32 %v5224_v2  ;;  %v5222_v49 = vmul.f32 1.442695, %v5220_v54 }
0x1dfb   :  { %8301 = vpow2.f32 %v5222_v49 }
0x1e06   :  { %v8300_v33 = vpop.eup %8299 }
0x1e07   :  { %v5229_v59 = vsel %vm956_vm6, %v8300_v33, 0.0 }
0x1e08   :  { %v8302_v60 = vpop.eup %8301  ;;  %5230 = vadd.xlane.f32.xlu0 %v5229_v59 }
0x1e09   :  { %v5226_v61 = vsel %vm956_vm6, %v8302_v60, 0.0 }
0x1e0a   :  { %5227 = vadd.xlane.f32.xlu1 %v5226_v61  ;;  %v8376_v61 = vld [vmem:[#allocation16] ss:$0 sm:$0xff] }
0x1e91   :  { %v5231_v62 = vpop.xlane.xlu0 %5230 }
0x1e92   :  { %8303 = vrcp.f32 %v5231_v62 }
0x1e93   :  { %v5228_v58 = vpop.xlane.xlu1 %5227 }
0x1e94   :  { %8305 = vrcp.f32 %v5228_v58 }
0x1e9f   :  { %v8304_v63 = vpop.eup %8303 }
0x1ea0   :  { %v5235_v4 = vmul.f32 %v8304_v63, %v8300_v33  ;;  %v8377_v63 = vld [vmem:[#allocation18] ss:$0 sm:$0xff] }
0x1ea1   :  { %v8306_v7 = vpop.eup %8305 }
0x1ea2   :  { %8002 = vmatmul.mubr.msk.f32.vlgmr.msra.gmra.mxu1 %vm956_vm6, %v5235_v4  ;;  %v5234_v9 = vmul.f32 %v8306_v7, %v8302_v60 }
0x1ea3   :  { %8016 = vmatpush3.msra.mxu1 %v8367_v22  ;;  %v8375_v22 = vld [vmem:[#allocation4] ss:$0 sm:$0xff] }
0x1ea4   :  { %7997 = vmatmul.mubr.msk.f32.vlgmr.msra.gmra.mxu0 %vm956_vm6, %v5234_v9  ;;  %8017 = vmatprep.subr.mxu1 %v8369_v12 }
0x1ea5   :  { %8005 = vmatpush3.msra.mxu0 %v8368_v0  ;;  %8018 = vmatpush3.msra.mxu1 %v8369_v12 }
0x1ea6   :  { %8006 = vmatprep.subr.mxu0 %v8370_v13  ;;  %8019 = vmatprep.subr.mxu1 %v8371_v3 }
0x1ea7   :  { %8007 = vmatpush3.msra.mxu0 %v8370_v13  ;;  %8020 = vmatpush3.msra.mxu1 %v8371_v3  ;;  %v8378_v3 = vld [vmem:[#allocation6] ss:$0 sm:$0xff] }
0x1ea8   :  { %8008 = vmatprep.subr.mxu0 %v8372_v15  ;;  %8021 = vmatprep.subr.mxu1 %v8373_v10 }
0x1ea9   :  { %8009 = vmatpush3.msra.mxu0 %v8372_v15  ;;  %8022 = vmatpush3.msra.mxu1 %v8373_v10 }
0x1eaa   :  { %8010 = vmatprep.subr.mxu0 %v8374_v17  ;;  %8031 = vmatprep.subr.mxu1 %v8809_v28 }
0x1eab   :  { %8011 = vmatpush3.msra.mxu0 %v8374_v17 }
0x1eac   :  { %8026 = vmatprep.subr.mxu0 %v8809_v28 }
0x1f62   :  { %v5378_v18 = vpop.f32.mrf.mxu1 }
0x1f63   :  { %v5383_v46 = vadd.f32 %v5378_v18, %v9653_v30 }
0x1f64   :  { %v5305_v48 = vpop.f32.mrf.mxu0  ;;  %v8003_v25 = vpop.f32.mrf.mxu1 }
0x1f65   :  { %v5382_v34 = vadd.f32 %v5305_v48, %v5064_v37 }
0x1f66   :  { %v7998_v27 = vpop.f32.mrf.mxu0 }
0x1f67   :  { %8012 = vmatprep.mubr.msk.f32.mxu0 %vm406_vm0, %v5382_v34 }
0x1f68   :  { %8013 = vmatmul.mubr.msk.f32.vlgmr.msra.gmra.mxu0 %vm406_vm0, %v5383_v46 }
0x1f69   :  { %8027 = vmatpush3.xpose.msk.msra.mxu0 %vm406_vm0, %v9242_v26  ;;  %8028 = vmatprep.mubr.msk.f32.mxu0 %vm8810_vm1, %v8809_v28 }
0x1f6a   :  { %8036 = vmatprep.subr.mxu0 %v8809_v28 }
0x2028   :  { %v8014_v29 = vpop.f32.mrf.mxu0 }
0x2029   :  { %v5462_v0 = vadd.f32 %v8375_v22, %v8014_v29 }
0x202a   :  { %v5456_v8 = vpop.f32.mrf.mxu0 }
0x202b   :  { %v5457_v16 = vadd.f32 %v8375_v22, %v5456_v8  ;;  %v5466_v30 = vadd.f32 %v5462_v0, %v9475_v55 }
0x202d   :  { %v5470_v35 = vsel %vm406_vm0, %v5466_v30, 0.0  ;;  %v5465_v37 = vadd.f32 %v5457_v16, %v9477_v56 }
0x202e   :  { %5471 = vadd.xlane.f32.xlu0 %v5470_v35 }
0x202f   :  { %v5467_v40 = vsel %vm406_vm0, %v5465_v37, 0.0 }
0x2030   :  { %5468 = vadd.xlane.f32.xlu1 %v5467_v40 }
0x20b7   :  { %v5472_v26 = vpop.xlane.xlu0 %5471 }
0x20b8   :  { %v5474_v43 = vmul.f32 0.03125, %v5472_v26 }
0x20b9   :  { %v5469_v36 = vpop.xlane.xlu1 %5468 }
0x20ba   :  { %v5476_v44 = vsub.f32 %v5466_v30, %v5474_v43  ;;  %v5473_v32 = vmul.f32 0.03125, %v5469_v36 }
0x20bc   :  { %v5475_v39 = vsub.f32 %v5465_v37, %v5473_v32  ;;  %v5478_v53 = vmul.f32 %v5476_v44, %v5476_v44 }
0x20be   :  { %v5482_v11 = vsel %vm406_vm0, %v5478_v53, 0.0  ;;  %v5477_v45 = vmul.f32 %v5475_v39, %v5475_v39 }
0x20bf   :  { %5483 = vadd.xlane.f32.xlu0 %v5482_v11 }
0x20c0   :  { %v5479_v55 = vsel %vm406_vm0, %v5477_v45, 0.0 }
0x20c1   :  { %5480 = vadd.xlane.f32.xlu1 %v5479_v55 }
0x2148   :  { %v5484_v6 = vpop.xlane.xlu0 %5483 }
0x2149   :  { %v5486_v56 = vmul.f32 0.03125, %v5484_v6 }
0x214a   :  { %v5481_v50 = vpop.xlane.xlu1 %5480 }
0x214b   :  { %v5488_v42 = vadd.f32 1e-05, %v5486_v56  ;;  %v5485_v2 = vmul.f32 0.03125, %v5481_v50 }
0x214d   :  { %8307 = vrsqrt.f32 %v5488_v42  ;;  %v5487_v54 = vadd.f32 1e-05, %v5485_v2 }
0x214f   :  { %8309 = vrsqrt.f32 %v5487_v54 }
0x215a   :  { %v8308_v49 = vpop.eup %8307 }
0x215b   :  { %v5492_v33 = vmul.f32 %v8308_v49, %v5476_v44 }
0x215c   :  { %v8310_v59 = vpop.eup %8309 }
0x215d   :  { %v5491_v60 = vmul.f32 %v8310_v59, %v5475_v39  ;;  %v5494_v62 = vmul.f32 %v8376_v61, %v5492_v33 }
0x215f   :  { %v5493_v58 = vmul.f32 %v8376_v61, %v5491_v60  ;;  %v9683_v4 = vadd.f32 %v8377_v63, %v5494_v62 }
0x2161   :  { %v9685_v7 = vadd.f32 %v8377_v63, %v5493_v58  ;;  %v5498_v12 = vadd.f32 %v9485_v51, %v9683_v4 }
0x2163   :  { %v5497_v9 = vadd.f32 %v9480_v57, %v9685_v7 }
0x2165   :  { %8023 = vmatprep.mubr.msk.f32.mxu1 %vm406_vm0, %v5497_v9 }
0x2166   :  { %8024 = vmatmul.mubr.msk.f32.vlgmr.msra.gmra.mxu1 %vm406_vm0, %v5498_v12 }
0x2167   :  { %8032 = vmatpush3.xpose.msk.msra.mxu1 %vm406_vm0, %v9273_v14  ;;  %8033 = vmatprep.mubr.msk.f32.mxu1 %vm8810_vm1, %v8809_v28 }
0x2168   :  { %8041 = vmatprep.subr.mxu1 %v8809_v28 }
0x2226   :  { %v8025_v13 = vpop.f32.mrf.mxu1 }
0x2227   :  { %v9698_v15 = vadd.f32 %v8378_v3, %v8025_v13 }
0x2228   :  { %v5571_v57 = vpop.f32.mrf.mxu1 }
0x2229   :  { %v9700_v10 = vadd.f32 %v8378_v3, %v5571_v57  ;;  %8034 = vmatmul.mubr.msk.f32.vlgmr.msra.gmra.mxu1 %vm406_vm0, %v9698_v15 }
0x222a   :  { %8042 = vmatpush3.xpose.msk.msra.mxu1 %vm406_vm0, %v9289_v19  ;;  %8043 = vmatprep.mubr.msk.f32.mxu1 %vm8810_vm1, %v8809_v28 }
0x222b   :  { %8029 = vmatmul.mubr.msk.f32.vlgmr.msra.gmra.mxu0 %vm406_vm0, %v9700_v10  ;;  %8051 = vmatprep.subr.mxu1 %v8809_v28 }
0x222c   :  { %8037 = vmatpush3.xpose.msk.msra.mxu0 %vm406_vm0, %v9300_v20  ;;  %8038 = vmatprep.mubr.msk.f32.mxu0 %vm8810_vm1, %v8809_v28 }
0x222d   :  { %8044 = vmatmul.mubr.msk.f32.vlgmr.msra.gmra.mxu1 %vm406_vm0, %v9698_v15  ;;  %8046 = vmatprep.subr.mxu0 %v8809_v28 }
0x222e   :  { %8052 = vmatpush3.msk.msra.mxu1 %vm9066_vm5, %v9304_v21  ;;  %8053 = vmatprep.mubr.msk.f32.mxu1 %vm8810_vm1, %v8809_v28 }
0x222f   :  { %8039 = vmatmul.mubr.msk.f32.vlgmr.msra.gmra.mxu0 %vm406_vm0, %v9700_v10  ;;  %8061 = vmatprep.subr.mxu1 %v8809_v28 }
0x2230   :  { %8047 = vmatpush3.msk.msra.mxu0 %vm9066_vm5, %v9314_v23  ;;  %8048 = vmatprep.mubr.msk.f32.mxu0 %vm8810_vm1, %v8809_v28 }
0x2231   :  { %8056 = vmatprep.subr.mxu0 %v8809_v28 }
0x22e9   :  { %v5722_v14 = vpop.f32.mrf.mxu1 }
0x22ea   :  { %v5727_v34 = vmul.f32 0.35355338, %v5722_v14 }
0x22eb   :  { %v5649_v19 = vpop.f32.mrf.mxu0  ;;  %v8035_v20 = vpop.f32.mrf.mxu1 }
0x22ec   :  { %v5726_v29 = vmul.f32 0.35355338, %v5649_v19  ;;  %v5731_v0 = vsel %vm956_vm6, %v5727_v34, -inf }
0x22ed   :  { %v8030_v51 = vpop.f32.mrf.mxu0  ;;  %v5886_v17 = vpop.f32.mrf.mxu1 }
0x22ee   :  { %v5891_v18 = vmul.f32 0.35355338, %v5886_v17  ;;  %v5728_v8 = vsel %vm956_vm6, %v5726_v29, -inf }
0x22ef   :  { %v5816_v48 = vpop.f32.mrf.mxu0  ;;  %v8045_v25 = vpop.f32.mrf.mxu1 }
0x22f0   :  { %v5890_v46 = vmul.f32 0.35355338, %v5816_v48  ;;  %v5895_v27 = vsel %vm956_vm6, %v5891_v18, -inf }
0x22f1   :  { %5896 = vmax.xlane.f32.xlu0 %v5895_v27  ;;  %v8040_v41 = vpop.f32.mrf.mxu0 }
0x22f2   :  { %v5892_v22 = vsel %vm956_vm6, %v5890_v46, -inf }
0x22f3   :  { %5893 = vmax.xlane.f32.xlu1 %v5892_v22 }
0x22f5   :  { %5732 = vmax.xlane.f32.xlu0 %v5731_v0 }
0x22f7   :  { %5729 = vmax.xlane.f32.xlu1 %v5728_v8 }
0x237a   :  { %v5897_v16 = vpop.xlane.xlu0 %5896 }
0x237b   :  { %v5899_v30 = vsub.f32 %v5891_v18, %v5897_v16 }
0x237c   :  { %v5894_v35 = vpop.xlane.xlu1 %5893 }
0x237d   :  { %v5902_v37 = vmul.f32 1.442695, %v5899_v30  ;;  %v5898_v40 = vsub.f32 %v5890_v46, %v5894_v35 }
0x237e   :  { %v5733_v26 = vpop.xlane.xlu0 %5732 }
0x237f   :  { %8311 = vpow2.f32 %v5902_v37  ;;  %v5900_v43 = vmul.f32 1.442695, %v5898_v40  ;;  %v5735_v36 = vsub.f32 %v5727_v34, %v5733_v26 }
0x2380   :  { %v5730_v44 = vpop.xlane.xlu1 %5729 }
0x2381   :  { %8313 = vpow2.f32 %v5900_v43  ;;  %v5738_v32 = vmul.f32 1.442695, %v5735_v36  ;;  %v5734_v39 = vsub.f32 %v5726_v29, %v5730_v44 }
0x2383   :  { %8315 = vpow2.f32 %v5738_v32  ;;  %v5736_v53 = vmul.f32 1.442695, %v5734_v39 }
0x2385   :  { %8317 = vpow2.f32 %v5736_v53 }
0x238c   :  { %v8312_v11 = vpop.eup %8311 }
0x238d   :  { %v5907_v45 = vsel %vm956_vm6, %v8312_v11, 0.0 }
0x238e   :  { %v8314_v55 = vpop.eup %8313  ;;  %5908 = vadd.xlane.f32.xlu0 %v5907_v45 }
0x238f   :  { %v5904_v6 = vsel %vm956_vm6, %v8314_v55, 0.0 }
0x2390   :  { %v8316_v56 = vpop.eup %8315  ;;  %5905 = vadd.xlane.f32.xlu1 %v5904_v6 }
0x2391   :  { %v5743_v50 = vsel %vm956_vm6, %v8316_v56, 0.0 }
0x2392   :  { %v8318_v42 = vpop.eup %8317  ;;  %5744 = vadd.xlane.f32.xlu0 %v5743_v50 }
0x2393   :  { %v5740_v2 = vsel %vm956_vm6, %v8318_v42, 0.0 }
0x2394   :  { %5741 = vadd.xlane.f32.xlu1 %v5740_v2 }
0x2417   :  { %v5909_v54 = vpop.xlane.xlu0 %5908 }
0x2418   :  { %8319 = vrcp.f32 %v5909_v54 }
0x2419   :  { %v5906_v49 = vpop.xlane.xlu1 %5905 }
0x241a   :  { %8321 = vrcp.f32 %v5906_v49 }
0x241b   :  { %v5745_v33 = vpop.xlane.xlu0 %5744 }
0x241c   :  { %8323 = vrcp.f32 %v5745_v33 }
0x241d   :  { %v5742_v59 = vpop.xlane.xlu1 %5741 }
0x241e   :  { %8325 = vrcp.f32 %v5742_v59 }
0x2425   :  { %v8320_v60 = vpop.eup %8319 }
0x2426   :  { %v5913_v61 = vmul.f32 %v8320_v60, %v8312_v11 }
0x2427   :  { %v8322_v62 = vpop.eup %8321 }
0x2428   :  { %8054 = vmatmul.mubr.msk.f32.vlgmr.msra.gmra.mxu1 %vm956_vm6, %v5913_v61  ;;  %v5912_v58 = vmul.f32 %v8322_v62, %v8314_v55 }
0x2429   :  { %v8324_v63 = vpop.eup %8323  ;;  %8062 = vmatpush3.msk.msra.mxu1 %vm382_vm2, %v9304_v21  ;;  %8063 = vmatprep.mubr.msk.f32.mxu1 %vm8810_vm1, %v8809_v28 }
0x242a   :  { %8049 = vmatmul.mubr.msk.f32.vlgmr.msra.gmra.mxu0 %vm956_vm6, %v5912_v58  ;;  %8071 = vmatprep.subr.mxu1 %v8809_v28  ;;  %v5749_v9 = vmul.f32 %v8324_v63, %v8316_v56 }
0x242b   :  { %v8326_v12 = vpop.eup %8325  ;;  %8057 = vmatpush3.msk.msra.mxu0 %vm382_vm2, %v9314_v23  ;;  %8058 = vmatprep.mubr.msk.f32.mxu0 %vm8810_vm1, %v8809_v28 }
0x242c   :  { %8064 = vmatmul.mubr.msk.f32.vlgmr.msra.gmra.mxu1 %vm956_vm6, %v5749_v9  ;;  %8066 = vmatprep.subr.mxu0 %v8809_v28  ;;  %v5748_v13 = vmul.f32 %v8326_v12, %v8318_v42 }
0x242d   :  { %8072 = vmatpush3.xpose.msk.msra.mxu1 %vm406_vm0, %v9355_v47  ;;  %8073 = vmatprep.mubr.msk.f32.mxu1 %vm8810_vm1, %v8809_v28 }
0x242e   :  { %8059 = vmatmul.mubr.msk.f32.vlgmr.msra.gmra.mxu0 %vm956_vm6, %v5748_v13  ;;  %8081 = vmatprep.subr.mxu1 %v8809_v28 }
0x242f   :  { %8067 = vmatpush3.xpose.msk.msra.mxu0 %vm406_vm0, %v9366_v24  ;;  %8068 = vmatprep.mubr.msk.f32.mxu0 %vm8810_vm1, %v8809_v28 }
0x2430   :  { %8074 = vmatmul.mubr.msk.f32.vlgmr.msra.gmra.mxu1 %vm406_vm0, %v9698_v15  ;;  %8076 = vmatprep.subr.mxu0 %v8809_v28 }
0x2431   :  { %8082 = vmatpush3.msk.msra.mxu1 %vm9145_vm9, %v9304_v21  ;;  %8083 = vmatprep.mubr.msk.f32.mxu1 %vm8810_vm1, %v8809_v28 }
0x2432   :  { %8069 = vmatmul.mubr.msk.f32.vlgmr.msra.gmra.mxu0 %vm406_vm0, %v9700_v10  ;;  %8091 = vmatprep.subr.mxu1 %v8809_v28 }
0x2433   :  { %8077 = vmatpush3.msk.msra.mxu0 %vm9145_vm9, %v9314_v23  ;;  %8078 = vmatprep.mubr.msk.f32.mxu0 %vm8810_vm1, %v8809_v28 }
0x2434   :  { %8086 = vmatprep.subr.mxu0 %v8809_v28 }
0x24e8   :  { %v6056_v38 = vpop.f32.mrf.mxu1 }
0x24ea   :  { %v5983_v47 = vpop.f32.mrf.mxu0  ;;  %v8055_v24 = vpop.f32.mrf.mxu1 }
0x24ec   :  { %v8050_v3 = vpop.f32.mrf.mxu0  ;;  %v6202_v57 = vpop.f32.mrf.mxu1 }
0x24ed   :  { %v6203_v14 = vadd.f32 %v6202_v57, %v6056_v38  ;;  %v8381_v57 = vld [vmem:[%s9901_s24 + $0x10] sm:$0xff] }
0x24ee   :  { %v6129_v19 = vpop.f32.mrf.mxu0  ;;  %v8065_v20 = vpop.f32.mrf.mxu1 }
0x24ef   :  { %v6130_v51 = vadd.f32 %v6129_v19, %v5983_v47  ;;  %v8383_v19 = vld [vmem:[%s9901_s24 + $0x8] sm:$0xff]  ;;  %v8384_v20 = vld [vmem:[#allocation10 + $0x8] sm:$0xff] }
0x24f0   :  { %v8060_v17 = vpop.f32.mrf.mxu0  ;;  %v6342_v18 = vpop.f32.mrf.mxu1 }
0x24f1   :  { %v6347_v48 = vmul.f32 0.35355338, %v6342_v18  ;;  %v8386_v17 = vld [vmem:[#allocation10] sm:$0xff]  ;;  %v8387_v18 = vld [vmem:[%s9902_s19 + $0x38] sm:$0xff] }
0x24f2   :  { %v6272_v25 = vpop.f32.mrf.mxu0  ;;  %v8075_v52 = vpop.f32.mrf.mxu1 }
0x24f3   :  { %v6346_v34 = vmul.f32 0.35355338, %v6272_v25  ;;  %v6351_v46 = vsel %vm956_vm6, %v6347_v48, -inf }
0x24f4   :  { %6352 = vmax.xlane.f32.xlu0 %v6351_v46  ;;  %v8070_v27 = vpop.f32.mrf.mxu0 }
0x24f5   :  { %v6348_v41 = vsel %vm956_vm6, %v6346_v34, -inf }
0x24f6   :  { %6349 = vmax.xlane.f32.xlu1 %v6348_v41  ;;  %v8388_v41 = vld [vmem:[%s9902_s19 + $0x30] sm:$0xff] }
0x257d   :  { %v6353_v29 = vpop.xlane.xlu0 %6352 }
0x257e   :  { %v6355_v22 = vsub.f32 %v6347_v48, %v6353_v29  ;;  %v8389_v29 = vld [vmem:[%s9902_s19 + $0x28] sm:$0xff] }
0x257f   :  { %v6350_v0 = vpop.xlane.xlu1 %6349 }
0x2580   :  { %v6358_v8 = vmul.f32 1.442695, %v6355_v22  ;;  %v6354_v16 = vsub.f32 %v6346_v34, %v6350_v0  ;;  %v8390_v22 = vld [vmem:[%s9902_s19 + $0x20] sm:$0xff]  ;;  %v8391_v0 = vld [vmem:[%s9902_s19 + $0x18] sm:$0xff] }
0x2582   :  { %8327 = vpow2.f32 %v6358_v8  ;;  %v6356_v30 = vmul.f32 1.442695, %v6354_v16  ;;  %v8392_v8 = vld [vmem:[%s9902_s19 + $0x10] sm:$0xff]  ;;  %v8393_v16 = vld [vmem:[%s9902_s19 + $0x8] sm:$0xff] }
0x2584   :  { %8329 = vpow2.f32 %v6356_v30  ;;  %v8394_v30 = vld [vmem:[%s9902_s19] sm:$0xff] }
0x258f   :  { %v8328_v35 = vpop.eup %8327 }
0x2590   :  { %v6363_v37 = vsel %vm956_vm6, %v8328_v35, 0.0 }
0x2591   :  { %v8330_v40 = vpop.eup %8329  ;;  %6364 = vadd.xlane.f32.xlu0 %v6363_v37  ;;  %v8395_v37 = vld [vmem:[#allocation12] ss:$0 sm:$0xff] }
0x2592   :  { %v6360_v26 = vsel %vm956_vm6, %v8330_v40, 0.0 }
0x2593   :  { %6361 = vadd.xlane.f32.xlu1 %v6360_v26 }
0x261a   :  { %v6365_v43 = vpop.xlane.xlu0 %6364 }
0x261b   :  { %8331 = vrcp.f32 %v6365_v43 }
0x261c   :  { %v6362_v36 = vpop.xlane.xlu1 %6361 }
0x261d   :  { %8333 = vrcp.f32 %v6362_v36 }
0x2628   :  { %v8332_v44 = vpop.eup %8331 }
0x2629   :  { %v6369_v32 = vmul.f32 %v8332_v44, %v8328_v35 }
0x262a   :  { %v8334_v39 = vpop.eup %8333 }
0x262b   :  { %8084 = vmatmul.mubr.msk.f32.vlgmr.msra.gmra.mxu1 %vm956_vm6, %v6369_v32  ;;  %v6368_v53 = vmul.f32 %v8334_v39, %v8330_v40 }
0x262c   :  { %8092 = vmatpush3.xpose.msk.msra.mxu1 %vm406_vm0, %v9398_v1  ;;  %8093 = vmatprep.mubr.msk.f32.mxu1 %vm8810_vm1, %v8809_v28  ;;  %v8379_v1 = vld [vmem:[%s9901_s24 + $0x18] sm:$0xff] }
0x262d   :  { %8079 = vmatmul.mubr.msk.f32.vlgmr.msra.gmra.mxu0 %vm956_vm6, %v6368_v53  ;;  %8101 = vmatprep.subr.mxu1 %v8809_v28 }
0x262e   :  { %8087 = vmatpush3.xpose.msk.msra.mxu0 %vm406_vm0, %v9408_v5  ;;  %8088 = vmatprep.mubr.msk.f32.mxu0 %vm8810_vm1, %v8809_v28  ;;  %v8380_v5 = vld [vmem:[#allocation10 + $0x18] sm:$0xff] }
0x262f   :  { %8094 = vmatmul.mubr.msk.f32.vlgmr.msra.gmra.mxu1 %vm406_vm0, %v9698_v15  ;;  %8096 = vmatprep.subr.mxu0 %v8809_v28 }
0x2630   :  { %8102 = vmatpush3.msk.msra.mxu1 %vm9188_vm12, %v9304_v21  ;;  %8103 = vmatprep.mubr.msk.f32.mxu1 %vm8810_vm1, %v8809_v28 }
0x2631   :  { %8089 = vmatmul.mubr.msk.f32.vlgmr.msra.gmra.mxu0 %vm406_vm0, %v9700_v10  ;;  %8117 = vmatprep.subr.mxu1 %v8379_v1 }
0x2632   :  { %8097 = vmatpush3.msk.msra.mxu0 %vm9188_vm12, %v9314_v23  ;;  %8098 = vmatprep.mubr.msk.f32.mxu0 %vm8810_vm1, %v8809_v28 }
0x2633   :  { %8106 = vmatprep.subr.mxu0 %v8380_v5 }
0x26eb   :  { %v6512_v15 = vpop.f32.mrf.mxu1 }
0x26ec   :  { %v9813_v11 = vadd.f32 %v6512_v15, %v6203_v14  ;;  %v8382_v14 = vld [vmem:[#allocation10 + $0x10] sm:$0xff] }
0x26ed   :  { %v6439_v21 = vpop.f32.mrf.mxu0  ;;  %v8085_v45 = vpop.f32.mrf.mxu1 }
0x26ee   :  { %v6516_v55 = vadd.f32 %v6439_v21, %v6130_v51  ;;  %v8385_v51 = vld [vmem:[%s9901_s24] sm:$0xff] }
0x26ef   :  { %v8080_v6 = vpop.f32.mrf.mxu0  ;;  %v6654_v56 = vpop.f32.mrf.mxu1 }
0x26f0   :  { %v6659_v10 = vmul.f32 0.35355338, %v6654_v56 }
0x26f1   :  { %v6584_v50 = vpop.f32.mrf.mxu0  ;;  %v8095_v42 = vpop.f32.mrf.mxu1 }
0x26f2   :  { %v6658_v2 = vmul.f32 0.35355338, %v6584_v50  ;;  %v6663_v31 = vsel %vm956_vm6, %v6659_v10, -inf }
0x26f3   :  { %6664 = vmax.xlane.f32.xlu0 %v6663_v31  ;;  %v8090_v23 = vpop.f32.mrf.mxu0 }
0x26f4   :  { %v6660_v28 = vsel %vm956_vm6, %v6658_v2, -inf }
0x26f5   :  { %6661 = vmax.xlane.f32.xlu1 %v6660_v28 }
0x277c   :  { %v6665_v54 = vpop.xlane.xlu0 %6664 }
0x277d   :  { %v6667_v49 = vsub.f32 %v6659_v10, %v6665_v54 }
0x277e   :  { %v6662_v33 = vpop.xlane.xlu1 %6661 }
0x277f   :  { %v6670_v59 = vmul.f32 1.442695, %v6667_v49  ;;  %v6666_v60 = vsub.f32 %v6658_v2, %v6662_v33  ;;  %v8396_v49 = vld [vmem:[#allocation19] ss:$0 sm:$0xff] }
0x2781   :  { %8335 = vpow2.f32 %v6670_v59  ;;  %v6668_v61 = vmul.f32 1.442695, %v6666_v60  ;;  %v8397_v60 = vld [vmem:[#allocation21] ss:$0 sm:$0xff] }
0x2783   :  { %8337 = vpow2.f32 %v6668_v61 }
0x278e   :  { %v8336_v62 = vpop.eup %8335 }
0x278f   :  { %v6675_v58 = vsel %vm956_vm6, %v8336_v62, 0.0 }
0x2790   :  { %v8338_v63 = vpop.eup %8337  ;;  %6676 = vadd.xlane.f32.xlu0 %v6675_v58 }
0x2791   :  { %v6672_v9 = vsel %vm956_vm6, %v8338_v63, 0.0 }
0x2792   :  { %6673 = vadd.xlane.f32.xlu1 %v6672_v9 }
0x2819   :  { %v6677_v12 = vpop.xlane.xlu0 %6676 }
0x281a   :  { %8339 = vrcp.f32 %v6677_v12 }
0x281b   :  { %v6674_v13 = vpop.xlane.xlu1 %6673 }
0x281c   :  { %8341 = vrcp.f32 %v6674_v13 }
0x2827   :  { %v8340_v38 = vpop.eup %8339 }
0x2828   :  { %v6681_v47 = vmul.f32 %v8340_v38, %v8336_v62 }
0x2829   :  { %v8342_v24 = vpop.eup %8341 }
0x282a   :  { %8104 = vmatmul.mubr.msk.f32.vlgmr.msra.gmra.mxu1 %vm956_vm6, %v6681_v47  ;;  %v6680_v3 = vmul.f32 %v8342_v24, %v8338_v63  ;;  %v8398_v63 = vld [vmem:[#allocation13] ss:$0 sm:$0xff] }
0x282b   :  { %8118 = vmatpush3.msra.mxu1 %v8379_v1 }
0x282c   :  { %8099 = vmatmul.mubr.msk.f32.vlgmr.msra.gmra.mxu0 %vm956_vm6, %v6680_v3  ;;  %8119 = vmatprep.subr.mxu1 %v8381_v57  ;;  %v8399_v3 = vld [vmem:[#allocation15] ss:$0 sm:$0xff] }
0x282d   :  { %8107 = vmatpush3.msra.mxu0 %v8380_v5  ;;  %8120 = vmatpush3.msra.mxu1 %v8381_v57 }
0x282e   :  { %8108 = vmatprep.subr.mxu0 %v8382_v14  ;;  %8121 = vmatprep.subr.mxu1 %v8383_v19 }
0x282f   :  { %8109 = vmatpush3.msra.mxu0 %v8382_v14  ;;  %8122 = vmatpush3.msra.mxu1 %v8383_v19 }
0x2830   :  { %8110 = vmatprep.subr.mxu0 %v8384_v20  ;;  %8123 = vmatprep.subr.mxu1 %v8385_v51 }
0x2831   :  { %8111 = vmatpush3.msra.mxu0 %v8384_v20  ;;  %8124 = vmatpush3.msra.mxu1 %v8385_v51 }
0x2832   :  { %8112 = vmatprep.subr.mxu0 %v8386_v17 }
0x2833   :  { %8113 = vmatpush3.msra.mxu0 %v8386_v17 }
0x2834   :  { %8128 = vmatprep.subr.mxu0 %v8387_v18 }
0x28ea   :  { %v6824_v48 = vpop.f32.mrf.mxu1 }
0x28eb   :  { %v6829_v46 = vadd.f32 %v6824_v48, %v9813_v11 }
0x28ec   :  { %v6751_v25 = vpop.f32.mrf.mxu0  ;;  %v8105_v52 = vpop.f32.mrf.mxu1 }
0x28ed   :  { %v6828_v34 = vadd.f32 %v6751_v25, %v6516_v55 }
0x28ee   :  { %v8100_v27 = vpop.f32.mrf.mxu0 }
0x28ef   :  { %8114 = vmatprep.mubr.msk.f32.mxu0 %vm406_vm0, %v6828_v34 }
0x28f0   :  { %8115 = vmatmul.mubr.msk.f32.vlgmr.msra.gmra.mxu0 %vm406_vm0, %v6829_v46 }
0x28f1   :  { %8129 = vmatpush3.msra.mxu0 %v8387_v18 }
0x28f2   :  { %8130 = vmatprep.subr.mxu0 %v8388_v41 }
0x28f3   :  { %8131 = vmatpush3.msra.mxu0 %v8388_v41 }
0x28f4   :  { %8132 = vmatprep.subr.mxu0 %v8389_v29 }
0x28f5   :  { %8133 = vmatpush3.msra.mxu0 %v8389_v29 }
0x28f6   :  { %8134 = vmatprep.subr.mxu0 %v8390_v22 }
0x28f7   :  { %8135 = vmatpush3.msra.mxu0 %v8390_v22 }
0x28f8   :  { %8136 = vmatprep.subr.mxu0 %v8391_v0 }
0x28f9   :  { %8137 = vmatpush3.msra.mxu0 %v8391_v0 }
0x28fa   :  { %8138 = vmatprep.subr.mxu0 %v8392_v8 }
0x28fb   :  { %8139 = vmatpush3.msra.mxu0 %v8392_v8 }
0x28fc   :  { %8140 = vmatprep.subr.mxu0 %v8393_v16 }
0x28fd   :  { %8141 = vmatpush3.msra.mxu0 %v8393_v16 }
0x28fe   :  { %8142 = vmatprep.subr.mxu0 %v8394_v30 }
0x28ff   :  { %8143 = vmatpush3.msra.mxu0 %v8394_v30 }
0x29b0   :  { %v8116_v35 = vpop.f32.mrf.mxu0 }
0x29b1   :  { %v6908_v40 = vadd.f32 %v8395_v37, %v8116_v35 }
0x29b2   :  { %v6902_v26 = vpop.f32.mrf.mxu0 }
0x29b3   :  { %v6903_v43 = vadd.f32 %v8395_v37, %v6902_v26  ;;  %v6912_v36 = vadd.f32 %v6908_v40, %v9683_v4 }
0x29b5   :  { %v6916_v44 = vsel %vm406_vm0, %v6912_v36, 0.0  ;;  %v6911_v32 = vadd.f32 %v6903_v43, %v9685_v7 }
0x29b6   :  { %6917 = vadd.xlane.f32.xlu0 %v6916_v44  ;;  %v8400_v44 = vld [vmem:[#allocation22] ss:$0 sm:$0xff] }
0x29b7   :  { %v6913_v39 = vsel %vm406_vm0, %v6911_v32, 0.0 }
0x29b8   :  { %6914 = vadd.xlane.f32.xlu1 %v6913_v39 }
0x2a3f   :  { %v6918_v53 = vpop.xlane.xlu0 %6917 }
0x2a40   :  { %v6920_v1 = vmul.f32 0.03125, %v6918_v53  ;;  %v8401_v53 = vld [vmem:[#allocation24] ss:$0 sm:$0xff] }
0x2a41   :  { %v6915_v5 = vpop.xlane.xlu1 %6914 }
0x2a42   :  { %v6922_v15 = vsub.f32 %v6912_v36, %v6920_v1  ;;  %v6919_v11 = vmul.f32 0.03125, %v6915_v5 }
0x2a44   :  { %v6921_v21 = vsub.f32 %v6911_v32, %v6919_v11  ;;  %v6924_v45 = vmul.f32 %v6922_v15, %v6922_v15 }
0x2a46   :  { %v6928_v55 = vsel %vm406_vm0, %v6924_v45, 0.0  ;;  %v6923_v6 = vmul.f32 %v6921_v21, %v6921_v21 }
0x2a47   :  { %6929 = vadd.xlane.f32.xlu0 %v6928_v55 }
0x2a48   :  { %v6925_v4 = vsel %vm406_vm0, %v6923_v6, 0.0 }
0x2a49   :  { %6926 = vadd.xlane.f32.xlu1 %v6925_v4 }
0x2ad0   :  { %v6930_v56 = vpop.xlane.xlu0 %6929 }
0x2ad1   :  { %v6932_v7 = vmul.f32 0.03125, %v6930_v56 }
0x2ad2   :  { %v6927_v10 = vpop.xlane.xlu1 %6926 }
0x2ad3   :  { %v6934_v50 = vadd.f32 1e-05, %v6932_v7  ;;  %v6931_v42 = vmul.f32 0.03125, %v6927_v10 }
0x2ad5   :  { %8343 = vrsqrt.f32 %v6934_v50  ;;  %v6933_v2 = vadd.f32 1e-05, %v6931_v42 }
0x2ad7   :  { %8345 = vrsqrt.f32 %v6933_v2 }
0x2ae2   :  { %v8344_v31 = vpop.eup %8343 }
0x2ae3   :  { %v6938_v23 = vmul.f32 %v8344_v31, %v6922_v15 }
0x2ae4   :  { %v8346_v28 = vpop.eup %8345 }
0x2ae5   :  { %v6937_v54 = vmul.f32 %v8346_v28, %v6921_v21  ;;  %v6940_v33 = vmul.f32 %v8396_v49, %v6938_v23 }
0x2ae7   :  { %v6939_v59 = vmul.f32 %v8396_v49, %v6937_v54  ;;  %v6942_v62 = vadd.f32 %v8397_v60, %v6940_v33 }
0x2ae9   :  { %v6941_v61 = vadd.f32 %v8397_v60, %v6939_v59  ;;  %v7401_v60 = vld [vmem:[#allocation25] ss:$0 sm:$0xff] }
0x2aeb   :  { %8125 = vmatprep.mubr.msk.f32.mxu1 %vm406_vm0, %v6941_v61 }
0x2aec   :  { %8126 = vmatmul.mubr.msk.f32.vlgmr.msra.gmra.mxu1 %vm406_vm0, %v6942_v62 }
0x2bac   :  { %v8127_v58 = vpop.f32.mrf.mxu1 }
0x2bad   :  { %v7021_v9 = vadd.f32 %v8398_v63, %v8127_v58  ;;  %v7402_v58 = vld [vmem:[#allocation27] ss:$0 sm:$0xff] }
0x2bae   :  { %v7015_v12 = vpop.f32.mrf.mxu1 }
0x2baf   :  { %v7016_v13 = vadd.f32 %v8398_v63, %v7015_v12  ;;  %v7025_v47 = vmax.f32 %v7021_v9, 0.0 }
0x2bb1   :  { %v7024_v38 = vmax.f32 %v7016_v13, 0.0 }
0x2bb3   :  { %8144 = vmatprep.mubr.msk.f32.mxu0 %vm3798_vm13, %v7024_v38 }
0x2bb4   :  { %8145 = vmatmul.mubr.msk.f32.vlgmr.msra.gmra.mxu0 %vm3798_vm13, %v7025_v47 }
0x2c74   :  { %v8146_v24 = vpop.f32.mrf.mxu0 }
0x2c75   :  { %v7104_v57 = vadd.f32 %v8399_v3, %v8146_v24 }
0x2c76   :  { %v7098_v14 = vpop.f32.mrf.mxu0 }
0x2c77   :  { %v7099_v19 = vadd.f32 %v8399_v3, %v7098_v14  ;;  %v7108_v20 = vadd.f32 %v7104_v57, %v6942_v62 }
0x2c79   :  { %v7112_v51 = vsel %vm406_vm0, %v7108_v20, 0.0  ;;  %v7107_v17 = vadd.f32 %v7099_v19, %v6941_v61 }
0x2c7a   :  { %7113 = vadd.xlane.f32.xlu0 %v7112_v51 }
0x2c7b   :  { %v7109_v18 = vsel %vm406_vm0, %v7107_v17, 0.0 }
0x2c7c   :  { %7110 = vadd.xlane.f32.xlu1 %v7109_v18 }
0x2d03   :  { %v7114_v48 = vpop.xlane.xlu0 %7113 }
0x2d04   :  { %v7116_v25 = vmul.f32 0.03125, %v7114_v48 }
0x2d05   :  { %v7111_v52 = vpop.xlane.xlu1 %7110 }
0x2d06   :  { %v7118_v34 = vsub.f32 %v7108_v20, %v7116_v25  ;;  %v7115_v46 = vmul.f32 0.03125, %v7111_v52 }
0x2d08   :  { %v7117_v27 = vsub.f32 %v7107_v17, %v7115_v46  ;;  %v7120_v41 = vmul.f32 %v7118_v34, %v7118_v34 }
0x2d0a   :  { %v7124_v29 = vsel %vm406_vm0, %v7120_v41, 0.0  ;;  %v7119_v22 = vmul.f32 %v7117_v27, %v7117_v27 }
0x2d0b   :  { %7125 = vadd.xlane.f32.xlu0 %v7124_v29 }
0x2d0c   :  { %v7121_v0 = vsel %vm406_vm0, %v7119_v22, 0.0 }
0x2d0d   :  { %7122 = vadd.xlane.f32.xlu1 %v7121_v0 }
0x2d94   :  { %v7126_v8 = vpop.xlane.xlu0 %7125 }
0x2d95   :  { %v7128_v16 = vmul.f32 0.03125, %v7126_v8 }
0x2d96   :  { %v7123_v30 = vpop.xlane.xlu1 %7122 }
0x2d97   :  { %v7130_v35 = vadd.f32 1e-05, %v7128_v16  ;;  %v7127_v37 = vmul.f32 0.03125, %v7123_v30 }
0x2d99   :  { %8347 = vrsqrt.f32 %v7130_v35  ;;  %v7129_v40 = vadd.f32 1e-05, %v7127_v37 }
0x2d9b   :  { %8349 = vrsqrt.f32 %v7129_v40 }
0x2da6   :  { %v8348_v26 = vpop.eup %8347 }
0x2da7   :  { %v7134_v43 = vmul.f32 %v8348_v26, %v7118_v34 }
0x2da8   :  { %v8350_v36 = vpop.eup %8349 }
0x2da9   :  { %v7136_v32 = vmul.f32 %v8400_v44, %v7134_v43  ;;  %v7133_v39 = vmul.f32 %v8350_v36, %v7117_v27 }
0x2dab   :  { %v7138_v1 = vadd.f32 %v8401_v53, %v7136_v32  ;;  %v7135_v5 = vmul.f32 %v8400_v44, %v7133_v39 }
0x2dad   :  { %v7142_v15 = vsel %vm406_vm0, %v7138_v1, 0.0  ;;  %v7137_v11 = vadd.f32 %v8401_v53, %v7135_v5 }
0x2dae   :  { %7143 = vadd.xlane.f32.xlu0 %v7142_v15 }
0x2daf   :  { %v7139_v21 = vsel %vm406_vm0, %v7137_v11, 0.0 }
0x2db0   :  { %7140 = vadd.xlane.f32.xlu1 %v7139_v21 }
0x2e37   :  { %v7144_v45 = vpop.xlane.xlu0 %7143 }
0x2e38   :  { %v7146_v55 = vmul.f32 0.03125, %v7144_v45 }
0x2e39   :  { %v7141_v6 = vpop.xlane.xlu1 %7140 }
0x2e3a   :  { %v7148_v4 = vsub.f32 %v7138_v1, %v7146_v55  ;;  %v7145_v56 = vmul.f32 0.03125, %v7141_v6 }
0x2e3c   :  { %v7147_v7 = vsub.f32 %v7137_v11, %v7145_v56  ;;  %v7150_v10 = vmul.f32 %v7148_v4, %v7148_v4 }
0x2e3e   :  { %v7154_v50 = vsel %vm406_vm0, %v7150_v10, 0.0  ;;  %v7149_v42 = vmul.f32 %v7147_v7, %v7147_v7 }
0x2e3f   :  { %7155 = vadd.xlane.f32.xlu0 %v7154_v50 }
0x2e40   :  { %v7151_v2 = vsel %vm406_vm0, %v7149_v42, 0.0 }
0x2e41   :  { %7152 = vadd.xlane.f32.xlu1 %v7151_v2 }
0x2ec8   :  { %v7156_v31 = vpop.xlane.xlu0 %7155 }
0x2ec9   :  { %v7158_v23 = vmul.f32 0.03125, %v7156_v31 }
0x2eca   :  { %v7153_v28 = vpop.xlane.xlu1 %7152 }
0x2ecb   :  { %v7160_v54 = vadd.f32 1e-05, %v7158_v23  ;;  %v7157_v49 = vmul.f32 0.03125, %v7153_v28 }
0x2ecd   :  { %8351 = vrsqrt.f32 %v7160_v54  ;;  %v7159_v33 = vadd.f32 1e-05, %v7157_v49 }
0x2ecf   :  { %8353 = vrsqrt.f32 %v7159_v33 }
0x2eda   :  { %v8352_v59 = vpop.eup %8351 }
0x2edb   :  { %v7164_v61 = vmul.f32 %v8352_v59, %v7148_v4 }
0x2edc   :  { %v8354_v62 = vpop.eup %8353 }
0x2edd   :  { %v7172_v63 = vmul.f32 %v7401_v60, %v7164_v61  ;;  %v7163_v9 = vmul.f32 %v8354_v62, %v7147_v7 }
0x2edf   :  { %v7180_v12 = vadd.f32 %v7402_v58, %v7172_v63  ;;  %v7171_v13 = vmul.f32 %v7401_v60, %v7163_v9 }
0x2ee1   :  { %7182 = vst.msk [vmem:[%s8970_s21 + $0x8] sm:$0xff] %vm406_vm0, %v7180_v12  ;;  %v7179_v38 = vadd.f32 %v7402_v58, %v7171_v13 }
0x2ee3   :  { %7181 = vst.msk [vmem:[%s8970_s21] sm:$0xff] %vm406_vm0, %v7179_v38 }
0x2ee4   :  { %7187 = vsyncpa [#allocation3], 1 }
0x2ee5   :  { %7188 = vsyncpa [#allocation5], 1 }
0x2ee6   :  { %7189 = vsyncpa [#allocation8], 1 }
0x2ee7   :  { %7190 = vsyncpa [#allocation11], 1 }
0x2ee8   :  { %7191 = vsyncpa [#allocation14], 1 }
0x2ee9   :  { %7192 = vsyncpa [#allocation17], 1 }
0x2eea   :  { %7193 = vsyncpa [#allocation20], 1 }
0x2eeb   :  { %7194 = vsyncpa [#allocation23], 1 }
0x2eec   :  { %7195 = vsyncpa [#allocation26], 1 }

</bundles_post_ra>
